<compile_context>
chip_gen: v7x
topology: tpu7x:2x2x1
jax: 0.10.0
libtpu: 0.0.40
codegen_flags: <defaults>
</compile_context>

<pallas_src>
import functools

import jax
import jax.numpy as jnp
from jax.experimental import pallas as pl
from jax.experimental.pallas import tpu as pltpu


def _full_spec(shape):
    nd = len(shape)
    return pl.BlockSpec(shape, lambda *_: (0,) * nd)


# --------------------------- fused decoder kernel ---------------------------
def _decoder_kernel(feat_ref, qe_ref, mg_in_ref,
                    wfold_ref, bfold_ref,
                    wq_ref, bq_ref, wkv_ref, bkv_ref, wo_ref, bo_ref,
                    lng_ref, lnb_ref,
                    w1_ref, b1_ref, w2_ref, b2_ref,
                    wpool_ref, pbias_ref,
                    logits_ref,
                    tgt_s, mi_s, mg_s,
                    *, nheads, eps):
    f32 = jnp.float32
    bf16 = jnp.bfloat16
    H = nheads
    E = tgt_s.shape[-1]
    Dh = E // H
    scale = float(Dh) ** -0.5
    layer = pl.program_id(1)

    @pl.when(layer == 0)
    def _init():
        # Stem folded in: per-pixel backbone->2048->hidden projection collapsed
        # to one (c, E) matmul (exact: the stand-in backbone has no nonlinearity
        # between the two linears).
        mi_s[...] = (jnp.dot(feat_ref[...].astype(bf16), wfold_ref[...],
                             preferred_element_type=f32) + bfold_ref[...])
        mg_s[...] = mg_in_ref[...]
        tgt_s[...] = qe_ref[...]

    def layer_norm(x, idx):
        mean = jnp.mean(x, axis=-1, keepdims=True)
        xc = x - mean
        var = jnp.mean(xc * xc, axis=-1, keepdims=True)
        return xc * jax.lax.rsqrt(var + eps) * lng_ref[idx] + lnb_ref[idx]

    def mha(m, q, kv):
        # NOTE: weights are stored "pre-transposed" (we compute x @ W) relative
        # to torch.nn.MultiheadAttention's x @ in_proj_weight.T / out_proj.weight.T;
        # indistinguishable for random init, real checkpoints would need a
        # transpose (and K/V concat) on load.
        qf = (jnp.dot(q.astype(bf16), wq_ref[m], preferred_element_type=f32)
              + bq_ref[m])                                            # (Lq, E)
        kvf = (jnp.dot(kv.astype(bf16), wkv_ref[m], preferred_element_type=f32)
               + bkv_ref[m])                                          # (Lk, 2E)
        # Head-major stacks (H, L, Dh) built from static lane slices (no
        # minor-dim reshapes, no major-dim transposes).
        qh = jnp.stack([qf[:, h * Dh:(h + 1) * Dh] for h in range(H)], axis=0)
        kh = jnp.stack([kvf[:, h * Dh:(h + 1) * Dh] for h in range(H)], axis=0)
        vh = jnp.stack([kvf[:, E + h * Dh:E + (h + 1) * Dh] for h in range(H)],
                       axis=0)
        s = jnp.einsum('hqd,hkd->hqk', qh.astype(bf16), kh.astype(bf16),
                       preferred_element_type=f32) * scale            # (H,Lq,Lk)
        s = s - jnp.max(s, axis=-1, keepdims=True)
        pw = jnp.exp(s)
        pw = pw * pl.reciprocal(jnp.sum(pw, axis=-1, keepdims=True), approx=True)
        oh = jnp.einsum('hqk,hkd->hqd', pw.astype(bf16), vh.astype(bf16),
                        preferred_element_type=f32)                   # (H,Lq,Dh)
        cat = jnp.concatenate([oh[h] for h in range(H)], axis=-1)     # (Lq, E)
        return (jnp.dot(cat.astype(bf16), wo_ref[m], preferred_element_type=f32)
                + bo_ref[m])

    t = tgt_s[...]
    mi = mi_s[...]
    mg = mg_s[...]

    # Reference forward_post with eval-mode dropout == identity:
    #   tgt = norm1(tgt + dropout1(tgt)) -> norm1(2 * tgt)  (exact reproduction)
    t = layer_norm(t + t, 0)
    t = layer_norm(t + mha(0, t, mi), 1)              # multihead_attn      ; norm2
    t2 = layer_norm(mi + mha(1, mi, mg), 3)           # attn_image          ; norm4
    t3 = layer_norm(mg + mha(2, mg, mi), 4)           # attn_graph          ; norm5
    t4 = layer_norm(t2 + mha(3, t2, t3), 5)           # cross_graph_to_img  ; norm6
    hmid = jnp.maximum(
        jnp.dot(t.astype(bf16), w1_ref[...], preferred_element_type=f32)
        + b1_ref[...], 0.0)
    hout = (jnp.dot(hmid.astype(bf16), w2_ref[...], preferred_element_type=f32)
            + b2_ref[...])
    t = layer_norm(t + hout, 2)                       # mlp_img_to_img      ; norm3

    tgt_s[...] = t
    mi_s[...] = t4
    mg_s[...] = t3

    @pl.when(layer == pl.num_programs(1) - 1)
    def _head():
        # GroupFC (only the last layer's output is used): logits[i] = <t[i], w[i]> + b.
        row = jnp.sum(t * wpool_ref[...], axis=-1) + pbias_ref[0]     # (nc,)
        logits_ref[...] = row.reshape(1, row.shape[0])


def decoder_call(feat, mem_graph, p, cfg):
    N, S, c = feat.shape
    E = cfg['hidden_dim']
    nc = cfg['num_class']
    G = mem_graph.shape[1]
    kernel = functools.partial(_decoder_kernel, nheads=cfg['nheads'], eps=1e-5)
    return pl.pallas_call(
        kernel,
        out_shape=jax.ShapeDtypeStruct((N, 1, nc), jnp.float32),
        grid=(N, cfg['dec_layers']),
        in_specs=[
            pl.BlockSpec((None, S, c), lambda n, l: (n, 0, 0)),       # feat (per-n)
            _full_spec((nc, E)),                                      # query_embed
            pl.BlockSpec((None, G, E), lambda n, l: (n, 0, 0)),       # memory_graph (per-n)
            _full_spec(tuple(p['w_fold'].shape)),
            _full_spec(tuple(p['b_fold'].shape)),
            _full_spec(tuple(p['wq'].shape)),
            _full_spec(tuple(p['bq'].shape)),
            _full_spec(tuple(p['wkv'].shape)),
            _full_spec(tuple(p['bkv'].shape)),
            _full_spec(tuple(p['wo'].shape)),
            _full_spec(tuple(p['bo'].shape)),
            _full_spec(tuple(p['ln_g'].shape)),
            _full_spec(tuple(p['ln_b'].shape)),
            _full_spec(tuple(p['mlp_w1'].shape)),
            _full_spec(tuple(p['mlp_b1'].shape)),
            _full_spec(tuple(p['mlp_w2'].shape)),
            _full_spec(tuple(p['mlp_b2'].shape)),
            _full_spec(tuple(p['wpool'].shape)),
            pl.BlockSpec(memory_space=pltpu.MemorySpace.SMEM),        # scalar bias
        ],
        out_specs=pl.BlockSpec((None, 1, nc), lambda n, l: (n, 0, 0)),
        scratch_shapes=[pltpu.VMEM((nc, E), jnp.float32),   # tgt
                        pltpu.VMEM((S, E), jnp.float32),    # memory_image
                        pltpu.VMEM((G, E), jnp.float32)],   # memory_graph
        compiler_params=pltpu.CompilerParams(
            dimension_semantics=("parallel", "arbitrary")),
    )(feat, p['query_embed'], mem_graph,
      p['w_fold'], p['b_fold'],
      p['wq'], p['bq'], p['wkv'], p['bkv'], p['wo'], p['bo'],
      p['ln_g'], p['ln_b'],
      p['mlp_w1'], p['mlp_b1'], p['mlp_w2'], p['mlp_b2'],
      p['wpool'], p['pool_bias'])


# --------------------------- image glue (XLA) --------------------------------
def crop_and_pool(x, crop_levels, img_size):
    """Batched crop_forward + backbone stand-in pooling.  Returns (bs, S, c)."""
    bs, c, _, wid = x.shape
    crop_dist = (wid // crop_levels) if crop_levels != 0 else wid
    crops = []
    for j in range(1, crop_levels + 1):
        for k in range(1, crop_levels + 1):
            crops.append(x[:, :, crop_dist * (k - 1):crop_dist * k,
                           crop_dist * (j - 1):crop_dist * j])
    full_r = jax.image.resize(x, (bs, c, img_size, img_size), method='bilinear')
    if crops:
        ncrop = len(crops)
        stacked = jnp.stack(crops, 0).reshape(ncrop * bs, c, crop_dist, crop_dist)
        crops_r = jax.image.resize(stacked, (ncrop * bs, c, img_size, img_size),
                                   method='bilinear')
        allr = jnp.concatenate(
            [crops_r.reshape(ncrop, bs, c, img_size, img_size), full_r[None]], 0)
    else:
        allr = full_r[None]
    n_img = allr.shape[0]
    fh = fw = img_size // 8
    # TODO(synk): the reference `backbone` is an external module; stand-in is a
    # stride-8 average pool followed by the folded per-pixel linear done inside
    # the decoder kernel at layer 0.
    pooled = allr.reshape(n_img, bs, c, fh, 8, fw, 8).mean(axis=(4, 6))
    feat = pooled.transpose(1, 0, 3, 4, 2).reshape(bs, n_img * fh * fw, c)
    return feat, n_img * fh * fw


# --------------------------- forward ----------------------------------------
def llcd_transformer_forward(p, x, cfg):
    bs = x.shape[0]
    hidden = cfg['hidden_dim']
    nc = cfg['num_class']

    feat, _ = crop_and_pool(x, cfg['crop_levels'], cfg['img_size'])   # (bs, S, c)

    # TODO(synk): positional embeddings from the reference backbone are never
    # used inside LLCD_Layer.forward_post, so they are not computed.

    # TODO(synk): GATN graph encoder is not defined in the source; deterministic
    # tanh-linear stand-in.  It is input-independent and tiny, so it stays in
    # XLA; the reference's repeat + eye + .view(dmod, bs, dmod) interleave is
    # reproduced exactly below.
    adj = jnp.tanh(p['query_embed'].T @ p['gatn_w'] + p['gatn_b'])    # (d, d)
    adjMat = jnp.tile(adj[None], (bs, 1, 1)) + jnp.eye(hidden, dtype=jnp.float32)
    adjMat = adjMat.reshape(hidden, bs, hidden)                       # torch .view
    mem_graph = adjMat.transpose(1, 0, 2)                             # (bs, G, E)

    logits = decoder_call(feat, mem_graph, p, cfg)                    # (bs, 1, nc)
    return logits.reshape(bs, nc)


# --------------------------- parameter init ----------------------------------
class _KeyGen:
    def __init__(self, key):
        self.key = key

    def __call__(self):
        self.key, sub = jax.random.split(self.key)
        return sub


def _w(kg, shape, scale=0.05):
    return scale * jax.random.normal(kg(), shape, jnp.float32)


def _mha_raw(kg, d):
    return dict(wq=_w(kg, (d, d)), bq=_w(kg, (d,)),
                wk=_w(kg, (d, d)), bk=_w(kg, (d,)),
                wv=_w(kg, (d, d)), bv=_w(kg, (d,)),
                wo=_w(kg, (d, d)), bo=_w(kg, (d,)))


def init_params(key, cfg, c_in):
    kg = _KeyGen(key)
    d = cfg['hidden_dim']
    dff = cfg['dim_feedforward']
    nc = cfg['num_class']
    H = cfg['nheads']
    assert d % H == 0 and cfg['img_size'] % 8 == 0

    # backbone per-pixel linear (c->2048) and embed_standart (2048->d), folded
    # exactly into one (c, d) weight / (1, d) bias (no nonlinearity between).
    backbone_w = _w(kg, (c_in, 2048))
    backbone_b = _w(kg, (1, 2048))
    embed_w = _w(kg, (2048, d))
    embed_b = _w(kg, (1, d))
    w_fold = (backbone_w @ embed_w).astype(jnp.bfloat16)
    b_fold = backbone_b @ embed_w + embed_b

    # module order: [multihead_attn, attn_image, attn_graph, cross_graph_to_img]
    mods = [_mha_raw(kg, d) for _ in range(4)]
    wq = jnp.stack([m['wq'] for m in mods], 0).astype(jnp.bfloat16)          # (4,d,d)
    bq = jnp.stack([m['bq'].reshape(1, d) for m in mods], 0)                 # (4,1,d)
    wkv = jnp.stack([jnp.concatenate([m['wk'], m['wv']], axis=1)
                     for m in mods], 0).astype(jnp.bfloat16)                 # (4,d,2d)
    bkv = jnp.stack([jnp.concatenate([m['bk'], m['bv']]).reshape(1, 2 * d)
                     for m in mods], 0)                                      # (4,1,2d)
    wo = jnp.stack([m['wo'] for m in mods], 0).astype(jnp.bfloat16)          # (4,d,d)
    bo = jnp.stack([m['bo'].reshape(1, d) for m in mods], 0)                 # (4,1,d)

    return dict(
        w_fold=w_fold, b_fold=b_fold,
        query_embed=_w(kg, (nc, d)),
        gatn_w=_w(kg, (nc, d)), gatn_b=_w(kg, (1, d)),
        wq=wq, bq=bq, wkv=wkv, bkv=bkv, wo=wo, bo=bo,
        ln_g=jnp.ones((6, 1, d), jnp.float32),      # norm1..norm6 gamma
        ln_b=jnp.zeros((6, 1, d), jnp.float32),     # norm1..norm6 beta
        mlp_w1=_w(kg, (d, dff)).astype(jnp.bfloat16), mlp_b1=_w(kg, (1, dff)),
        mlp_w2=_w(kg, (dff, d)).astype(jnp.bfloat16), mlp_b2=_w(kg, (1, d)),
        wpool=_w(kg, (nc, d)),                      # duplicate_pooling (nc,d,1) squeezed
        pool_bias=jnp.array([0.1], jnp.float32),    # duplicate_pooling_bias (scalar)
    )


# --------------------------- main ---------------------------------------------
if __name__ == "__main__":
    CFG = dict(hidden_dim=32, nheads=4, dim_feedforward=64,
               num_class=8, dec_layers=2, crop_levels=2, img_size=16)

    key = jax.random.PRNGKey(0)
    k_in, k_par = jax.random.split(key)
    bs, c, h, w = 2, 4, 16, 16
    x = jax.random.normal(k_in, (bs, c, h, w), jnp.float32)

    params = init_params(k_par, CFG, c_in=c)

    fwd = jax.jit(lambda p, inp: llcd_transformer_forward(p, inp, CFG))
    logits = jax.block_until_ready(fwd(params, x))

    assert logits.shape == (bs, CFG['num_class']), logits.shape
    assert bool(jnp.all(jnp.isfinite(logits)))
    print("KERNEL_OK")
</pallas_src>

<mosaic_0001>
module attributes {stable_mosaic.version = 11 : i64} {
  func.func @_decoder_kernel(%arg0: i32, %arg1: i32, %arg2: memref<1x20x4xf32, #tpu.memory_space<vmem>>, %arg3: memref<8x32xf32, #tpu.memory_space<vmem>>, %arg4: memref<1x32x32xf32, #tpu.memory_space<vmem>>, %arg5: memref<4x32xbf16, #tpu.memory_space<vmem>>, %arg6: memref<1x32xf32, #tpu.memory_space<vmem>>, %arg7: memref<4x32x32xbf16, #tpu.memory_space<vmem>>, %arg8: memref<4x1x32xf32, #tpu.memory_space<vmem>>, %arg9: memref<4x32x64xbf16, #tpu.memory_space<vmem>>, %arg10: memref<4x1x64xf32, #tpu.memory_space<vmem>>, %arg11: memref<4x32x32xbf16, #tpu.memory_space<vmem>>, %arg12: memref<4x1x32xf32, #tpu.memory_space<vmem>>, %arg13: memref<6x1x32xf32, #tpu.memory_space<vmem>>, %arg14: memref<6x1x32xf32, #tpu.memory_space<vmem>>, %arg15: memref<32x64xbf16, #tpu.memory_space<vmem>>, %arg16: memref<1x64xf32, #tpu.memory_space<vmem>>, %arg17: memref<64x32xbf16, #tpu.memory_space<vmem>>, %arg18: memref<1x32xf32, #tpu.memory_space<vmem>>, %arg19: memref<8x32xf32, #tpu.memory_space<vmem>>, %arg20: memref<1xf32, #tpu.memory_space<smem>>, %arg21: memref<1x1x8xf32, #tpu.memory_space<vmem>>, %arg22: memref<8x32xf32, #tpu.memory_space<vmem>>, %arg23: memref<20x32xf32, #tpu.memory_space<vmem>>, %arg24: memref<32x32xf32, #tpu.memory_space<vmem>>) attributes {dimension_semantics = [#tpu.dimension_semantics<parallel>, #tpu.dimension_semantics<arbitrary>], iteration_bounds = array<i64: 2, 2>, scalar_prefetch = 0 : i64, scratch_operands = 3 : i64, tpu.core_type = #tpu.core_type<tc>, window_params = [{transform_indices = @transform_0, window_bounds = array<i64: 1, 20, 4>}, {pipeline_mode = #tpu.pipeline_mode<synchronous>, transform_indices = @transform_1, window_bounds = array<i64: 8, 32>}, {transform_indices = @transform_2, window_bounds = array<i64: 1, 32, 32>}, {pipeline_mode = #tpu.pipeline_mode<synchronous>, transform_indices = @transform_3, window_bounds = array<i64: 4, 32>}, {pipeline_mode = #tpu.pipeline_mode<synchronous>, transform_indices = @transform_4, window_bounds = array<i64: 1, 32>}, {pipeline_mode = #tpu.pipeline_mode<synchronous>, transform_indices = @transform_5, window_bounds = array<i64: 4, 32, 32>}, {pipeline_mode = #tpu.pipeline_mode<synchronous>, transform_indices = @transform_6, window_bounds = array<i64: 4, 1, 32>}, {pipeline_mode = #tpu.pipeline_mode<synchronous>, transform_indices = @transform_7, window_bounds = array<i64: 4, 32, 64>}, {pipeline_mode = #tpu.pipeline_mode<synchronous>, transform_indices = @transform_8, window_bounds = array<i64: 4, 1, 64>}, {pipeline_mode = #tpu.pipeline_mode<synchronous>, transform_indices = @transform_9, window_bounds = array<i64: 4, 32, 32>}, {pipeline_mode = #tpu.pipeline_mode<synchronous>, transform_indices = @transform_10, window_bounds = array<i64: 4, 1, 32>}, {pipeline_mode = #tpu.pipeline_mode<synchronous>, transform_indices = @transform_11, window_bounds = array<i64: 6, 1, 32>}, {pipeline_mode = #tpu.pipeline_mode<synchronous>, transform_indices = @transform_12, window_bounds = array<i64: 6, 1, 32>}, {pipeline_mode = #tpu.pipeline_mode<synchronous>, transform_indices = @transform_13, window_bounds = array<i64: 32, 64>}, {pipeline_mode = #tpu.pipeline_mode<synchronous>, transform_indices = @transform_14, window_bounds = array<i64: 1, 64>}, {pipeline_mode = #tpu.pipeline_mode<synchronous>, transform_indices = @transform_15, window_bounds = array<i64: 64, 32>}, {pipeline_mode = #tpu.pipeline_mode<synchronous>, transform_indices = @transform_16, window_bounds = array<i64: 1, 32>}, {pipeline_mode = #tpu.pipeline_mode<synchronous>, transform_indices = @transform_17, window_bounds = array<i64: 8, 32>}, {transform_indices = @transform_18, window_bounds = array<i64: 1>}, {transform_indices = @transform_19, window_bounds = array<i64: 1, 1, 8>}]} {
    %c0_i32 = arith.constant 0 : i32
    %0 = arith.cmpi eq, %arg1, %c0_i32 : i32
    %1 = arith.extui %0 : i1 to i32
    %c0_i32_0 = arith.constant 0 : i32
    %2 = arith.cmpi ne, %1, %c0_i32_0 : i32
    scf.if %2 {
      %c0_188 = arith.constant 0 : index
      %c0_189 = arith.constant 0 : index
      %c0_190 = arith.constant 0 : index
      %488 = vector.load %arg2[%c0_188, %c0_189, %c0_190] : memref<1x20x4xf32, #tpu.memory_space<vmem>>, vector<1x20x4xf32>
      %489 = vector.shape_cast %488 : vector<1x20x4xf32> to vector<20x4xf32>
      %490 = arith.truncf %489 : vector<20x4xf32> to vector<20x4xbf16>
      %c0_191 = arith.constant 0 : index
      %c0_192 = arith.constant 0 : index
      %491 = vector.load %arg5[%c0_191, %c0_192] : memref<4x32xbf16, #tpu.memory_space<vmem>>, vector<4x32xbf16>
      %cst_193 = arith.constant dense<0.000000e+00> : vector<20x32xf32>
      %492 = tpu.matmul %490, %491, %cst_193 {dimension_numbers = #tpu.dot_dimension_numbers<[1], [0], [0], [1], [0, 0, 1, 1], [], []>} : vector<20x4xbf16>, vector<4x32xbf16>, vector<20x32xf32> -> vector<20x32xf32>
      %c0_194 = arith.constant 0 : index
      %c0_195 = arith.constant 0 : index
      %493 = vector.load %arg6[%c0_194, %c0_195] : memref<1x32xf32, #tpu.memory_space<vmem>>, vector<1x32xf32>
      %494 = vector.broadcast %493 : vector<1x32xf32> to vector<20x32xf32>
      %495 = arith.addf %492, %494 : vector<20x32xf32>
      %c0_196 = arith.constant 0 : index
      %c0_197 = arith.constant 0 : index
      %496 = vector.load %arg23[%c0_196, %c0_197] : memref<20x32xf32, #tpu.memory_space<vmem>>, vector<20x32xf32>
      tpu.vector_store %arg23[%c0_196, %c0_197], %495 {strides = array<i32>} : memref<20x32xf32, #tpu.memory_space<vmem>>, vector<20x32xf32>,
      %c0_198 = arith.constant 0 : index
      %c0_199 = arith.constant 0 : index
      %c0_200 = arith.constant 0 : index
      %497 = vector.load %arg4[%c0_198, %c0_199, %c0_200] : memref<1x32x32xf32, #tpu.memory_space<vmem>>, vector<1x32x32xf32>
      %498 = vector.shape_cast %497 : vector<1x32x32xf32> to vector<32x32xf32>
      %c0_201 = arith.constant 0 : index
      %c0_202 = arith.constant 0 : index
      %499 = vector.load %arg24[%c0_201, %c0_202] : memref<32x32xf32, #tpu.memory_space<vmem>>, vector<32x32xf32>
      tpu.vector_store %arg24[%c0_201, %c0_202], %498 {strides = array<i32>} : memref<32x32xf32, #tpu.memory_space<vmem>>, vector<32x32xf32>,
      %c0_203 = arith.constant 0 : index
      %c0_204 = arith.constant 0 : index
      %500 = vector.load %arg3[%c0_203, %c0_204] : memref<8x32xf32, #tpu.memory_space<vmem>>, vector<8x32xf32>
      %c0_205 = arith.constant 0 : index
      %c0_206 = arith.constant 0 : index
      %501 = vector.load %arg22[%c0_205, %c0_206] : memref<8x32xf32, #tpu.memory_space<vmem>>, vector<8x32xf32>
      tpu.vector_store %arg22[%c0_205, %c0_206], %500 {strides = array<i32>} : memref<8x32xf32, #tpu.memory_space<vmem>>, vector<8x32xf32>,
    } else {
    }
    %c0 = arith.constant 0 : index
    %c0_1 = arith.constant 0 : index
    %3 = vector.load %arg22[%c0, %c0_1] : memref<8x32xf32, #tpu.memory_space<vmem>>, vector<8x32xf32>
    %c0_2 = arith.constant 0 : index
    %c0_3 = arith.constant 0 : index
    %4 = vector.load %arg23[%c0_2, %c0_3] : memref<20x32xf32, #tpu.memory_space<vmem>>, vector<20x32xf32>
    %c0_4 = arith.constant 0 : index
    %c0_5 = arith.constant 0 : index
    %5 = vector.load %arg24[%c0_4, %c0_5] : memref<32x32xf32, #tpu.memory_space<vmem>>, vector<32x32xf32>
    %6 = arith.addf %3, %3 : vector<8x32xf32>
    %cst = arith.constant dense<0.000000e+00> : vector<8xf32>
    %7 = vector.multi_reduction <add>, %6, %cst [1] : vector<8x32xf32> to vector<8xf32>
    %8 = vector.shape_cast %7 : vector<8xf32> to vector<8x1xf32>
    %cst_6 = arith.constant 3.200000e+01 : f32
    %9 = vector.broadcast %cst_6 : f32 to vector<8x1xf32>
    %10 = arith.divf %8, %9 : vector<8x1xf32>
    %11 = vector.broadcast %10 : vector<8x1xf32> to vector<8x32xf32>
    %12 = arith.subf %6, %11 : vector<8x32xf32>
    %13 = arith.mulf %12, %12 : vector<8x32xf32>
    %cst_7 = arith.constant dense<0.000000e+00> : vector<8xf32>
    %14 = vector.multi_reduction <add>, %13, %cst_7 [1] : vector<8x32xf32> to vector<8xf32>
    %15 = vector.shape_cast %14 : vector<8xf32> to vector<8x1xf32>
    %cst_8 = arith.constant 3.200000e+01 : f32
    %16 = vector.broadcast %cst_8 : f32 to vector<8x1xf32>
    %17 = arith.divf %15, %16 : vector<8x1xf32>
    %cst_9 = arith.constant 9.99999974E-6 : f32
    %18 = vector.broadcast %cst_9 : f32 to vector<8x1xf32>
    %19 = arith.addf %17, %18 : vector<8x1xf32>
    %20 = math.rsqrt %19 : vector<8x1xf32>
    %21 = vector.broadcast %20 : vector<8x1xf32> to vector<8x32xf32>
    %22 = arith.mulf %12, %21 : vector<8x32xf32>
    %c0_10 = arith.constant 0 : index
    %c0_11 = arith.constant 0 : index
    %c0_12 = arith.constant 0 : index
    %23 = vector.load %arg13[%c0_10, %c0_11, %c0_12] : memref<6x1x32xf32, #tpu.memory_space<vmem>>, vector<1x1x32xf32>
    %24 = vector.shape_cast %23 : vector<1x1x32xf32> to vector<1x32xf32>
    %25 = vector.broadcast %24 : vector<1x32xf32> to vector<8x32xf32>
    %26 = arith.mulf %22, %25 : vector<8x32xf32>
    %c0_13 = arith.constant 0 : index
    %c0_14 = arith.constant 0 : index
    %c0_15 = arith.constant 0 : index
    %27 = vector.load %arg14[%c0_13, %c0_14, %c0_15] : memref<6x1x32xf32, #tpu.memory_space<vmem>>, vector<1x1x32xf32>
    %28 = vector.shape_cast %27 : vector<1x1x32xf32> to vector<1x32xf32>
    %29 = vector.broadcast %28 : vector<1x32xf32> to vector<8x32xf32>
    %30 = arith.addf %26, %29 : vector<8x32xf32>
    %31 = arith.truncf %30 : vector<8x32xf32> to vector<8x32xbf16>
    %c0_16 = arith.constant 0 : index
    %c0_17 = arith.constant 0 : index
    %c0_18 = arith.constant 0 : index
    %32 = vector.load %arg7[%c0_16, %c0_17, %c0_18] : memref<4x32x32xbf16, #tpu.memory_space<vmem>>, vector<1x32x32xbf16>
    %33 = vector.shape_cast %32 : vector<1x32x32xbf16> to vector<32x32xbf16>
    %cst_19 = arith.constant dense<0.000000e+00> : vector<8x32xf32>
    %34 = tpu.matmul %31, %33, %cst_19 {dimension_numbers = #tpu.dot_dimension_numbers<[1], [0], [0], [1], [0, 0, 1, 1], [], []>} : vector<8x32xbf16>, vector<32x32xbf16>, vector<8x32xf32> -> vector<8x32xf32>
    %c0_20 = arith.constant 0 : index
    %c0_21 = arith.constant 0 : index
    %c0_22 = arith.constant 0 : index
    %35 = vector.load %arg8[%c0_20, %c0_21, %c0_22] : memref<4x1x32xf32, #tpu.memory_space<vmem>>, vector<1x1x32xf32>
    %36 = vector.shape_cast %35 : vector<1x1x32xf32> to vector<1x32xf32>
    %37 = vector.broadcast %36 : vector<1x32xf32> to vector<8x32xf32>
    %38 = arith.addf %34, %37 : vector<8x32xf32>
    %39 = arith.truncf %4 : vector<20x32xf32> to vector<20x32xbf16>
    %c0_23 = arith.constant 0 : index
    %c0_24 = arith.constant 0 : index
    %c0_25 = arith.constant 0 : index
    %40 = vector.load %arg9[%c0_23, %c0_24, %c0_25] : memref<4x32x64xbf16, #tpu.memory_space<vmem>>, vector<1x32x64xbf16>
    %41 = vector.shape_cast %40 : vector<1x32x64xbf16> to vector<32x64xbf16>
    %cst_26 = arith.constant dense<0.000000e+00> : vector<20x64xf32>
    %42 = tpu.matmul %39, %41, %cst_26 {dimension_numbers = #tpu.dot_dimension_numbers<[1], [0], [0], [1], [0, 0, 1, 1], [], []>} : vector<20x32xbf16>, vector<32x64xbf16>, vector<20x64xf32> -> vector<20x64xf32>
    %c0_27 = arith.constant 0 : index
    %c0_28 = arith.constant 0 : index
    %c0_29 = arith.constant 0 : index
    %43 = vector.load %arg10[%c0_27, %c0_28, %c0_29] : memref<4x1x64xf32, #tpu.memory_space<vmem>>, vector<1x1x64xf32>
    %44 = vector.shape_cast %43 : vector<1x1x64xf32> to vector<1x64xf32>
    %45 = vector.broadcast %44 : vector<1x64xf32> to vector<20x64xf32>
    %46 = arith.addf %42, %45 : vector<20x64xf32>
    %47 = vector.extract_strided_slice %38 {offsets = [0, 0], sizes = [8, 8], strides = [1, 1]} : vector<8x32xf32> to vector<8x8xf32>
    %48 = vector.extract_strided_slice %38 {offsets = [0, 8], sizes = [8, 8], strides = [1, 1]} : vector<8x32xf32> to vector<8x8xf32>
    %49 = vector.extract_strided_slice %38 {offsets = [0, 16], sizes = [8, 8], strides = [1, 1]} : vector<8x32xf32> to vector<8x8xf32>
    %50 = vector.extract_strided_slice %38 {offsets = [0, 24], sizes = [8, 8], strides = [1, 1]} : vector<8x32xf32> to vector<8x8xf32>
    %51 = vector.shape_cast %47 : vector<8x8xf32> to vector<1x8x8xf32>
    %52 = vector.shape_cast %48 : vector<8x8xf32> to vector<1x8x8xf32>
    %53 = vector.shape_cast %49 : vector<8x8xf32> to vector<1x8x8xf32>
    %54 = vector.shape_cast %50 : vector<8x8xf32> to vector<1x8x8xf32>
    %55 = tpu.concatenate %51, %52, %53, %54 in 0 : vector<1x8x8xf32>, vector<1x8x8xf32>, vector<1x8x8xf32>, vector<1x8x8xf32> -> vector<4x8x8xf32>
    %56 = vector.extract_strided_slice %46 {offsets = [0, 0], sizes = [20, 8], strides = [1, 1]} : vector<20x64xf32> to vector<20x8xf32>
    %57 = vector.extract_strided_slice %46 {offsets = [0, 8], sizes = [20, 8], strides = [1, 1]} : vector<20x64xf32> to vector<20x8xf32>
    %58 = vector.extract_strided_slice %46 {offsets = [0, 16], sizes = [20, 8], strides = [1, 1]} : vector<20x64xf32> to vector<20x8xf32>
    %59 = vector.extract_strided_slice %46 {offsets = [0, 24], sizes = [20, 8], strides = [1, 1]} : vector<20x64xf32> to vector<20x8xf32>
    %60 = vector.shape_cast %56 : vector<20x8xf32> to vector<1x20x8xf32>
    %61 = vector.shape_cast %57 : vector<20x8xf32> to vector<1x20x8xf32>
    %62 = vector.shape_cast %58 : vector<20x8xf32> to vector<1x20x8xf32>
    %63 = vector.shape_cast %59 : vector<20x8xf32> to vector<1x20x8xf32>
    %64 = tpu.concatenate %60, %61, %62, %63 in 0 : vector<1x20x8xf32>, vector<1x20x8xf32>, vector<1x20x8xf32>, vector<1x20x8xf32> -> vector<4x20x8xf32>
    %65 = vector.extract_strided_slice %46 {offsets = [0, 32], sizes = [20, 8], strides = [1, 1]} : vector<20x64xf32> to vector<20x8xf32>
    %66 = vector.extract_strided_slice %46 {offsets = [0, 40], sizes = [20, 8], strides = [1, 1]} : vector<20x64xf32> to vector<20x8xf32>
    %67 = vector.extract_strided_slice %46 {offsets = [0, 48], sizes = [20, 8], strides = [1, 1]} : vector<20x64xf32> to vector<20x8xf32>
    %68 = vector.extract_strided_slice %46 {offsets = [0, 56], sizes = [20, 8], strides = [1, 1]} : vector<20x64xf32> to vector<20x8xf32>
    %69 = vector.shape_cast %65 : vector<20x8xf32> to vector<1x20x8xf32>
    %70 = vector.shape_cast %66 : vector<20x8xf32> to vector<1x20x8xf32>
    %71 = vector.shape_cast %67 : vector<20x8xf32> to vector<1x20x8xf32>
    %72 = vector.shape_cast %68 : vector<20x8xf32> to vector<1x20x8xf32>
    %73 = tpu.concatenate %69, %70, %71, %72 in 0 : vector<1x20x8xf32>, vector<1x20x8xf32>, vector<1x20x8xf32>, vector<1x20x8xf32> -> vector<4x20x8xf32>
    %74 = arith.truncf %55 : vector<4x8x8xf32> to vector<4x8x8xbf16>
    %75 = arith.truncf %64 : vector<4x20x8xf32> to vector<4x20x8xbf16>
    "tpu.trace_start"() <{level = 10 : i32, message = "hqd,hkd->hqk"}> : () -> ()
    %cst_30 = arith.constant dense<0.000000e+00> : vector<4x8x20xf32>
    %76 = tpu.matmul %74, %75, %cst_30 {dimension_numbers = #tpu.dot_dimension_numbers<[2], [2], [1], [1], [0, 0, 0, 1, 1, 1], [0], [0]>} : vector<4x8x8xbf16>, vector<4x20x8xbf16>, vector<4x8x20xf32> -> vector<4x8x20xf32>
    "tpu.trace_stop"() : () -> ()
    %cst_31 = arith.constant 0.353553385 : f32
    %77 = vector.broadcast %cst_31 : f32 to vector<4x8x20xf32>
    %78 = arith.mulf %76, %77 : vector<4x8x20xf32>
    %cst_32 = arith.constant dense<0xFF800000> : vector<4x8xf32>
    %79 = vector.multi_reduction <maximumf>, %78, %cst_32 [2] : vector<4x8x20xf32> to vector<4x8xf32>
    %80 = vector.shape_cast %79 : vector<4x8xf32> to vector<4x8x1xf32>
    %81 = vector.broadcast %80 : vector<4x8x1xf32> to vector<4x8x20xf32>
    %82 = arith.subf %78, %81 : vector<4x8x20xf32>
    %83 = math.exp %82 : vector<4x8x20xf32>
    %cst_33 = arith.constant dense<0.000000e+00> : vector<4x8xf32>
    %84 = vector.multi_reduction <add>, %83, %cst_33 [2] : vector<4x8x20xf32> to vector<4x8xf32>
    %85 = vector.shape_cast %84 : vector<4x8xf32> to vector<4x8x1xf32>
    %86 = tpu.reciprocal %85 {approx = true} : vector<4x8x1xf32> -> vector<4x8x1xf32>
    %87 = vector.broadcast %86 : vector<4x8x1xf32> to vector<4x8x20xf32>
    %88 = arith.mulf %83, %87 : vector<4x8x20xf32>
    %89 = arith.truncf %88 : vector<4x8x20xf32> to vector<4x8x20xbf16>
    %90 = arith.truncf %73 : vector<4x20x8xf32> to vector<4x20x8xbf16>
    "tpu.trace_start"() <{level = 10 : i32, message = "hqk,hkd->hqd"}> : () -> ()
    %cst_34 = arith.constant dense<0.000000e+00> : vector<4x8x8xf32>
    %91 = tpu.matmul %89, %90, %cst_34 {dimension_numbers = #tpu.dot_dimension_numbers<[2], [1], [1], [2], [0, 0, 0, 1, 1, 2], [0], [0]>} : vector<4x8x20xbf16>, vector<4x20x8xbf16>, vector<4x8x8xf32> -> vector<4x8x8xf32>
    "tpu.trace_stop"() : () -> ()
    %92 = vector.extract_strided_slice %91 {offsets = [0, 0, 0], sizes = [1, 8, 8], strides = [1, 1, 1]} : vector<4x8x8xf32> to vector<1x8x8xf32>
    %93 = vector.shape_cast %92 : vector<1x8x8xf32> to vector<8x8xf32>
    %94 = vector.extract_strided_slice %91 {offsets = [1, 0, 0], sizes = [1, 8, 8], strides = [1, 1, 1]} : vector<4x8x8xf32> to vector<1x8x8xf32>
    %95 = vector.shape_cast %94 : vector<1x8x8xf32> to vector<8x8xf32>
    %96 = vector.extract_strided_slice %91 {offsets = [2, 0, 0], sizes = [1, 8, 8], strides = [1, 1, 1]} : vector<4x8x8xf32> to vector<1x8x8xf32>
    %97 = vector.shape_cast %96 : vector<1x8x8xf32> to vector<8x8xf32>
    %98 = vector.extract_strided_slice %91 {offsets = [3, 0, 0], sizes = [1, 8, 8], strides = [1, 1, 1]} : vector<4x8x8xf32> to vector<1x8x8xf32>
    %99 = vector.shape_cast %98 : vector<1x8x8xf32> to vector<8x8xf32>
    %100 = tpu.concatenate %93, %95, %97, %99 in 1 : vector<8x8xf32>, vector<8x8xf32>, vector<8x8xf32>, vector<8x8xf32> -> vector<8x32xf32>
    %101 = arith.truncf %100 : vector<8x32xf32> to vector<8x32xbf16>
    %c0_35 = arith.constant 0 : index
    %c0_36 = arith.constant 0 : index
    %c0_37 = arith.constant 0 : index
    %102 = vector.load %arg11[%c0_35, %c0_36, %c0_37] : memref<4x32x32xbf16, #tpu.memory_space<vmem>>, vector<1x32x32xbf16>
    %103 = vector.shape_cast %102 : vector<1x32x32xbf16> to vector<32x32xbf16>
    %cst_38 = arith.constant dense<0.000000e+00> : vector<8x32xf32>
    %104 = tpu.matmul %101, %103, %cst_38 {dimension_numbers = #tpu.dot_dimension_numbers<[1], [0], [0], [1], [0, 0, 1, 1], [], []>} : vector<8x32xbf16>, vector<32x32xbf16>, vector<8x32xf32> -> vector<8x32xf32>
    %c0_39 = arith.constant 0 : index
    %c0_40 = arith.constant 0 : index
    %c0_41 = arith.constant 0 : index
    %105 = vector.load %arg12[%c0_39, %c0_40, %c0_41] : memref<4x1x32xf32, #tpu.memory_space<vmem>>, vector<1x1x32xf32>
    %106 = vector.shape_cast %105 : vector<1x1x32xf32> to vector<1x32xf32>
    %107 = vector.broadcast %106 : vector<1x32xf32> to vector<8x32xf32>
    %108 = arith.addf %104, %107 : vector<8x32xf32>
    %109 = arith.addf %30, %108 : vector<8x32xf32>
    %cst_42 = arith.constant dense<0.000000e+00> : vector<8xf32>
    %110 = vector.multi_reduction <add>, %109, %cst_42 [1] : vector<8x32xf32> to vector<8xf32>
    %111 = vector.shape_cast %110 : vector<8xf32> to vector<8x1xf32>
    %cst_43 = arith.constant 3.200000e+01 : f32
    %112 = vector.broadcast %cst_43 : f32 to vector<8x1xf32>
    %113 = arith.divf %111, %112 : vector<8x1xf32>
    %114 = vector.broadcast %113 : vector<8x1xf32> to vector<8x32xf32>
    %115 = arith.subf %109, %114 : vector<8x32xf32>
    %116 = arith.mulf %115, %115 : vector<8x32xf32>
    %cst_44 = arith.constant dense<0.000000e+00> : vector<8xf32>
    %117 = vector.multi_reduction <add>, %116, %cst_44 [1] : vector<8x32xf32> to vector<8xf32>
    %118 = vector.shape_cast %117 : vector<8xf32> to vector<8x1xf32>
    %cst_45 = arith.constant 3.200000e+01 : f32
    %119 = vector.broadcast %cst_45 : f32 to vector<8x1xf32>
    %120 = arith.divf %118, %119 : vector<8x1xf32>
    %cst_46 = arith.constant 9.99999974E-6 : f32
    %121 = vector.broadcast %cst_46 : f32 to vector<8x1xf32>
    %122 = arith.addf %120, %121 : vector<8x1xf32>
    %123 = math.rsqrt %122 : vector<8x1xf32>
    %124 = vector.broadcast %123 : vector<8x1xf32> to vector<8x32xf32>
    %125 = arith.mulf %115, %124 : vector<8x32xf32>
    %c1 = arith.constant 1 : index
    %c0_47 = arith.constant 0 : index
    %c0_48 = arith.constant 0 : index
    %126 = vector.load %arg13[%c1, %c0_47, %c0_48] : memref<6x1x32xf32, #tpu.memory_space<vmem>>, vector<1x1x32xf32>
    %127 = vector.shape_cast %126 : vector<1x1x32xf32> to vector<1x32xf32>
    %128 = vector.broadcast %127 : vector<1x32xf32> to vector<8x32xf32>
    %129 = arith.mulf %125, %128 : vector<8x32xf32>
    %c1_49 = arith.constant 1 : index
    %c0_50 = arith.constant 0 : index
    %c0_51 = arith.constant 0 : index
    %130 = vector.load %arg14[%c1_49, %c0_50, %c0_51] : memref<6x1x32xf32, #tpu.memory_space<vmem>>, vector<1x1x32xf32>
    %131 = vector.shape_cast %130 : vector<1x1x32xf32> to vector<1x32xf32>
    %132 = vector.broadcast %131 : vector<1x32xf32> to vector<8x32xf32>
    %133 = arith.addf %129, %132 : vector<8x32xf32>
    %134 = arith.truncf %4 : vector<20x32xf32> to vector<20x32xbf16>
    %c1_52 = arith.constant 1 : index
    %c0_53 = arith.constant 0 : index
    %c0_54 = arith.constant 0 : index
    %135 = vector.load %arg7[%c1_52, %c0_53, %c0_54] : memref<4x32x32xbf16, #tpu.memory_space<vmem>>, vector<1x32x32xbf16>
    %136 = vector.shape_cast %135 : vector<1x32x32xbf16> to vector<32x32xbf16>
    %cst_55 = arith.constant dense<0.000000e+00> : vector<20x32xf32>
    %137 = tpu.matmul %134, %136, %cst_55 {dimension_numbers = #tpu.dot_dimension_numbers<[1], [0], [0], [1], [0, 0, 1, 1], [], []>} : vector<20x32xbf16>, vector<32x32xbf16>, vector<20x32xf32> -> vector<20x32xf32>
    %c1_56 = arith.constant 1 : index
    %c0_57 = arith.constant 0 : index
    %c0_58 = arith.constant 0 : index
    %138 = vector.load %arg8[%c1_56, %c0_57, %c0_58] : memref<4x1x32xf32, #tpu.memory_space<vmem>>, vector<1x1x32xf32>
    %139 = vector.shape_cast %138 : vector<1x1x32xf32> to vector<1x32xf32>
    %140 = vector.broadcast %139 : vector<1x32xf32> to vector<20x32xf32>
    %141 = arith.addf %137, %140 : vector<20x32xf32>
    %142 = arith.truncf %5 : vector<32x32xf32> to vector<32x32xbf16>
    %c1_59 = arith.constant 1 : index
    %c0_60 = arith.constant 0 : index
    %c0_61 = arith.constant 0 : index
    %143 = vector.load %arg9[%c1_59, %c0_60, %c0_61] : memref<4x32x64xbf16, #tpu.memory_space<vmem>>, vector<1x32x64xbf16>
    %144 = vector.shape_cast %143 : vector<1x32x64xbf16> to vector<32x64xbf16>
    %cst_62 = arith.constant dense<0.000000e+00> : vector<32x64xf32>
    %145 = tpu.matmul %142, %144, %cst_62 {dimension_numbers = #tpu.dot_dimension_numbers<[1], [0], [0], [1], [0, 0, 1, 1], [], []>} : vector<32x32xbf16>, vector<32x64xbf16>, vector<32x64xf32> -> vector<32x64xf32>
    %c1_63 = arith.constant 1 : index
    %c0_64 = arith.constant 0 : index
    %c0_65 = arith.constant 0 : index
    %146 = vector.load %arg10[%c1_63, %c0_64, %c0_65] : memref<4x1x64xf32, #tpu.memory_space<vmem>>, vector<1x1x64xf32>
    %147 = vector.shape_cast %146 : vector<1x1x64xf32> to vector<1x64xf32>
    %148 = vector.broadcast %147 : vector<1x64xf32> to vector<32x64xf32>
    %149 = arith.addf %145, %148 : vector<32x64xf32>
    %150 = vector.extract_strided_slice %141 {offsets = [0, 0], sizes = [20, 8], strides = [1, 1]} : vector<20x32xf32> to vector<20x8xf32>
    %151 = vector.extract_strided_slice %141 {offsets = [0, 8], sizes = [20, 8], strides = [1, 1]} : vector<20x32xf32> to vector<20x8xf32>
    %152 = vector.extract_strided_slice %141 {offsets = [0, 16], sizes = [20, 8], strides = [1, 1]} : vector<20x32xf32> to vector<20x8xf32>
    %153 = vector.extract_strided_slice %141 {offsets = [0, 24], sizes = [20, 8], strides = [1, 1]} : vector<20x32xf32> to vector<20x8xf32>
    %154 = vector.shape_cast %150 : vector<20x8xf32> to vector<1x20x8xf32>
    %155 = vector.shape_cast %151 : vector<20x8xf32> to vector<1x20x8xf32>
    %156 = vector.shape_cast %152 : vector<20x8xf32> to vector<1x20x8xf32>
    %157 = vector.shape_cast %153 : vector<20x8xf32> to vector<1x20x8xf32>
    %158 = tpu.concatenate %154, %155, %156, %157 in 0 : vector<1x20x8xf32>, vector<1x20x8xf32>, vector<1x20x8xf32>, vector<1x20x8xf32> -> vector<4x20x8xf32>
    %159 = vector.extract_strided_slice %149 {offsets = [0, 0], sizes = [32, 8], strides = [1, 1]} : vector<32x64xf32> to vector<32x8xf32>
    %160 = vector.extract_strided_slice %149 {offsets = [0, 8], sizes = [32, 8], strides = [1, 1]} : vector<32x64xf32> to vector<32x8xf32>
    %161 = vector.extract_strided_slice %149 {offsets = [0, 16], sizes = [32, 8], strides = [1, 1]} : vector<32x64xf32> to vector<32x8xf32>
    %162 = vector.extract_strided_slice %149 {offsets = [0, 24], sizes = [32, 8], strides = [1, 1]} : vector<32x64xf32> to vector<32x8xf32>
    %163 = vector.shape_cast %159 : vector<32x8xf32> to vector<1x32x8xf32>
    %164 = vector.shape_cast %160 : vector<32x8xf32> to vector<1x32x8xf32>
    %165 = vector.shape_cast %161 : vector<32x8xf32> to vector<1x32x8xf32>
    %166 = vector.shape_cast %162 : vector<32x8xf32> to vector<1x32x8xf32>
    %167 = tpu.concatenate %163, %164, %165, %166 in 0 : vector<1x32x8xf32>, vector<1x32x8xf32>, vector<1x32x8xf32>, vector<1x32x8xf32> -> vector<4x32x8xf32>
    %168 = vector.extract_strided_slice %149 {offsets = [0, 32], sizes = [32, 8], strides = [1, 1]} : vector<32x64xf32> to vector<32x8xf32>
    %169 = vector.extract_strided_slice %149 {offsets = [0, 40], sizes = [32, 8], strides = [1, 1]} : vector<32x64xf32> to vector<32x8xf32>
    %170 = vector.extract_strided_slice %149 {offsets = [0, 48], sizes = [32, 8], strides = [1, 1]} : vector<32x64xf32> to vector<32x8xf32>
    %171 = vector.extract_strided_slice %149 {offsets = [0, 56], sizes = [32, 8], strides = [1, 1]} : vector<32x64xf32> to vector<32x8xf32>
    %172 = vector.shape_cast %168 : vector<32x8xf32> to vector<1x32x8xf32>
    %173 = vector.shape_cast %169 : vector<32x8xf32> to vector<1x32x8xf32>
    %174 = vector.shape_cast %170 : vector<32x8xf32> to vector<1x32x8xf32>
    %175 = vector.shape_cast %171 : vector<32x8xf32> to vector<1x32x8xf32>
    %176 = tpu.concatenate %172, %173, %174, %175 in 0 : vector<1x32x8xf32>, vector<1x32x8xf32>, vector<1x32x8xf32>, vector<1x32x8xf32> -> vector<4x32x8xf32>
    %177 = arith.truncf %158 : vector<4x20x8xf32> to vector<4x20x8xbf16>
    %178 = arith.truncf %167 : vector<4x32x8xf32> to vector<4x32x8xbf16>
    "tpu.trace_start"() <{level = 10 : i32, message = "hqd,hkd->hqk"}> : () -> ()
    %cst_66 = arith.constant dense<0.000000e+00> : vector<4x20x32xf32>
    %179 = tpu.matmul %177, %178, %cst_66 {dimension_numbers = #tpu.dot_dimension_numbers<[2], [2], [1], [1], [0, 0, 0, 1, 1, 1], [0], [0]>} : vector<4x20x8xbf16>, vector<4x32x8xbf16>, vector<4x20x32xf32> -> vector<4x20x32xf32>
    "tpu.trace_stop"() : () -> ()
    %cst_67 = arith.constant 0.353553385 : f32
    %180 = vector.broadcast %cst_67 : f32 to vector<4x20x32xf32>
    %181 = arith.mulf %179, %180 : vector<4x20x32xf32>
    %cst_68 = arith.constant dense<0xFF800000> : vector<4x20xf32>
    %182 = vector.multi_reduction <maximumf>, %181, %cst_68 [2] : vector<4x20x32xf32> to vector<4x20xf32>
    %183 = vector.shape_cast %182 : vector<4x20xf32> to vector<4x20x1xf32>
    %184 = vector.broadcast %183 : vector<4x20x1xf32> to vector<4x20x32xf32>
    %185 = arith.subf %181, %184 : vector<4x20x32xf32>
    %186 = math.exp %185 : vector<4x20x32xf32>
    %cst_69 = arith.constant dense<0.000000e+00> : vector<4x20xf32>
    %187 = vector.multi_reduction <add>, %186, %cst_69 [2] : vector<4x20x32xf32> to vector<4x20xf32>
    %188 = vector.shape_cast %187 : vector<4x20xf32> to vector<4x20x1xf32>
    %189 = tpu.reciprocal %188 {approx = true} : vector<4x20x1xf32> -> vector<4x20x1xf32>
    %190 = vector.broadcast %189 : vector<4x20x1xf32> to vector<4x20x32xf32>
    %191 = arith.mulf %186, %190 : vector<4x20x32xf32>
    %192 = arith.truncf %191 : vector<4x20x32xf32> to vector<4x20x32xbf16>
    %193 = arith.truncf %176 : vector<4x32x8xf32> to vector<4x32x8xbf16>
    "tpu.trace_start"() <{level = 10 : i32, message = "hqk,hkd->hqd"}> : () -> ()
    %cst_70 = arith.constant dense<0.000000e+00> : vector<4x20x8xf32>
    %194 = tpu.matmul %192, %193, %cst_70 {dimension_numbers = #tpu.dot_dimension_numbers<[2], [1], [1], [2], [0, 0, 0, 1, 1, 2], [0], [0]>} : vector<4x20x32xbf16>, vector<4x32x8xbf16>, vector<4x20x8xf32> -> vector<4x20x8xf32>
    "tpu.trace_stop"() : () -> ()
    %195 = vector.extract_strided_slice %194 {offsets = [0, 0, 0], sizes = [1, 20, 8], strides = [1, 1, 1]} : vector<4x20x8xf32> to vector<1x20x8xf32>
    %196 = vector.shape_cast %195 : vector<1x20x8xf32> to vector<20x8xf32>
    %197 = vector.extract_strided_slice %194 {offsets = [1, 0, 0], sizes = [1, 20, 8], strides = [1, 1, 1]} : vector<4x20x8xf32> to vector<1x20x8xf32>
    %198 = vector.shape_cast %197 : vector<1x20x8xf32> to vector<20x8xf32>
    %199 = vector.extract_strided_slice %194 {offsets = [2, 0, 0], sizes = [1, 20, 8], strides = [1, 1, 1]} : vector<4x20x8xf32> to vector<1x20x8xf32>
    %200 = vector.shape_cast %199 : vector<1x20x8xf32> to vector<20x8xf32>
    %201 = vector.extract_strided_slice %194 {offsets = [3, 0, 0], sizes = [1, 20, 8], strides = [1, 1, 1]} : vector<4x20x8xf32> to vector<1x20x8xf32>
    %202 = vector.shape_cast %201 : vector<1x20x8xf32> to vector<20x8xf32>
    %203 = tpu.concatenate %196, %198, %200, %202 in 1 : vector<20x8xf32>, vector<20x8xf32>, vector<20x8xf32>, vector<20x8xf32> -> vector<20x32xf32>
    %204 = arith.truncf %203 : vector<20x32xf32> to vector<20x32xbf16>
    %c1_71 = arith.constant 1 : index
    %c0_72 = arith.constant 0 : index
    %c0_73 = arith.constant 0 : index
    %205 = vector.load %arg11[%c1_71, %c0_72, %c0_73] : memref<4x32x32xbf16, #tpu.memory_space<vmem>>, vector<1x32x32xbf16>
    %206 = vector.shape_cast %205 : vector<1x32x32xbf16> to vector<32x32xbf16>
    %cst_74 = arith.constant dense<0.000000e+00> : vector<20x32xf32>
    %207 = tpu.matmul %204, %206, %cst_74 {dimension_numbers = #tpu.dot_dimension_numbers<[1], [0], [0], [1], [0, 0, 1, 1], [], []>} : vector<20x32xbf16>, vector<32x32xbf16>, vector<20x32xf32> -> vector<20x32xf32>
    %c1_75 = arith.constant 1 : index
    %c0_76 = arith.constant 0 : index
    %c0_77 = arith.constant 0 : index
    %208 = vector.load %arg12[%c1_75, %c0_76, %c0_77] : memref<4x1x32xf32, #tpu.memory_space<vmem>>, vector<1x1x32xf32>
    %209 = vector.shape_cast %208 : vector<1x1x32xf32> to vector<1x32xf32>
    %210 = vector.broadcast %209 : vector<1x32xf32> to vector<20x32xf32>
    %211 = arith.addf %207, %210 : vector<20x32xf32>
    %212 = arith.addf %4, %211 : vector<20x32xf32>
    %cst_78 = arith.constant dense<0.000000e+00> : vector<20xf32>
    %213 = vector.multi_reduction <add>, %212, %cst_78 [1] : vector<20x32xf32> to vector<20xf32>
    %214 = vector.shape_cast %213 : vector<20xf32> to vector<20x1xf32>
    %cst_79 = arith.constant 3.200000e+01 : f32
    %215 = vector.broadcast %cst_79 : f32 to vector<20x1xf32>
    %216 = arith.divf %214, %215 : vector<20x1xf32>
    %217 = vector.broadcast %216 : vector<20x1xf32> to vector<20x32xf32>
    %218 = arith.subf %212, %217 : vector<20x32xf32>
    %219 = arith.mulf %218, %218 : vector<20x32xf32>
    %cst_80 = arith.constant dense<0.000000e+00> : vector<20xf32>
    %220 = vector.multi_reduction <add>, %219, %cst_80 [1] : vector<20x32xf32> to vector<20xf32>
    %221 = vector.shape_cast %220 : vector<20xf32> to vector<20x1xf32>
    %cst_81 = arith.constant 3.200000e+01 : f32
    %222 = vector.broadcast %cst_81 : f32 to vector<20x1xf32>
    %223 = arith.divf %221, %222 : vector<20x1xf32>
    %cst_82 = arith.constant 9.99999974E-6 : f32
    %224 = vector.broadcast %cst_82 : f32 to vector<20x1xf32>
    %225 = arith.addf %223, %224 : vector<20x1xf32>
    %226 = math.rsqrt %225 : vector<20x1xf32>
    %227 = vector.broadcast %226 : vector<20x1xf32> to vector<20x32xf32>
    %228 = arith.mulf %218, %227 : vector<20x32xf32>
    %c3 = arith.constant 3 : index
    %c0_83 = arith.constant 0 : index
    %c0_84 = arith.constant 0 : index
    %229 = vector.load %arg13[%c3, %c0_83, %c0_84] : memref<6x1x32xf32, #tpu.memory_space<vmem>>, vector<1x1x32xf32>
    %230 = vector.shape_cast %229 : vector<1x1x32xf32> to vector<1x32xf32>
    %231 = vector.broadcast %230 : vector<1x32xf32> to vector<20x32xf32>
    %232 = arith.mulf %228, %231 : vector<20x32xf32>
    %c3_85 = arith.constant 3 : index
    %c0_86 = arith.constant 0 : index
    %c0_87 = arith.constant 0 : index
    %233 = vector.load %arg14[%c3_85, %c0_86, %c0_87] : memref<6x1x32xf32, #tpu.memory_space<vmem>>, vector<1x1x32xf32>
    %234 = vector.shape_cast %233 : vector<1x1x32xf32> to vector<1x32xf32>
    %235 = vector.broadcast %234 : vector<1x32xf32> to vector<20x32xf32>
    %236 = arith.addf %232, %235 : vector<20x32xf32>
    %237 = arith.truncf %5 : vector<32x32xf32> to vector<32x32xbf16>
    %c2 = arith.constant 2 : index
    %c0_88 = arith.constant 0 : index
    %c0_89 = arith.constant 0 : index
    %238 = vector.load %arg7[%c2, %c0_88, %c0_89] : memref<4x32x32xbf16, #tpu.memory_space<vmem>>, vector<1x32x32xbf16>
    %239 = vector.shape_cast %238 : vector<1x32x32xbf16> to vector<32x32xbf16>
    %cst_90 = arith.constant dense<0.000000e+00> : vector<32x32xf32>
    %240 = tpu.matmul %237, %239, %cst_90 {dimension_numbers = #tpu.dot_dimension_numbers<[1], [0], [0], [1], [0, 0, 1, 1], [], []>} : vector<32x32xbf16>, vector<32x32xbf16>, vector<32x32xf32> -> vector<32x32xf32>
    %c2_91 = arith.constant 2 : index
    %c0_92 = arith.constant 0 : index
    %c0_93 = arith.constant 0 : index
    %241 = vector.load %arg8[%c2_91, %c0_92, %c0_93] : memref<4x1x32xf32, #tpu.memory_space<vmem>>, vector<1x1x32xf32>
    %242 = vector.shape_cast %241 : vector<1x1x32xf32> to vector<1x32xf32>
    %243 = vector.broadcast %242 : vector<1x32xf32> to vector<32x32xf32>
    %244 = arith.addf %240, %243 : vector<32x32xf32>
    %245 = arith.truncf %4 : vector<20x32xf32> to vector<20x32xbf16>
    %c2_94 = arith.constant 2 : index
    %c0_95 = arith.constant 0 : index
    %c0_96 = arith.constant 0 : index
    %246 = vector.load %arg9[%c2_94, %c0_95, %c0_96] : memref<4x32x64xbf16, #tpu.memory_space<vmem>>, vector<1x32x64xbf16>
    %247 = vector.shape_cast %246 : vector<1x32x64xbf16> to vector<32x64xbf16>
    %cst_97 = arith.constant dense<0.000000e+00> : vector<20x64xf32>
    %248 = tpu.matmul %245, %247, %cst_97 {dimension_numbers = #tpu.dot_dimension_numbers<[1], [0], [0], [1], [0, 0, 1, 1], [], []>} : vector<20x32xbf16>, vector<32x64xbf16>, vector<20x64xf32> -> vector<20x64xf32>
    %c2_98 = arith.constant 2 : index
    %c0_99 = arith.constant 0 : index
    %c0_100 = arith.constant 0 : index
    %249 = vector.load %arg10[%c2_98, %c0_99, %c0_100] : memref<4x1x64xf32, #tpu.memory_space<vmem>>, vector<1x1x64xf32>
    %250 = vector.shape_cast %249 : vector<1x1x64xf32> to vector<1x64xf32>
    %251 = vector.broadcast %250 : vector<1x64xf32> to vector<20x64xf32>
    %252 = arith.addf %248, %251 : vector<20x64xf32>
    %253 = vector.extract_strided_slice %244 {offsets = [0, 0], sizes = [32, 8], strides = [1, 1]} : vector<32x32xf32> to vector<32x8xf32>
    %254 = vector.extract_strided_slice %244 {offsets = [0, 8], sizes = [32, 8], strides = [1, 1]} : vector<32x32xf32> to vector<32x8xf32>
    %255 = vector.extract_strided_slice %244 {offsets = [0, 16], sizes = [32, 8], strides = [1, 1]} : vector<32x32xf32> to vector<32x8xf32>
    %256 = vector.extract_strided_slice %244 {offsets = [0, 24], sizes = [32, 8], strides = [1, 1]} : vector<32x32xf32> to vector<32x8xf32>
    %257 = vector.shape_cast %253 : vector<32x8xf32> to vector<1x32x8xf32>
    %258 = vector.shape_cast %254 : vector<32x8xf32> to vector<1x32x8xf32>
    %259 = vector.shape_cast %255 : vector<32x8xf32> to vector<1x32x8xf32>
    %260 = vector.shape_cast %256 : vector<32x8xf32> to vector<1x32x8xf32>
    %261 = tpu.concatenate %257, %258, %259, %260 in 0 : vector<1x32x8xf32>, vector<1x32x8xf32>, vector<1x32x8xf32>, vector<1x32x8xf32> -> vector<4x32x8xf32>
    %262 = vector.extract_strided_slice %252 {offsets = [0, 0], sizes = [20, 8], strides = [1, 1]} : vector<20x64xf32> to vector<20x8xf32>
    %263 = vector.extract_strided_slice %252 {offsets = [0, 8], sizes = [20, 8], strides = [1, 1]} : vector<20x64xf32> to vector<20x8xf32>
    %264 = vector.extract_strided_slice %252 {offsets = [0, 16], sizes = [20, 8], strides = [1, 1]} : vector<20x64xf32> to vector<20x8xf32>
    %265 = vector.extract_strided_slice %252 {offsets = [0, 24], sizes = [20, 8], strides = [1, 1]} : vector<20x64xf32> to vector<20x8xf32>
    %266 = vector.shape_cast %262 : vector<20x8xf32> to vector<1x20x8xf32>
    %267 = vector.shape_cast %263 : vector<20x8xf32> to vector<1x20x8xf32>
    %268 = vector.shape_cast %264 : vector<20x8xf32> to vector<1x20x8xf32>
    %269 = vector.shape_cast %265 : vector<20x8xf32> to vector<1x20x8xf32>
    %270 = tpu.concatenate %266, %267, %268, %269 in 0 : vector<1x20x8xf32>, vector<1x20x8xf32>, vector<1x20x8xf32>, vector<1x20x8xf32> -> vector<4x20x8xf32>
    %271 = vector.extract_strided_slice %252 {offsets = [0, 32], sizes = [20, 8], strides = [1, 1]} : vector<20x64xf32> to vector<20x8xf32>
    %272 = vector.extract_strided_slice %252 {offsets = [0, 40], sizes = [20, 8], strides = [1, 1]} : vector<20x64xf32> to vector<20x8xf32>
    %273 = vector.extract_strided_slice %252 {offsets = [0, 48], sizes = [20, 8], strides = [1, 1]} : vector<20x64xf32> to vector<20x8xf32>
    %274 = vector.extract_strided_slice %252 {offsets = [0, 56], sizes = [20, 8], strides = [1, 1]} : vector<20x64xf32> to vector<20x8xf32>
    %275 = vector.shape_cast %271 : vector<20x8xf32> to vector<1x20x8xf32>
    %276 = vector.shape_cast %272 : vector<20x8xf32> to vector<1x20x8xf32>
    %277 = vector.shape_cast %273 : vector<20x8xf32> to vector<1x20x8xf32>
    %278 = vector.shape_cast %274 : vector<20x8xf32> to vector<1x20x8xf32>
    %279 = tpu.concatenate %275, %276, %277, %278 in 0 : vector<1x20x8xf32>, vector<1x20x8xf32>, vector<1x20x8xf32>, vector<1x20x8xf32> -> vector<4x20x8xf32>
    %280 = arith.truncf %261 : vector<4x32x8xf32> to vector<4x32x8xbf16>
    %281 = arith.truncf %270 : vector<4x20x8xf32> to vector<4x20x8xbf16>
    "tpu.trace_start"() <{level = 10 : i32, message = "hqd,hkd->hqk"}> : () -> ()
    %cst_101 = arith.constant dense<0.000000e+00> : vector<4x32x20xf32>
    %282 = tpu.matmul %280, %281, %cst_101 {dimension_numbers = #tpu.dot_dimension_numbers<[2], [2], [1], [1], [0, 0, 0, 1, 1, 1], [0], [0]>} : vector<4x32x8xbf16>, vector<4x20x8xbf16>, vector<4x32x20xf32> -> vector<4x32x20xf32>
    "tpu.trace_stop"() : () -> ()
    %cst_102 = arith.constant 0.353553385 : f32
    %283 = vector.broadcast %cst_102 : f32 to vector<4x32x20xf32>
    %284 = arith.mulf %282, %283 : vector<4x32x20xf32>
    %cst_103 = arith.constant dense<0xFF800000> : vector<4x32xf32>
    %285 = vector.multi_reduction <maximumf>, %284, %cst_103 [2] : vector<4x32x20xf32> to vector<4x32xf32>
    %286 = vector.shape_cast %285 : vector<4x32xf32> to vector<4x32x1xf32>
    %287 = vector.broadcast %286 : vector<4x32x1xf32> to vector<4x32x20xf32>
    %288 = arith.subf %284, %287 : vector<4x32x20xf32>
    %289 = math.exp %288 : vector<4x32x20xf32>
    %cst_104 = arith.constant dense<0.000000e+00> : vector<4x32xf32>
    %290 = vector.multi_reduction <add>, %289, %cst_104 [2] : vector<4x32x20xf32> to vector<4x32xf32>
    %291 = vector.shape_cast %290 : vector<4x32xf32> to vector<4x32x1xf32>
    %292 = tpu.reciprocal %291 {approx = true} : vector<4x32x1xf32> -> vector<4x32x1xf32>
    %293 = vector.broadcast %292 : vector<4x32x1xf32> to vector<4x32x20xf32>
    %294 = arith.mulf %289, %293 : vector<4x32x20xf32>
    %295 = arith.truncf %294 : vector<4x32x20xf32> to vector<4x32x20xbf16>
    %296 = arith.truncf %279 : vector<4x20x8xf32> to vector<4x20x8xbf16>
    "tpu.trace_start"() <{level = 10 : i32, message = "hqk,hkd->hqd"}> : () -> ()
    %cst_105 = arith.constant dense<0.000000e+00> : vector<4x32x8xf32>
    %297 = tpu.matmul %295, %296, %cst_105 {dimension_numbers = #tpu.dot_dimension_numbers<[2], [1], [1], [2], [0, 0, 0, 1, 1, 2], [0], [0]>} : vector<4x32x20xbf16>, vector<4x20x8xbf16>, vector<4x32x8xf32> -> vector<4x32x8xf32>
    "tpu.trace_stop"() : () -> ()
    %298 = vector.extract_strided_slice %297 {offsets = [0, 0, 0], sizes = [1, 32, 8], strides = [1, 1, 1]} : vector<4x32x8xf32> to vector<1x32x8xf32>
    %299 = vector.shape_cast %298 : vector<1x32x8xf32> to vector<32x8xf32>
    %300 = vector.extract_strided_slice %297 {offsets = [1, 0, 0], sizes = [1, 32, 8], strides = [1, 1, 1]} : vector<4x32x8xf32> to vector<1x32x8xf32>
    %301 = vector.shape_cast %300 : vector<1x32x8xf32> to vector<32x8xf32>
    %302 = vector.extract_strided_slice %297 {offsets = [2, 0, 0], sizes = [1, 32, 8], strides = [1, 1, 1]} : vector<4x32x8xf32> to vector<1x32x8xf32>
    %303 = vector.shape_cast %302 : vector<1x32x8xf32> to vector<32x8xf32>
    %304 = vector.extract_strided_slice %297 {offsets = [3, 0, 0], sizes = [1, 32, 8], strides = [1, 1, 1]} : vector<4x32x8xf32> to vector<1x32x8xf32>
    %305 = vector.shape_cast %304 : vector<1x32x8xf32> to vector<32x8xf32>
    %306 = tpu.concatenate %299, %301, %303, %305 in 1 : vector<32x8xf32>, vector<32x8xf32>, vector<32x8xf32>, vector<32x8xf32> -> vector<32x32xf32>
    %307 = arith.truncf %306 : vector<32x32xf32> to vector<32x32xbf16>
    %c2_106 = arith.constant 2 : index
    %c0_107 = arith.constant 0 : index
    %c0_108 = arith.constant 0 : index
    %308 = vector.load %arg11[%c2_106, %c0_107, %c0_108] : memref<4x32x32xbf16, #tpu.memory_space<vmem>>, vector<1x32x32xbf16>
    %309 = vector.shape_cast %308 : vector<1x32x32xbf16> to vector<32x32xbf16>
    %cst_109 = arith.constant dense<0.000000e+00> : vector<32x32xf32>
    %310 = tpu.matmul %307, %309, %cst_109 {dimension_numbers = #tpu.dot_dimension_numbers<[1], [0], [0], [1], [0, 0, 1, 1], [], []>} : vector<32x32xbf16>, vector<32x32xbf16>, vector<32x32xf32> -> vector<32x32xf32>
    %c2_110 = arith.constant 2 : index
    %c0_111 = arith.constant 0 : index
    %c0_112 = arith.constant 0 : index
    %311 = vector.load %arg12[%c2_110, %c0_111, %c0_112] : memref<4x1x32xf32, #tpu.memory_space<vmem>>, vector<1x1x32xf32>
    %312 = vector.shape_cast %311 : vector<1x1x32xf32> to vector<1x32xf32>
    %313 = vector.broadcast %312 : vector<1x32xf32> to vector<32x32xf32>
    %314 = arith.addf %310, %313 : vector<32x32xf32>
    %315 = arith.addf %5, %314 : vector<32x32xf32>
    %cst_113 = arith.constant dense<0.000000e+00> : vector<32xf32>
    %316 = vector.multi_reduction <add>, %315, %cst_113 [1] : vector<32x32xf32> to vector<32xf32>
    %317 = vector.shape_cast %316 : vector<32xf32> to vector<32x1xf32>
    %cst_114 = arith.constant 3.200000e+01 : f32
    %318 = vector.broadcast %cst_114 : f32 to vector<32x1xf32>
    %319 = arith.divf %317, %318 : vector<32x1xf32>
    %320 = vector.broadcast %319 : vector<32x1xf32> to vector<32x32xf32>
    %321 = arith.subf %315, %320 : vector<32x32xf32>
    %322 = arith.mulf %321, %321 : vector<32x32xf32>
    %cst_115 = arith.constant dense<0.000000e+00> : vector<32xf32>
    %323 = vector.multi_reduction <add>, %322, %cst_115 [1] : vector<32x32xf32> to vector<32xf32>
    %324 = vector.shape_cast %323 : vector<32xf32> to vector<32x1xf32>
    %cst_116 = arith.constant 3.200000e+01 : f32
    %325 = vector.broadcast %cst_116 : f32 to vector<32x1xf32>
    %326 = arith.divf %324, %325 : vector<32x1xf32>
    %cst_117 = arith.constant 9.99999974E-6 : f32
    %327 = vector.broadcast %cst_117 : f32 to vector<32x1xf32>
    %328 = arith.addf %326, %327 : vector<32x1xf32>
    %329 = math.rsqrt %328 : vector<32x1xf32>
    %330 = vector.broadcast %329 : vector<32x1xf32> to vector<32x32xf32>
    %331 = arith.mulf %321, %330 : vector<32x32xf32>
    %c4 = arith.constant 4 : index
    %c0_118 = arith.constant 0 : index
    %c0_119 = arith.constant 0 : index
    %332 = vector.load %arg13[%c4, %c0_118, %c0_119] : memref<6x1x32xf32, #tpu.memory_space<vmem>>, vector<1x1x32xf32>
    %333 = vector.shape_cast %332 : vector<1x1x32xf32> to vector<1x32xf32>
    %334 = vector.broadcast %333 : vector<1x32xf32> to vector<32x32xf32>
    %335 = arith.mulf %331, %334 : vector<32x32xf32>
    %c4_120 = arith.constant 4 : index
    %c0_121 = arith.constant 0 : index
    %c0_122 = arith.constant 0 : index
    %336 = vector.load %arg14[%c4_120, %c0_121, %c0_122] : memref<6x1x32xf32, #tpu.memory_space<vmem>>, vector<1x1x32xf32>
    %337 = vector.shape_cast %336 : vector<1x1x32xf32> to vector<1x32xf32>
    %338 = vector.broadcast %337 : vector<1x32xf32> to vector<32x32xf32>
    %339 = arith.addf %335, %338 : vector<32x32xf32>
    %340 = arith.truncf %236 : vector<20x32xf32> to vector<20x32xbf16>
    %c3_123 = arith.constant 3 : index
    %c0_124 = arith.constant 0 : index
    %c0_125 = arith.constant 0 : index
    %341 = vector.load %arg7[%c3_123, %c0_124, %c0_125] : memref<4x32x32xbf16, #tpu.memory_space<vmem>>, vector<1x32x32xbf16>
    %342 = vector.shape_cast %341 : vector<1x32x32xbf16> to vector<32x32xbf16>
    %cst_126 = arith.constant dense<0.000000e+00> : vector<20x32xf32>
    %343 = tpu.matmul %340, %342, %cst_126 {dimension_numbers = #tpu.dot_dimension_numbers<[1], [0], [0], [1], [0, 0, 1, 1], [], []>} : vector<20x32xbf16>, vector<32x32xbf16>, vector<20x32xf32> -> vector<20x32xf32>
    %c3_127 = arith.constant 3 : index
    %c0_128 = arith.constant 0 : index
    %c0_129 = arith.constant 0 : index
    %344 = vector.load %arg8[%c3_127, %c0_128, %c0_129] : memref<4x1x32xf32, #tpu.memory_space<vmem>>, vector<1x1x32xf32>
    %345 = vector.shape_cast %344 : vector<1x1x32xf32> to vector<1x32xf32>
    %346 = vector.broadcast %345 : vector<1x32xf32> to vector<20x32xf32>
    %347 = arith.addf %343, %346 : vector<20x32xf32>
    %348 = arith.truncf %339 : vector<32x32xf32> to vector<32x32xbf16>
    %c3_130 = arith.constant 3 : index
    %c0_131 = arith.constant 0 : index
    %c0_132 = arith.constant 0 : index
    %349 = vector.load %arg9[%c3_130, %c0_131, %c0_132] : memref<4x32x64xbf16, #tpu.memory_space<vmem>>, vector<1x32x64xbf16>
    %350 = vector.shape_cast %349 : vector<1x32x64xbf16> to vector<32x64xbf16>
    %cst_133 = arith.constant dense<0.000000e+00> : vector<32x64xf32>
    %351 = tpu.matmul %348, %350, %cst_133 {dimension_numbers = #tpu.dot_dimension_numbers<[1], [0], [0], [1], [0, 0, 1, 1], [], []>} : vector<32x32xbf16>, vector<32x64xbf16>, vector<32x64xf32> -> vector<32x64xf32>
    %c3_134 = arith.constant 3 : index
    %c0_135 = arith.constant 0 : index
    %c0_136 = arith.constant 0 : index
    %352 = vector.load %arg10[%c3_134, %c0_135, %c0_136] : memref<4x1x64xf32, #tpu.memory_space<vmem>>, vector<1x1x64xf32>
    %353 = vector.shape_cast %352 : vector<1x1x64xf32> to vector<1x64xf32>
    %354 = vector.broadcast %353 : vector<1x64xf32> to vector<32x64xf32>
    %355 = arith.addf %351, %354 : vector<32x64xf32>
    %356 = vector.extract_strided_slice %347 {offsets = [0, 0], sizes = [20, 8], strides = [1, 1]} : vector<20x32xf32> to vector<20x8xf32>
    %357 = vector.extract_strided_slice %347 {offsets = [0, 8], sizes = [20, 8], strides = [1, 1]} : vector<20x32xf32> to vector<20x8xf32>
    %358 = vector.extract_strided_slice %347 {offsets = [0, 16], sizes = [20, 8], strides = [1, 1]} : vector<20x32xf32> to vector<20x8xf32>
    %359 = vector.extract_strided_slice %347 {offsets = [0, 24], sizes = [20, 8], strides = [1, 1]} : vector<20x32xf32> to vector<20x8xf32>
    %360 = vector.shape_cast %356 : vector<20x8xf32> to vector<1x20x8xf32>
    %361 = vector.shape_cast %357 : vector<20x8xf32> to vector<1x20x8xf32>
    %362 = vector.shape_cast %358 : vector<20x8xf32> to vector<1x20x8xf32>
    %363 = vector.shape_cast %359 : vector<20x8xf32> to vector<1x20x8xf32>
    %364 = tpu.concatenate %360, %361, %362, %363 in 0 : vector<1x20x8xf32>, vector<1x20x8xf32>, vector<1x20x8xf32>, vector<1x20x8xf32> -> vector<4x20x8xf32>
    %365 = vector.extract_strided_slice %355 {offsets = [0, 0], sizes = [32, 8], strides = [1, 1]} : vector<32x64xf32> to vector<32x8xf32>
    %366 = vector.extract_strided_slice %355 {offsets = [0, 8], sizes = [32, 8], strides = [1, 1]} : vector<32x64xf32> to vector<32x8xf32>
    %367 = vector.extract_strided_slice %355 {offsets = [0, 16], sizes = [32, 8], strides = [1, 1]} : vector<32x64xf32> to vector<32x8xf32>
    %368 = vector.extract_strided_slice %355 {offsets = [0, 24], sizes = [32, 8], strides = [1, 1]} : vector<32x64xf32> to vector<32x8xf32>
    %369 = vector.shape_cast %365 : vector<32x8xf32> to vector<1x32x8xf32>
    %370 = vector.shape_cast %366 : vector<32x8xf32> to vector<1x32x8xf32>
    %371 = vector.shape_cast %367 : vector<32x8xf32> to vector<1x32x8xf32>
    %372 = vector.shape_cast %368 : vector<32x8xf32> to vector<1x32x8xf32>
    %373 = tpu.concatenate %369, %370, %371, %372 in 0 : vector<1x32x8xf32>, vector<1x32x8xf32>, vector<1x32x8xf32>, vector<1x32x8xf32> -> vector<4x32x8xf32>
    %374 = vector.extract_strided_slice %355 {offsets = [0, 32], sizes = [32, 8], strides = [1, 1]} : vector<32x64xf32> to vector<32x8xf32>
    %375 = vector.extract_strided_slice %355 {offsets = [0, 40], sizes = [32, 8], strides = [1, 1]} : vector<32x64xf32> to vector<32x8xf32>
    %376 = vector.extract_strided_slice %355 {offsets = [0, 48], sizes = [32, 8], strides = [1, 1]} : vector<32x64xf32> to vector<32x8xf32>
    %377 = vector.extract_strided_slice %355 {offsets = [0, 56], sizes = [32, 8], strides = [1, 1]} : vector<32x64xf32> to vector<32x8xf32>
    %378 = vector.shape_cast %374 : vector<32x8xf32> to vector<1x32x8xf32>
    %379 = vector.shape_cast %375 : vector<32x8xf32> to vector<1x32x8xf32>
    %380 = vector.shape_cast %376 : vector<32x8xf32> to vector<1x32x8xf32>
    %381 = vector.shape_cast %377 : vector<32x8xf32> to vector<1x32x8xf32>
    %382 = tpu.concatenate %378, %379, %380, %381 in 0 : vector<1x32x8xf32>, vector<1x32x8xf32>, vector<1x32x8xf32>, vector<1x32x8xf32> -> vector<4x32x8xf32>
    %383 = arith.truncf %364 : vector<4x20x8xf32> to vector<4x20x8xbf16>
    %384 = arith.truncf %373 : vector<4x32x8xf32> to vector<4x32x8xbf16>
    "tpu.trace_start"() <{level = 10 : i32, message = "hqd,hkd->hqk"}> : () -> ()
    %cst_137 = arith.constant dense<0.000000e+00> : vector<4x20x32xf32>
    %385 = tpu.matmul %383, %384, %cst_137 {dimension_numbers = #tpu.dot_dimension_numbers<[2], [2], [1], [1], [0, 0, 0, 1, 1, 1], [0], [0]>} : vector<4x20x8xbf16>, vector<4x32x8xbf16>, vector<4x20x32xf32> -> vector<4x20x32xf32>
    "tpu.trace_stop"() : () -> ()
    %cst_138 = arith.constant 0.353553385 : f32
    %386 = vector.broadcast %cst_138 : f32 to vector<4x20x32xf32>
    %387 = arith.mulf %385, %386 : vector<4x20x32xf32>
    %cst_139 = arith.constant dense<0xFF800000> : vector<4x20xf32>
    %388 = vector.multi_reduction <maximumf>, %387, %cst_139 [2] : vector<4x20x32xf32> to vector<4x20xf32>
    %389 = vector.shape_cast %388 : vector<4x20xf32> to vector<4x20x1xf32>
    %390 = vector.broadcast %389 : vector<4x20x1xf32> to vector<4x20x32xf32>
    %391 = arith.subf %387, %390 : vector<4x20x32xf32>
    %392 = math.exp %391 : vector<4x20x32xf32>
    %cst_140 = arith.constant dense<0.000000e+00> : vector<4x20xf32>
    %393 = vector.multi_reduction <add>, %392, %cst_140 [2] : vector<4x20x32xf32> to vector<4x20xf32>
    %394 = vector.shape_cast %393 : vector<4x20xf32> to vector<4x20x1xf32>
    %395 = tpu.reciprocal %394 {approx = true} : vector<4x20x1xf32> -> vector<4x20x1xf32>
    %396 = vector.broadcast %395 : vector<4x20x1xf32> to vector<4x20x32xf32>
    %397 = arith.mulf %392, %396 : vector<4x20x32xf32>
    %398 = arith.truncf %397 : vector<4x20x32xf32> to vector<4x20x32xbf16>
    %399 = arith.truncf %382 : vector<4x32x8xf32> to vector<4x32x8xbf16>
    "tpu.trace_start"() <{level = 10 : i32, message = "hqk,hkd->hqd"}> : () -> ()
    %cst_141 = arith.constant dense<0.000000e+00> : vector<4x20x8xf32>
    %400 = tpu.matmul %398, %399, %cst_141 {dimension_numbers = #tpu.dot_dimension_numbers<[2], [1], [1], [2], [0, 0, 0, 1, 1, 2], [0], [0]>} : vector<4x20x32xbf16>, vector<4x32x8xbf16>, vector<4x20x8xf32> -> vector<4x20x8xf32>
    "tpu.trace_stop"() : () -> ()
    %401 = vector.extract_strided_slice %400 {offsets = [0, 0, 0], sizes = [1, 20, 8], strides = [1, 1, 1]} : vector<4x20x8xf32> to vector<1x20x8xf32>
    %402 = vector.shape_cast %401 : vector<1x20x8xf32> to vector<20x8xf32>
    %403 = vector.extract_strided_slice %400 {offsets = [1, 0, 0], sizes = [1, 20, 8], strides = [1, 1, 1]} : vector<4x20x8xf32> to vector<1x20x8xf32>
    %404 = vector.shape_cast %403 : vector<1x20x8xf32> to vector<20x8xf32>
    %405 = vector.extract_strided_slice %400 {offsets = [2, 0, 0], sizes = [1, 20, 8], strides = [1, 1, 1]} : vector<4x20x8xf32> to vector<1x20x8xf32>
    %406 = vector.shape_cast %405 : vector<1x20x8xf32> to vector<20x8xf32>
    %407 = vector.extract_strided_slice %400 {offsets = [3, 0, 0], sizes = [1, 20, 8], strides = [1, 1, 1]} : vector<4x20x8xf32> to vector<1x20x8xf32>
    %408 = vector.shape_cast %407 : vector<1x20x8xf32> to vector<20x8xf32>
    %409 = tpu.concatenate %402, %404, %406, %408 in 1 : vector<20x8xf32>, vector<20x8xf32>, vector<20x8xf32>, vector<20x8xf32> -> vector<20x32xf32>
    %410 = arith.truncf %409 : vector<20x32xf32> to vector<20x32xbf16>
    %c3_142 = arith.constant 3 : index
    %c0_143 = arith.constant 0 : index
    %c0_144 = arith.constant 0 : index
    %411 = vector.load %arg11[%c3_142, %c0_143, %c0_144] : memref<4x32x32xbf16, #tpu.memory_space<vmem>>, vector<1x32x32xbf16>
    %412 = vector.shape_cast %411 : vector<1x32x32xbf16> to vector<32x32xbf16>
    %cst_145 = arith.constant dense<0.000000e+00> : vector<20x32xf32>
    %413 = tpu.matmul %410, %412, %cst_145 {dimension_numbers = #tpu.dot_dimension_numbers<[1], [0], [0], [1], [0, 0, 1, 1], [], []>} : vector<20x32xbf16>, vector<32x32xbf16>, vector<20x32xf32> -> vector<20x32xf32>
    %c3_146 = arith.constant 3 : index
    %c0_147 = arith.constant 0 : index
    %c0_148 = arith.constant 0 : index
    %414 = vector.load %arg12[%c3_146, %c0_147, %c0_148] : memref<4x1x32xf32, #tpu.memory_space<vmem>>, vector<1x1x32xf32>
    %415 = vector.shape_cast %414 : vector<1x1x32xf32> to vector<1x32xf32>
    %416 = vector.broadcast %415 : vector<1x32xf32> to vector<20x32xf32>
    %417 = arith.addf %413, %416 : vector<20x32xf32>
    %418 = arith.addf %236, %417 : vector<20x32xf32>
    %cst_149 = arith.constant dense<0.000000e+00> : vector<20xf32>
    %419 = vector.multi_reduction <add>, %418, %cst_149 [1] : vector<20x32xf32> to vector<20xf32>
    %420 = vector.shape_cast %419 : vector<20xf32> to vector<20x1xf32>
    %cst_150 = arith.constant 3.200000e+01 : f32
    %421 = vector.broadcast %cst_150 : f32 to vector<20x1xf32>
    %422 = arith.divf %420, %421 : vector<20x1xf32>
    %423 = vector.broadcast %422 : vector<20x1xf32> to vector<20x32xf32>
    %424 = arith.subf %418, %423 : vector<20x32xf32>
    %425 = arith.mulf %424, %424 : vector<20x32xf32>
    %cst_151 = arith.constant dense<0.000000e+00> : vector<20xf32>
    %426 = vector.multi_reduction <add>, %425, %cst_151 [1] : vector<20x32xf32> to vector<20xf32>
    %427 = vector.shape_cast %426 : vector<20xf32> to vector<20x1xf32>
    %cst_152 = arith.constant 3.200000e+01 : f32
    %428 = vector.broadcast %cst_152 : f32 to vector<20x1xf32>
    %429 = arith.divf %427, %428 : vector<20x1xf32>
    %cst_153 = arith.constant 9.99999974E-6 : f32
    %430 = vector.broadcast %cst_153 : f32 to vector<20x1xf32>
    %431 = arith.addf %429, %430 : vector<20x1xf32>
    %432 = math.rsqrt %431 : vector<20x1xf32>
    %433 = vector.broadcast %432 : vector<20x1xf32> to vector<20x32xf32>
    %434 = arith.mulf %424, %433 : vector<20x32xf32>
    %c5 = arith.constant 5 : index
    %c0_154 = arith.constant 0 : index
    %c0_155 = arith.constant 0 : index
    %435 = vector.load %arg13[%c5, %c0_154, %c0_155] : memref<6x1x32xf32, #tpu.memory_space<vmem>>, vector<1x1x32xf32>
    %436 = vector.shape_cast %435 : vector<1x1x32xf32> to vector<1x32xf32>
    %437 = vector.broadcast %436 : vector<1x32xf32> to vector<20x32xf32>
    %438 = arith.mulf %434, %437 : vector<20x32xf32>
    %c5_156 = arith.constant 5 : index
    %c0_157 = arith.constant 0 : index
    %c0_158 = arith.constant 0 : index
    %439 = vector.load %arg14[%c5_156, %c0_157, %c0_158] : memref<6x1x32xf32, #tpu.memory_space<vmem>>, vector<1x1x32xf32>
    %440 = vector.shape_cast %439 : vector<1x1x32xf32> to vector<1x32xf32>
    %441 = vector.broadcast %440 : vector<1x32xf32> to vector<20x32xf32>
    %442 = arith.addf %438, %441 : vector<20x32xf32>
    %443 = arith.truncf %133 : vector<8x32xf32> to vector<8x32xbf16>
    %c0_159 = arith.constant 0 : index
    %c0_160 = arith.constant 0 : index
    %444 = vector.load %arg15[%c0_159, %c0_160] : memref<32x64xbf16, #tpu.memory_space<vmem>>, vector<32x64xbf16>
    %cst_161 = arith.constant dense<0.000000e+00> : vector<8x64xf32>
    %445 = tpu.matmul %443, %444, %cst_161 {dimension_numbers = #tpu.dot_dimension_numbers<[1], [0], [0], [1], [0, 0, 1, 1], [], []>} : vector<8x32xbf16>, vector<32x64xbf16>, vector<8x64xf32> -> vector<8x64xf32>
    %c0_162 = arith.constant 0 : index
    %c0_163 = arith.constant 0 : index
    %446 = vector.load %arg16[%c0_162, %c0_163] : memref<1x64xf32, #tpu.memory_space<vmem>>, vector<1x64xf32>
    %447 = vector.broadcast %446 : vector<1x64xf32> to vector<8x64xf32>
    %448 = arith.addf %445, %447 : vector<8x64xf32>
    %cst_164 = arith.constant 0.000000e+00 : f32
    %449 = vector.broadcast %cst_164 : f32 to vector<8x64xf32>
    %450 = arith.maximumf %448, %449 : vector<8x64xf32>
    %451 = arith.truncf %450 : vector<8x64xf32> to vector<8x64xbf16>
    %c0_165 = arith.constant 0 : index
    %c0_166 = arith.constant 0 : index
    %452 = vector.load %arg17[%c0_165, %c0_166] : memref<64x32xbf16, #tpu.memory_space<vmem>>, vector<64x32xbf16>
    %cst_167 = arith.constant dense<0.000000e+00> : vector<8x32xf32>
    %453 = tpu.matmul %451, %452, %cst_167 {dimension_numbers = #tpu.dot_dimension_numbers<[1], [0], [0], [1], [0, 0, 1, 1], [], []>} : vector<8x64xbf16>, vector<64x32xbf16>, vector<8x32xf32> -> vector<8x32xf32>
    %c0_168 = arith.constant 0 : index
    %c0_169 = arith.constant 0 : index
    %454 = vector.load %arg18[%c0_168, %c0_169] : memref<1x32xf32, #tpu.memory_space<vmem>>, vector<1x32xf32>
    %455 = vector.broadcast %454 : vector<1x32xf32> to vector<8x32xf32>
    %456 = arith.addf %453, %455 : vector<8x32xf32>
    %457 = arith.addf %133, %456 : vector<8x32xf32>
    %cst_170 = arith.constant dense<0.000000e+00> : vector<8xf32>
    %458 = vector.multi_reduction <add>, %457, %cst_170 [1] : vector<8x32xf32> to vector<8xf32>
    %459 = vector.shape_cast %458 : vector<8xf32> to vector<8x1xf32>
    %cst_171 = arith.constant 3.200000e+01 : f32
    %460 = vector.broadcast %cst_171 : f32 to vector<8x1xf32>
    %461 = arith.divf %459, %460 : vector<8x1xf32>
    %462 = vector.broadcast %461 : vector<8x1xf32> to vector<8x32xf32>
    %463 = arith.subf %457, %462 : vector<8x32xf32>
    %464 = arith.mulf %463, %463 : vector<8x32xf32>
    %cst_172 = arith.constant dense<0.000000e+00> : vector<8xf32>
    %465 = vector.multi_reduction <add>, %464, %cst_172 [1] : vector<8x32xf32> to vector<8xf32>
    %466 = vector.shape_cast %465 : vector<8xf32> to vector<8x1xf32>
    %cst_173 = arith.constant 3.200000e+01 : f32
    %467 = vector.broadcast %cst_173 : f32 to vector<8x1xf32>
    %468 = arith.divf %466, %467 : vector<8x1xf32>
    %cst_174 = arith.constant 9.99999974E-6 : f32
    %469 = vector.broadcast %cst_174 : f32 to vector<8x1xf32>
    %470 = arith.addf %468, %469 : vector<8x1xf32>
    %471 = math.rsqrt %470 : vector<8x1xf32>
    %472 = vector.broadcast %471 : vector<8x1xf32> to vector<8x32xf32>
    %473 = arith.mulf %463, %472 : vector<8x32xf32>
    %c2_175 = arith.constant 2 : index
    %c0_176 = arith.constant 0 : index
    %c0_177 = arith.constant 0 : index
    %474 = vector.load %arg13[%c2_175, %c0_176, %c0_177] : memref<6x1x32xf32, #tpu.memory_space<vmem>>, vector<1x1x32xf32>
    %475 = vector.shape_cast %474 : vector<1x1x32xf32> to vector<1x32xf32>
    %476 = vector.broadcast %475 : vector<1x32xf32> to vector<8x32xf32>
    %477 = arith.mulf %473, %476 : vector<8x32xf32>
    %c2_178 = arith.constant 2 : index
    %c0_179 = arith.constant 0 : index
    %c0_180 = arith.constant 0 : index
    %478 = vector.load %arg14[%c2_178, %c0_179, %c0_180] : memref<6x1x32xf32, #tpu.memory_space<vmem>>, vector<1x1x32xf32>
    %479 = vector.shape_cast %478 : vector<1x1x32xf32> to vector<1x32xf32>
    %480 = vector.broadcast %479 : vector<1x32xf32> to vector<8x32xf32>
    %481 = arith.addf %477, %480 : vector<8x32xf32>
    %c0_181 = arith.constant 0 : index
    %c0_182 = arith.constant 0 : index
    %482 = vector.load %arg22[%c0_181, %c0_182] : memref<8x32xf32, #tpu.memory_space<vmem>>, vector<8x32xf32>
    tpu.vector_store %arg22[%c0_181, %c0_182], %481 {strides = array<i32>} : memref<8x32xf32, #tpu.memory_space<vmem>>, vector<8x32xf32>,
    %c0_183 = arith.constant 0 : index
    %c0_184 = arith.constant 0 : index
    %483 = vector.load %arg23[%c0_183, %c0_184] : memref<20x32xf32, #tpu.memory_space<vmem>>, vector<20x32xf32>
    tpu.vector_store %arg23[%c0_183, %c0_184], %442 {strides = array<i32>} : memref<20x32xf32, #tpu.memory_space<vmem>>, vector<20x32xf32>,
    %c0_185 = arith.constant 0 : index
    %c0_186 = arith.constant 0 : index
    %484 = vector.load %arg24[%c0_185, %c0_186] : memref<32x32xf32, #tpu.memory_space<vmem>>, vector<32x32xf32>
    tpu.vector_store %arg24[%c0_185, %c0_186], %339 {strides = array<i32>} : memref<32x32xf32, #tpu.memory_space<vmem>>, vector<32x32xf32>,
    %c1_i32 = arith.constant 1 : i32
    %485 = arith.cmpi eq, %arg1, %c1_i32 : i32
    %486 = arith.extui %485 : i1 to i32
    %c0_i32_187 = arith.constant 0 : i32
    %487 = arith.cmpi ne, %486, %c0_i32_187 : i32
    scf.if %487 {
      %c0_188 = arith.constant 0 : index
      %c0_189 = arith.constant 0 : index
      %488 = vector.load %arg19[%c0_188, %c0_189] : memref<8x32xf32, #tpu.memory_space<vmem>>, vector<8x32xf32>
      %489 = arith.mulf %481, %488 : vector<8x32xf32>
      %cst_190 = arith.constant dense<0.000000e+00> : vector<8xf32>
      %490 = vector.multi_reduction <add>, %489, %cst_190 [1] : vector<8x32xf32> to vector<8xf32>
      %c0_191 = arith.constant 0 : index
      %491 = memref.load %arg20[%c0_191] : memref<1xf32, #tpu.memory_space<smem>>
      %492 = vector.broadcast %491 : f32 to vector<8xf32>
      %493 = arith.addf %490, %492 : vector<8xf32>
      %494 = vector.shape_cast %493 : vector<8xf32> to vector<1x8xf32>
      %c0_192 = arith.constant 0 : index
      %c0_193 = arith.constant 0 : index
      %c0_194 = arith.constant 0 : index
      %495 = vector.load %arg21[%c0_192, %c0_193, %c0_194] : memref<1x1x8xf32, #tpu.memory_space<vmem>>, vector<1x1x8xf32>
      %496 = vector.shape_cast %495 : vector<1x1x8xf32> to vector<1x8xf32>
      %497 = vector.shape_cast %494 : vector<1x8xf32> to vector<1x1x8xf32>
      tpu.vector_store %arg21[%c0_192, %c0_193, %c0_194], %497 {strides = array<i32>} : memref<1x1x8xf32, #tpu.memory_space<vmem>>, vector<1x1x8xf32>,
    } else {
    }
    return
  }
  func.func @transform_0(%arg0: i32, %arg1: i32) -> (i32, i32, i32) {
    %c0_i32 = arith.constant 0 : i32
    %c0_i32_0 = arith.constant 0 : i32
    %c0_i32_1 = arith.constant 0 : i32
    return %arg0, %c0_i32, %c0_i32_0 : i32, i32, i32
  }
  func.func @transform_1(%arg0: i32, %arg1: i32) -> (i32, i32) {
    %c0_i32 = arith.constant 0 : i32
    %c0_i32_0 = arith.constant 0 : i32
    %c0_i32_1 = arith.constant 0 : i32
    return %c0_i32, %c0_i32_0 : i32, i32
  }
  func.func @transform_2(%arg0: i32, %arg1: i32) -> (i32, i32, i32) {
    %c0_i32 = arith.constant 0 : i32
    %c0_i32_0 = arith.constant 0 : i32
    %c0_i32_1 = arith.constant 0 : i32
    return %arg0, %c0_i32, %c0_i32_0 : i32, i32, i32
  }
  func.func @transform_3(%arg0: i32, %arg1: i32) -> (i32, i32) {
    %c0_i32 = arith.constant 0 : i32
    %c0_i32_0 = arith.constant 0 : i32
    %c0_i32_1 = arith.constant 0 : i32
    return %c0_i32, %c0_i32_0 : i32, i32
  }
  func.func @transform_4(%arg0: i32, %arg1: i32) -> (i32, i32) {
    %c0_i32 = arith.constant 0 : i32
    %c0_i32_0 = arith.constant 0 : i32
    %c0_i32_1 = arith.constant 0 : i32
    return %c0_i32, %c0_i32_0 : i32, i32
  }
  func.func @transform_5(%arg0: i32, %arg1: i32) -> (i32, i32, i32) {
    %c0_i32 = arith.constant 0 : i32
    %c0_i32_0 = arith.constant 0 : i32
    %c0_i32_1 = arith.constant 0 : i32
    %c0_i32_2 = arith.constant 0 : i32
    return %c0_i32, %c0_i32_0, %c0_i32_1 : i32, i32, i32
  }
  func.func @transform_6(%arg0: i32, %arg1: i32) -> (i32, i32, i32) {
    %c0_i32 = arith.constant 0 : i32
    %c0_i32_0 = arith.constant 0 : i32
    %c0_i32_1 = arith.constant 0 : i32
    %c0_i32_2 = arith.constant 0 : i32
    return %c0_i32, %c0_i32_0, %c0_i32_1 : i32, i32, i32
  }
  func.func @transform_7(%arg0: i32, %arg1: i32) -> (i32, i32, i32) {
    %c0_i32 = arith.constant 0 : i32
    %c0_i32_0 = arith.constant 0 : i32
    %c0_i32_1 = arith.constant 0 : i32
    %c0_i32_2 = arith.constant 0 : i32
    return %c0_i32, %c0_i32_0, %c0_i32_1 : i32, i32, i32
  }
  func.func @transform_8(%arg0: i32, %arg1: i32) -> (i32, i32, i32) {
    %c0_i32 = arith.constant 0 : i32
    %c0_i32_0 = arith.constant 0 : i32
    %c0_i32_1 = arith.constant 0 : i32
    %c0_i32_2 = arith.constant 0 : i32
    return %c0_i32, %c0_i32_0, %c0_i32_1 : i32, i32, i32
  }
  func.func @transform_9(%arg0: i32, %arg1: i32) -> (i32, i32, i32) {
    %c0_i32 = arith.constant 0 : i32
    %c0_i32_0 = arith.constant 0 : i32
    %c0_i32_1 = arith.constant 0 : i32
    %c0_i32_2 = arith.constant 0 : i32
    return %c0_i32, %c0_i32_0, %c0_i32_1 : i32, i32, i32
  }
  func.func @transform_10(%arg0: i32, %arg1: i32) -> (i32, i32, i32) {
    %c0_i32 = arith.constant 0 : i32
    %c0_i32_0 = arith.constant 0 : i32
    %c0_i32_1 = arith.constant 0 : i32
    %c0_i32_2 = arith.constant 0 : i32
    return %c0_i32, %c0_i32_0, %c0_i32_1 : i32, i32, i32
  }
  func.func @transform_11(%arg0: i32, %arg1: i32) -> (i32, i32, i32) {
    %c0_i32 = arith.constant 0 : i32
    %c0_i32_0 = arith.constant 0 : i32
    %c0_i32_1 = arith.constant 0 : i32
    %c0_i32_2 = arith.constant 0 : i32
    return %c0_i32, %c0_i32_0, %c0_i32_1 : i32, i32, i32
  }
  func.func @transform_12(%arg0: i32, %arg1: i32) -> (i32, i32, i32) {
    %c0_i32 = arith.constant 0 : i32
    %c0_i32_0 = arith.constant 0 : i32
    %c0_i32_1 = arith.constant 0 : i32
    %c0_i32_2 = arith.constant 0 : i32
    return %c0_i32, %c0_i32_0, %c0_i32_1 : i32, i32, i32
  }
  func.func @transform_13(%arg0: i32, %arg1: i32) -> (i32, i32) {
    %c0_i32 = arith.constant 0 : i32
    %c0_i32_0 = arith.constant 0 : i32
    %c0_i32_1 = arith.constant 0 : i32
    return %c0_i32, %c0_i32_0 : i32, i32
  }
  func.func @transform_14(%arg0: i32, %arg1: i32) -> (i32, i32) {
    %c0_i32 = arith.constant 0 : i32
    %c0_i32_0 = arith.constant 0 : i32
    %c0_i32_1 = arith.constant 0 : i32
    return %c0_i32, %c0_i32_0 : i32, i32
  }
  func.func @transform_15(%arg0: i32, %arg1: i32) -> (i32, i32) {
    %c0_i32 = arith.constant 0 : i32
    %c0_i32_0 = arith.constant 0 : i32
    %c0_i32_1 = arith.constant 0 : i32
    return %c0_i32, %c0_i32_0 : i32, i32
  }
  func.func @transform_16(%arg0: i32, %arg1: i32) -> (i32, i32) {
    %c0_i32 = arith.constant 0 : i32
    %c0_i32_0 = arith.constant 0 : i32
    %c0_i32_1 = arith.constant 0 : i32
    return %c0_i32, %c0_i32_0 : i32, i32
  }
  func.func @transform_17(%arg0: i32, %arg1: i32) -> (i32, i32) {
    %c0_i32 = arith.constant 0 : i32
    %c0_i32_0 = arith.constant 0 : i32
    %c0_i32_1 = arith.constant 0 : i32
    return %c0_i32, %c0_i32_0 : i32, i32
  }
  func.func @transform_18(%arg0: i32, %arg1: i32) -> i32 {
    %c0_i32 = arith.constant 0 : i32
    %c0_i32_0 = arith.constant 0 : i32
    return %c0_i32 : i32
  }
  func.func @transform_19(%arg0: i32, %arg1: i32) -> (i32, i32, i32) {
    %c0_i32 = arith.constant 0 : i32
    %c0_i32_0 = arith.constant 0 : i32
    %c0_i32_1 = arith.constant 0 : i32
    return %arg0, %c0_i32, %c0_i32_0 : i32, i32, i32
  }
}

</mosaic_0001>

<bundles_post_ra>
// kernel: _lambda_.1
= control target key start
LH: loop header
LB: loop body
LE: loop exit
PB: predicated region body
PF: predicated region fallthrough
CT: control target
= control target key end

     0   :  { %s8015_s0 = inlined_call_operand.vmem [shape: f32[2,20,4], index: 0, kind: input, shape index: {}]   ;;  %s8016_s1 = inlined_call_operand.vmem [shape: f32[8,32], index: 1, kind: input, shape index: {}]   ;;  %s8017_s2 = inlined_call_operand.vmem [shape: f32[2,32,32], index: 2, kind: input, shape index: {}]   ;;  %s8018_s3 = inlined_call_operand.vmem [shape: bf16[4,32], index: 3, kind: input, shape index: {}]   ;;  %s8019_s4 = inlined_call_operand.vmem [shape: f32[1,32], index: 4, kind: input, shape index: {}]   ;;  %s8020_s5 = inlined_call_operand.vmem [shape: bf16[4,32,32], index: 5, kind: input, shape index: {}]   ;;  %s8021_s6 = inlined_call_operand.vmem [shape: f32[4,1,32], index: 6, kind: input, shape index: {}]   ;;  %s8022_s7 = inlined_call_operand.vmem [shape: bf16[4,32,64], index: 7, kind: input, shape index: {}]   ;;  %s8023_s8 = inlined_call_operand.vmem [shape: f32[4,1,64], index: 8, kind: input, shape index: {}]   ;;  %s8024_s9 = inlined_call_operand.vmem [shape: bf16[4,32,32], index: 9, kind: input, shape index: {}]   ;;  %s8025_s10 = inlined_call_operand.vmem [shape: f32[4,1,32], index: 10, kind: input, shape index: {}]   ;;  %s8026_s11 = inlined_call_operand.vmem [shape: f32[6,1,32], index: 11, kind: input, shape index: {}]   ;;  %s8027_s12 = inlined_call_operand.vmem [shape: f32[6,1,32], index: 12, kind: input, shape index: {}]   ;;  %s8028_s13 = inlined_call_operand.vmem [shape: bf16[32,64], index: 13, kind: input, shape index: {}]   ;;  %s8029_s14 = inlined_call_operand.vmem [shape: f32[1,64], index: 14, kind: input, shape index: {}]   ;;  %s8030_s15 = inlined_call_operand.vmem [shape: bf16[64,32], index: 15, kind: input, shape index: {}]   ;;  %s8031_s16 = inlined_call_operand.vmem [shape: f32[1,32], index: 16, kind: input, shape index: {}]   ;;  %s8032_s17 = inlined_call_operand.vmem [shape: f32[8,32], index: 17, kind: input, shape index: {}]   ;;  %s8033_s18 = inlined_call_operand.<no memory space> [shape: f32[1], index: 18, kind: input, shape index: {}]   ;;  %s8034_s19 = inlined_call_operand.hbm [shape: f32[2,1,8], index: 19, kind: output, shape index: {}]  }
   0x1   :  { %8047 = sst [smem:[#allocation19_spill]] %s8015_s0 }
   0x2   :  { %8048 = sst [smem:[#allocation20_spill]] %s8016_s1 }
   0x3   :  { %8049 = sst [smem:[#allocation21_spill]] %s8017_s2 }
   0x4   :  { %8050 = sst [smem:[#allocation22_spill]] %s8018_s3 }
   0x5   :  { %8051 = sst [smem:[#allocation23_spill]] %s8031_s16 }
   0x6   :  { %8052 = sst [smem:[#allocation24_spill]] %s8032_s17 }
   0x7   :  { %8053 = sst [smem:[#allocation25_spill]] %s8034_s19 }
   0x8   :  { %24 = sst [smem:[#allocation5]] %s8033_s18 }
   0x9   :  { %25 = vsyncpa [#allocation7], 0 }
   0xa   :  { %27 = vsyncpa [#allocation7 + $0x1], 0  ;;  %s6688_s20 = smov 0   ;;  %s6690_s21 = smov 0  }
   0xb   :  { %s6692_s1 = smov 0   ;;  %s6694_s22 = smov 0  }
   0xc   :  { %s6696_s2 = smov 0   ;;  %s6698_s23 = smov 0  }
   0xd   :  { %s6700_s24 = smov 0   ;;  %s6702_s25 = smov 0  }
   0xe LB: > { %8054 = sst [smem:[#allocation9_spill]] %s6545_s20  ;;  %s5157_s18 = sadd.s32 4294967295, %s6573_s25   ;;  %s6573_s25 = sphi %s6702_s25, %s33_s25   ;;  %s6569_s24 = sphi %s6700_s24, %s8084_s24   ;;  %s6565_s23 = sphi %s6698_s23, %s8087_s23   ;;  %s6561_s2 = sphi %s6696_s2, %s8082_s2   ;;  %s6557_s22 = sphi %s6694_s22, %s8081_s22   ;;  %s6553_s1 = sphi %s6692_s1, %s8080_s1   ;;  %s6549_s21 = sphi %s6690_s21, %s8086_s21   ;;  %s6545_s20 = sphi %s6688_s20, %s8085_s20  }
   0xf   : > { %8055 = sst [smem:[#allocation10_spill]] %s6553_s1  ;;  %s5158_s3 = sadd.s32 4294967294, %s6573_s25  }
  0x10   : > { %8056 = sst [smem:[#allocation11_spill]] %s6565_s23  ;;  %s42_s26 = sadd.s32 1, %s6565_s23 }
  0x11   : > { %8057 = sst [smem:[#allocation12_spill]] %s6569_s24  ;;  %p43_p0 = scmp.ge.s32.totalorder %s42_s26, 2 }
  0x12   : > { %8058 = sst [smem:[#allocation13_spill]] %s6573_s25  ;;  %s45_s27 = sadd.s32 1, %s6569_s24 }
  0x13   : > { %p471_p1 = scmp.ne.s32.totalorder %s6553_s1, %s6549_s21  ;;  %p472_p2 = scmp.eq.s32.totalorder %s5157_s18, 3 }
  0x14   : > { %s8089_s26 = smov (%p43_p0, %s42_s26), 0  ;;  %s8091_s27 = smov (!%p43_p0, %s45_s27), %s6569_s24 }
  0x15   : > { %8059 = sst [smem:[#allocation14_spill]] %s8089_s26  ;;  %p6737_p3 = por %p472_p2, %p471_p1 }
  0x16   : > { %p477_p4 = scmp.ne.s32.totalorder %s6549_s21, %s6545_s20  ;;  %p47_p5 = scmp.ge.s32.totalorder %s8091_s27, 2 }
  0x17   : > { %s8060_s28 = scalar_select %p6737_p3, 1, 0 }
  0x18   : > { %p478_p6 = scmp.eq.s32.totalorder %s5158_s3, 3  ;;  %p5161_p7 = scmp.ge.s32.totalorder %s6573_s25, 1 }
  0x19   : > { %8061 = sst [smem:[#allocation15_spill]] %s8060_s28  ;;  %p563_p8 = scmp.lt.s32.totalorder %s6573_s25, 5 }
  0x1a   : > { %s8093_s27 = smov (%p47_p5, %s8091_s27), 0  ;;  %p6747_p9 = por %p478_p6, %p477_p4 }
  0x1b   : > { %8062 = sst [smem:[#allocation16_spill]] %s8093_s27  ;;  %p564_p10 = pnand %p5161_p7, %p563_p8 }
  0x1c   : > { %s8063_s29 = scalar_select %p6747_p9, 1, 0 }
  0x1d   : > { %s458_s0 = ssub.s32 %s6569_s24, %s8093_s27  ;;  %s461_s30 = sadd.s32 1, %s6553_s1 }
  0x1e   : > { %8064 = sst [smem:[#allocation17_spill]] %s8063_s29  ;;  %p459_p11 = scmp.eq.s32.totalorder %s458_s0, 0 }
  0x1f   : > { %567 = sbr.rel (%p564_p10) target bundleno = 6823 (0x1aa7), region = 96  ;;  %s8046_s3 = sand.u32 (!%p564_p10), 1, %s6549_s21  }
  0x20   : > { %s6755_s18 = scalar_select %p459_p11, %s6553_s1, %s461_s30  }
  0x21   : > { %p623_p12 = scmp.lt.s32.totalorder (!%p564_p10), %s6561_s2, 1  ;;  %s8066_s28 = sld [smem:[#allocation21_spill]] (!%p564_p10) }
  0x22   : > { %8065 = sst [smem:[#allocation18_spill]] %s6755_s18  ;;  %s8067_s24 = sld [smem:[#allocation19_spill]] (!%p564_p10) }
  0x23   : > { %s6768_s30 = scalar_lea.vmem (!%p564_p10), [#allocation6], %s8046_s3  ;;  %p5165_p13 = scmp.ne.s32.totalorder (!%p564_p10), %s6557_s22, 0 }
  0x26   : > { %s624_s26 = scalar_select %p623_p12, %s6561_s2, 1 }
  0x27   : > { %637 = sbr.rel (%p5165_p13) target bundleno = 268 (0x10c), region = 100  ;;  %s8068_s16 = sld [smem:[#allocation22_spill]] (!%p5165_p13)  ;;  %vm658_vm0 = vcmask (!%p5165_p13), 1041408   ;;  %vm651_vm1 = vcmask (!%p5165_p13), 31744   ;;  %vm710_vm2 = vcmask (!%p5165_p13), 261120   ;;  %vm713_vm3 = vcmask (!%p5165_p13), 257024  }
  0x28   : > { %s5949_s23 = smul.u32 24, %s624_s26  ;;  %s5364_s20 = sshll.u32 %s624_s26, 5  ;;  %v5166_v12 = vld [vmem:[%s8019_s4] ss:$0 sm:$0xff] (!%p5165_p13) }
  0x29   : > { %s632_s29 = scalar_lea.vmem %s8066_s28, %s5364_s20  ;;  %s8069_s19 = sld [smem:[#allocation20_spill]] (!%p5165_p13) }
  0x2a   : > { %s627_s0 = scalar_lea.vmem %s8067_s24, %s5949_s23  ;;  %v715_v7 = vld [vmem:[%s632_s29] sm:$0xff] (!%p5165_p13)  ;;  %v716_v8 = vld [vmem:[%s632_s29 + $0x8] sm:$0xff] (!%p5165_p13)  ;;  %v717_v9 = vld [vmem:[%s632_s29 + $0x10] sm:$0xff] (!%p5165_p13) }
  0x2b   : > { %v638_v1 = vld [vmem:[%s627_s0] sm:$0xff] (!%p5165_p13)  ;;  %v639_v2 = vld [vmem:[%s627_s0 + $0x8] sm:$0xff] (!%p5165_p13)  ;;  %v640_v5 = vld [vmem:[%s627_s0 + $0x10] sm:$0xf] (!%p5165_p13)  ;;  %719 = vst.msk [vmem:[#allocation4] sm:$0xff] (!%p5165_p13), %vm710_vm2, %v715_v7 }
  0x2c   : > { %v641_v4 = vpack.c.bf16 (!%p5165_p13), %v639_v2, %v638_v1  ;;  %v642_v6 = vpack.c.bf16 (!%p5165_p13), %v640_v5, %v640_v5  ;;  %v718_v10 = vld [vmem:[%s632_s29 + $0x18] sm:$0xff] (!%p5165_p13)  ;;  %720 = vst.msk [vmem:[#allocation4 + $0x8] sm:$0xff] (!%p5165_p13), %vm710_vm2, %v716_v8  ;;  %721 = vst.msk [vmem:[#allocation4 + $0x10] sm:$0xff] (!%p5165_p13), %vm710_vm2, %v717_v9 }
  0x2d   : > { %v643_v0 = vld [vmem:[%s8068_s16] sm:$0x3] (!%p5165_p13)  ;;  %722 = vst.msk [vmem:[#allocation4 + $0x18] sm:$0xff] (!%p5165_p13), %vm710_vm2, %v718_v10 }
  0x2e   : > { %5920 = vmatprep.subr.msk.bf16.mxu0 %vm658_vm0, %v643_v0  ;;  %v660_v3 = vsel %vm658_vm0, %v643_v0, 0  ;;  %5544 = vmatprep.mubr.msk.bf16.mxu0 %vm651_vm1, %v641_v4 }
  0x2f   : > { %5543 = vmatpush3.bf16.msra.mxu0 %v660_v3  ;;  %v723_v11 = vld [vmem:[%s8069_s19] sm:$0xff] }
  0x30   : > { %724 = vst.msk [vmem:[#allocation2] sm:$0xff] %vm710_vm2, %v723_v11 }
  0x32   : > { %5545 = vmatmul.mubr.msk.bf16.vlgmr.msra.gmra.mrb[0].mxu0 %vm651_vm1, %v642_v6 }
 0x105   : > { %v5546_v13 = vpop.f32.mrb[0].mxu0 }
 0x106   : > { %v705_v14 = vadd.f32 %v5546_v13, %v5166_v12  ;;  %v696_v15 = vpop.f32.mrb[1].mxu0 }
 0x107   : > { %v697_v16 = vadd.f32 %v5166_v12, %v696_v15  ;;  %v5547_v17 = vpop.f32.mrb[2].mxu0 }
 0x108   : > { %714 = vst.msk [vmem:[#allocation3 + $0x10] sm:$0xf] %vm713_vm3, %v705_v14  ;;  %v699_v18 = vpop.f32.mrb[3].mxu0 }
 0x109   : > { %711 = vst.msk [vmem:[#allocation3] sm:$0xff] %vm710_vm2, %v697_v16  ;;  %v700_v19 = vadd.f32 %v5166_v12, %v699_v18 }
 0x10b   : > { %712 = vst.msk [vmem:[#allocation3 + $0x8] sm:$0xff] %vm710_vm2, %v700_v19 }
 0x10c PF: > { %v725_v20 = vld [vmem:[#allocation2] sm:$0xff]  ;;  %vm734_vm4 = vcmask 261120   ;;  %v6241_v24 = vld [vmem:[%s8022_s7 + $0x8] sm:$0xff]   ;;  %v6575_v36 = vmov 0.0   ;;  %vm6576_vm5 = vmmov 0   ;;  %s6577_s17 = smov 120  }
 0x10d   : > { %v733_v21 = vadd.f32 %v725_v20, %v725_v20  ;;  %v6240_v23 = vld [vmem:[%s8022_s7] sm:$0xff]   ;;  %5548 = vmatprep.subr.bf16.mxu0 %v6575_v36  ;;  %5552 = vmatprep.mubr.msk.bf16.mxu0 %vm6576_vm5, %v6575_v36  ;;  %v6243_v37 = vld [vmem:[%s8020_s5 + $0x8] sm:$0xff]   ;;  %s6578_s19 = smov 112   ;;  %s6579_s20 = smov 104   ;;  %vm963_vm6 = vcmask 64512   ;;  %vm1164_vm7 = vcmask 162816  }
 0x10e   : > { %5556 = vmatprep.subr.bf16.mxu1 %v6240_v23  ;;  %v6242_v35 = vld [vmem:[%s8020_s5] sm:$0xff]   ;;  %s6580_s28 = smov 96   ;;  %vm1223_vm8 = vcmask 1041408   ;;  %s6581_s1 = smov 8   ;;  %vm1439_vm9 = vcmask 130048   ;;  %vm1441_vm10 = vcmask 195584  }
 0x10f   : > { %v735_v22 = vsel %vm734_vm4, %v733_v21, 0.0  ;;  %5557 = vmatpush3.bf16.msra.mxu1 %v6240_v23  ;;  %v728_v28 = vld [vmem:[#allocation3 + $0x10] sm:$0xf]  ;;  %5549 = vmatpush3.bf16.msra.mxu0 %v6242_v35  ;;  %v5175_v38 = vld [vmem:[%s8023_s8] ss:$0 sm:$0xff]  ;;  %s6582_s18 = smov 16  }
 0x110   : > { %736 = vadd.xlane.f32.xlu0 %v735_v22  ;;  %v726_v25 = vld [vmem:[#allocation3] sm:$0xff]  ;;  %5558 = vmatprep.subr.bf16.mxu1 %v6241_v24  ;;  %v6798_v29 = vpack.c.bf16 %v728_v28, %v728_v28  ;;  %v5169_v52 = vld [vmem:[%s8026_s11] ss:$0 sm:$0xff]  ;;  %s6583_s0 = smov 24   ;;  %vm2041_vm11 = vcmask 257024   ;;  %vm4960_vm12 = vcmask 523264  }
 0x111   : > { %5550 = vmatprep.subr.bf16.mxu0 %v6575_v36  ;;  %v5170_v54 = vld [vmem:[%s8027_s12] ss:$0 sm:$0xff]  ;;  %p5360_p0 = scmp.ne.s32.totalorder %s6557_s22, 1 }
 0x112   : > { %v727_v26 = vld [vmem:[#allocation3 + $0x8] sm:$0xff]  ;;  %v5171_v8 = vld [vmem:[%s8021_s6] ss:$0 sm:$0xff]  ;;  %s8071_s24 = sld [smem:[#allocation24_spill]] (!%p5360_p0)  ;;  %s5053_s25 = sld [smem:[#allocation5]] (!%p5360_p0)  ;;  %vm5064_vm13 = vcmask (!%p5360_p0), 57344  }
 0x113   : > { %v6794_v27 = vpack.c.bf16 %v727_v26, %v726_v25  ;;  %5559 = vmatpush3.bf16.msra.mxu1 %v6241_v24  ;;  %5551 = vmatpush3.bf16.msra.mxu0 %v6243_v37 }
 0x114   : > { %5572 = vmatprep.subr.bf16.mxu1 %v6575_v36  ;;  %5564 = vmatprep.subr.bf16.mxu0 %v6575_v36 }
 0x115   : > { %5560 = vmatprep.mubr.msk.bf16.mxu1 %vm734_vm4, %v6794_v27 }
 0x116   : > { %5561 = vmatmul.mubr.msk.bf16.vlgmr.msra.gmra.mrb[0].mxu1 %vm734_vm4, %v6798_v29 }
 0x117   : > { %5576 = vmatprep.mubr.msk.bf16.mxu1 %vm6576_vm5, %v6575_v36 }
 0x19d   : > { %v737_v30 = vpop.xlane.xlu0 %736 }
 0x19e   : > { %v739_v31 = vmul.f32 0.03125, %v737_v30 }
 0x1a0   : > { %v740_v32 = vsub.f32 %v733_v21, %v739_v31 }
 0x1a2   : > { %v741_v33 = vmul.f32 %v740_v32, %v740_v32 }
 0x1a4   : > { %v742_v34 = vsel %vm734_vm4, %v741_v33, 0.0 }
 0x1a5   : > { %743 = vadd.xlane.f32.xlu0 %v742_v34 }
 0x1e9   : > { %v5562_v39 = vpop.f32.mrb[0].mxu1 }
 0x1ea   : > { %v897_v40 = vpop.f32.mrb[1].mxu1  ;;  %v906_v47 = vadd.f32 %v5562_v39, %v5175_v38 }
 0x1eb   : > { %v898_v41 = vadd.f32 %v5175_v38, %v897_v40  ;;  %v5563_v42 = vpop.f32.mrb[2].mxu1 }
 0x1ec   : > { %v900_v43 = vpop.f32.mrb[3].mxu1  ;;  %v6842_v59 = vpack.c.bf16 %v906_v47, %v906_v47 }
 0x1ed   : > { %v901_v44 = vadd.f32 %v5175_v38, %v900_v43 }
 0x1ee   : > { %v971_v60 = vsel %vm963_vm6, %v6842_v59, 0 }
 0x1ef   : > { %v6030_v45 = vpack.i.bf16 %v901_v44, %v898_v41  ;;  %v6820_v46 = vpack.c.bf16 %v901_v44, %v898_v41 }
 0x1f1   : > { %6031 = vrot.lane.b32.xlu1 %v6030_v45, %s6577_s17  ;;  %6036 = vrot.lane.b32.xlu0 %v6030_v45, %s6578_s19  ;;  %v968_v58 = vsel %vm963_vm6, %v6820_v46, 0 }
 0x1f5   : > { %928 = vrot.lane.b32.xlu1 %v906_v47, %s6577_s17 }
 0x1f9   : > { %6041 = vrot.lane.b32.xlu1 %v6030_v45, %s6579_s20 }
 0x232   : > { %v744_v48 = vpop.xlane.xlu0 %743 }
 0x233   : > { %v745_v49 = vmul.f32 0.03125, %v744_v48 }
 0x235   : > { %v746_v50 = vadd.f32 1e-05, %v745_v49 }
 0x237   : > { %6270 = vrsqrt.f32 %v746_v50 }
 0x241   : > { %v6271_v51 = vpop.eup %6270 }
 0x242   : > { %v748_v53 = vmul.f32 %v6271_v51, %v740_v32 }
 0x244   : > { %v756_v55 = vmul.f32 %v5169_v52, %v748_v53 }
 0x246   : > { %v6832_v56 = vadd.f32 %v5170_v54, %v756_v55 }
 0x248   : > { %v765_v57 = vpack.c.bf16 %v6832_v56, %v6832_v56 }
 0x24a   : > { %5553 = vmatmul.mubr.msk.bf16.vlgmr.msra.gmra.mrb[0].mxu0 %vm734_vm4, %v765_v57 }
 0x24b   : > { %5565 = vmatpush3.bf16.xpose.msra.mxu0 %v968_v58  ;;  %5568 = vmatprep.mubr.msk.bf16.mxu0 %vm6576_vm5, %v6575_v36 }
 0x24c   : > { %5566 = vmatprep.subr.bf16.mxu0 %v6575_v36 }
 0x253   : > { %5567 = vmatpush3.bf16.xpose.msra.mxu0 %v971_v60 }
 0x254   : > { %5580 = vmatprep.subr.bf16.mxu0 %v6575_v36 }
 0x263   : > { %v6032_v61 = vpop.permute.xlu1 %6031  ;;  %v6037_v5 = vpop.permute.xlu0 %6036 }
 0x264   : > { %v6034_v62 = vunpack.i.h.bf16 %v6032_v61  ;;  %v6033_v63 = vunpack.i.l.bf16 %v6032_v61  ;;  %v6039_v6 = vunpack.i.h.bf16 %v6037_v5  ;;  %v6038_v7 = vunpack.i.l.bf16 %v6037_v5 }
 0x266   : > { %v6847_v0 = vpack.c.bf16 %v6034_v62, %v6033_v63  ;;  %v6860_v9 = vpack.c.bf16 %v6039_v6, %v6038_v7 }
 0x267   : > { %v929_v2 = vpop.permute.xlu1 %928 }
 0x268   : > { %v1017_v1 = vsel %vm963_vm6, %v6847_v0, 0  ;;  %v6851_v3 = vpack.c.bf16 %v929_v2, %v929_v2  ;;  %v1066_v16 = vsel %vm963_vm6, %v6860_v9, 0 }
 0x269   : > { %5573 = vmatpush3.bf16.xpose.msra.mxu1 %v1017_v1 }
 0x26a   : > { %5574 = vmatprep.subr.bf16.mxu1 %v6575_v36  ;;  %v1020_v4 = vsel %vm963_vm6, %v6851_v3, 0 }
 0x26b   : > { %v6042_v17 = vpop.permute.xlu1 %6041 }
 0x26c   : > { %v6044_v18 = vunpack.i.h.bf16 %v6042_v17  ;;  %v6043_v19 = vunpack.i.l.bf16 %v6042_v17 }
 0x26e   : > { %v961_v20 = vpack.c.bf16 %v6044_v18, %v6043_v19 }
 0x270   : > { %v1115_v23 = vsel %vm963_vm6, %v961_v20, 0 }
 0x271   : > { %5575 = vmatpush3.bf16.xpose.msra.mxu1 %v1020_v4 }
 0x272   : > { %5588 = vmatprep.subr.bf16.mxu1 %v6575_v36 }
 0x31d   : > { %v826_v10 = vpop.f32.mrb[0].mxu0 }
 0x31e   : > { %v827_v11 = vadd.f32 %v5171_v8, %v826_v10  ;;  %v5554_v12 = vpop.f32.mrb[1].mxu0 }
 0x31f   : > { %v829_v13 = vpop.f32.mrb[2].mxu0 }
 0x320   : > { %v951_v14 = vpack.c.bf16 %v827_v11, %v827_v11  ;;  %912 = vrot.lane.b32.xlu1 %v827_v11, %s6577_s17  ;;  %v5555_v15 = vpop.f32.mrb[3].mxu0 }
 0x322   : > { %5569 = vmatmul.mubr.msk.bf16.vlgmr.msra.gmra.mrb[4].mxu0 %vm963_vm6, %v951_v14 }
 0x323   : > { %5581 = vmatpush3.bf16.xpose.msra.mxu0 %v1066_v16  ;;  %5584 = vmatprep.mubr.msk.bf16.mxu0 %vm6576_vm5, %v6575_v36 }
 0x324   : > { %937 = vrot.lane.b32.xlu1 %v906_v47, %s6578_s19  ;;  %5582 = vmatprep.subr.bf16.mxu0 %v6575_v36 }
 0x328   : > { %946 = vrot.lane.b32.xlu1 %v906_v47, %s6579_s20 }
 0x32c   : > { %915 = vrot.lane.b32.xlu1 %v827_v11, %s6578_s19 }
 0x330   : > { %918 = vrot.lane.b32.xlu1 %v827_v11, %s6579_s20 }
 0x392   : > { %v913_v21 = vpop.permute.xlu1 %912 }
 0x393   : > { %v952_v22 = vpack.c.bf16 %v913_v21, %v913_v21 }
 0x395   : > { %5577 = vmatmul.mubr.msk.bf16.vlgmr.msra.gmra.mrb[4].mxu1 %vm963_vm6, %v952_v22 }
 0x396   : > { %5589 = vmatpush3.bf16.xpose.msra.mxu1 %v1115_v23  ;;  %v938_v24 = vpop.permute.xlu1 %937  ;;  %5592 = vmatprep.mubr.msk.bf16.mxu1 %vm6576_vm5, %v6575_v36 }
 0x397   : > { %v6877_v25 = vpack.c.bf16 %v938_v24, %v938_v24  ;;  %5590 = vmatprep.subr.bf16.mxu1 %v6575_v36 }
 0x399   : > { %v1069_v26 = vsel %vm963_vm6, %v6877_v25, 0 }
 0x39a   : > { %v947_v28 = vpop.permute.xlu1 %946  ;;  %5583 = vmatpush3.bf16.xpose.msra.mxu0 %v1069_v26 }
 0x39b   : > { %v6882_v30 = vpack.c.bf16 %v947_v28, %v947_v28  ;;  %5596 = vmatprep.subr.bf16.mxu0 %v6575_v36 }
 0x39d   : > { %v1118_v31 = vsel %vm963_vm6, %v6882_v30, 0 }
 0x39e   : > { %5591 = vmatpush3.bf16.xpose.msra.mxu1 %v1118_v31  ;;  %v916_v32 = vpop.permute.xlu1 %915 }
 0x39f   : > { %v953_v33 = vpack.c.bf16 %v916_v32, %v916_v32  ;;  %5604 = vmatprep.subr.bf16.mxu1 %v6575_v36 }
 0x3a1   : > { %5585 = vmatmul.mubr.msk.bf16.vlgmr.msra.gmra.mrb[8].mxu0 %vm963_vm6, %v953_v33 }
 0x3a2   : > { %v919_v34 = vpop.permute.xlu1 %918  ;;  %5600 = vmatprep.mubr.msk.bf16.mxu0 %vm6576_vm5, %v6575_v36 }
 0x3a3   : > { %v954_v35 = vpack.c.bf16 %v919_v34, %v919_v34 }
 0x3a5   : > { %5593 = vmatmul.mubr.msk.bf16.vlgmr.msra.gmra.mrb[8].mxu1 %vm963_vm6, %v954_v35 }
 0x3a6   : > { %5608 = vmatprep.mubr.msk.bf16.mxu1 %vm6576_vm5, %v6575_v36 }
 0x3f5   : > { %v1007_v37 = vpop.f32.mrb[4].mxu0 }
 0x3f6   : > { %v1160_v38 = vmul.f32 0.35355338, %v1007_v37  ;;  %v5570_v39 = vpop.f32.mrb[5].mxu0 }
 0x3f7   : > { %v1010_v40 = vpop.f32.mrb[6].mxu0 }
 0x3f8   : > { %v5571_v41 = vpop.f32.mrb[7].mxu0  ;;  %v1165_v42 = vsel %vm1164_vm7, %v1160_v38, -inf }
 0x3f9   : > { %1166 = vmax.xlane.f32.xlu0 %v1165_v42 }
 0x468   : > { %v1056_v43 = vpop.f32.mrb[4].mxu1 }
 0x469   : > { %v1161_v44 = vmul.f32 0.35355338, %v1056_v43  ;;  %v5578_v45 = vpop.f32.mrb[5].mxu1 }
 0x46a   : > { %v1059_v47 = vpop.f32.mrb[6].mxu1 }
 0x46b   : > { %v5579_v48 = vpop.f32.mrb[7].mxu1  ;;  %v1168_v49 = vsel %vm1164_vm7, %v1161_v44, -inf }
 0x46c   : > { %1169 = vmax.xlane.f32.xlu1 %v1168_v49 }
 0x474   : > { %v1105_v50 = vpop.f32.mrb[8].mxu0 }
 0x475   : > { %v1162_v51 = vmul.f32 0.35355338, %v1105_v50  ;;  %v5586_v52 = vpop.f32.mrb[9].mxu0 }
 0x476   : > { %v1108_v53 = vpop.f32.mrb[10].mxu0 }
 0x477   : > { %v5587_v54 = vpop.f32.mrb[11].mxu0  ;;  %v1171_v55 = vsel %vm1164_vm7, %v1162_v51, -inf }
 0x478   : > { %v1154_v57 = vpop.f32.mrb[8].mxu1  ;;  %1172 = vmax.xlane.f32.xlu0 %v1171_v55  ;;  %v6244_v54 = vld [vmem:[%s8024_s9] sm:$0xff]  }
 0x479   : > { %v1163_v58 = vmul.f32 0.35355338, %v1154_v57  ;;  %v5594_v60 = vpop.f32.mrb[9].mxu1  ;;  %v6245_v57 = vld [vmem:[%s8024_s9 + $0x8] sm:$0xff]  }
 0x47a   : > { %v1157_v61 = vpop.f32.mrb[10].mxu1 }
 0x47b   : > { %v5595_v62 = vpop.f32.mrb[11].mxu1  ;;  %v1174_v63 = vsel %vm1164_vm7, %v1163_v58, -inf }
 0x47c   : > { %1175 = vmax.xlane.f32.xlu0 %v1174_v63  ;;  %v6246_v62 = vld [vmem:[%s8022_s7 + $0x10] sm:$0xff]  }
 0x47d   : > { %1215 = vrot.lane.b32.xlu1 %v6820_v46, %s6580_s28  ;;  %v6247_v63 = vld [vmem:[%s8020_s5 + $0x10] sm:$0xff]  }
 0x481   : > { %1217 = vrot.lane.b32.xlu1 %v6842_v59, %s6580_s28 }
 0x485   : > { %1271 = vrot.lane.b32.xlu1 %v6851_v3, %s6580_s28 }
 0x486   : > { %v1167_v1 = vpop.xlane.xlu0 %1166 }
 0x487   : > { %v1177_v2 = vsub.f32 %v1160_v38, %v1167_v1 }
 0x489   : > { %1375 = vrot.lane.b32.xlu1 %v961_v20, %s6580_s28  ;;  %v1181_v4 = vmul.f32 1.442695, %v1177_v2  ;;  %v6249_v2 = vld [vmem:[%s8020_s5 + $0x18] sm:$0xff]  }
 0x48b   : > { %6272 = vpow2.f32 %v1181_v4 }
 0x492   : > { %1269 = vrot.lane.b32.xlu0 %v6847_v0, %s6580_s28 }
 0x495   : > { %v6273_v5 = vpop.eup %6272 }
 0x496   : > { %1322 = vrot.lane.b32.xlu0 %v6860_v9, %s6580_s28  ;;  %v1189_v46 = vsel %vm1164_vm7, %v6273_v5, 0.0 }
 0x4ad   : > { %1190 = vadd.xlane.f32.xlu1 %v1189_v46 }
 0x4f9   : > { %v1170_v59 = vpop.xlane.xlu1 %1169 }
 0x4fa   : > { %v1178_v6 = vsub.f32 %v1161_v44, %v1170_v59 }
 0x4fc   : > { %v1183_v7 = vmul.f32 1.442695, %v1178_v6 }
 0x4fd   : > { %v1216_v3 = vpop.permute.xlu1 %1215 }
 0x4fe   : > { %6274 = vpow2.f32 %v1183_v7  ;;  %5597 = vmatpush3.bf16.msra.mxu0 %v1216_v3 }
 0x4ff   : > { %5598 = vmatprep.subr.bf16.mxu0 %v6575_v36 }
 0x501   : > { %v1218_v0 = vpop.permute.xlu1 %1217 }
 0x502   : > { %v1225_v8 = vsel %vm1223_vm8, %v1218_v0, 0 }
 0x503   : > { %5599 = vmatpush3.bf16.msra.mxu0 %v1225_v8 }
 0x504   : > { %5612 = vmatprep.subr.bf16.mxu0 %v6575_v36 }
 0x505   : > { %v1173_v9 = vpop.xlane.xlu0 %1172  ;;  %v1272_v18 = vpop.permute.xlu1 %1271 }
 0x506   : > { %v1179_v10 = vsub.f32 %v1162_v51, %v1173_v9  ;;  %v1278_v19 = vsel %vm1223_vm8, %v1272_v18, 0  ;;  %v729_v9 = vld [vmem:[#allocation4] sm:$0xff]  ;;  %v731_v18 = vld [vmem:[#allocation4 + $0x10] sm:$0xff] }
 0x508   : > { %v6275_v11 = vpop.eup %6274  ;;  %v1185_v12 = vmul.f32 1.442695, %v1179_v10  ;;  %v730_v10 = vld [vmem:[#allocation4 + $0x8] sm:$0xff] }
 0x509   : > { %v1176_v13 = vpop.xlane.xlu0 %1175  ;;  %v1192_v14 = vsel %vm1164_vm7, %v6275_v11, 0.0  ;;  %v1376_v24 = vpop.permute.xlu1 %1375 }
 0x50a   : > { %6276 = vpow2.f32 %v1185_v12  ;;  %v1180_v15 = vsub.f32 %v1163_v58, %v1176_v13  ;;  %1193 = vadd.xlane.f32.xlu0 %v1192_v14 }
 0x50c   : > { %v1187_v16 = vmul.f32 1.442695, %v1180_v15  ;;  %v6964_v15 = vpack.c.bf16 %v730_v10, %v729_v9 }
 0x50d   : > { %v1270_v17 = vpop.permute.xlu0 %1269 }
 0x50e   : > { %6278 = vpow2.f32 %v1187_v16  ;;  %5605 = vmatpush3.bf16.msra.mxu1 %v1270_v17  ;;  %v6248_v17 = vld [vmem:[%s8022_s7 + $0x18] sm:$0xff]  }
 0x50f   : > { %5606 = vmatprep.subr.bf16.mxu1 %v6575_v36 }
 0x511   : > { %v1323_v33 = vpop.permute.xlu0 %1322 }
 0x512   : > { %5607 = vmatpush3.bf16.msra.mxu1 %v1278_v19  ;;  %v732_v19 = vld [vmem:[#allocation4 + $0x18] sm:$0xff] }
 0x513   : > { %5620 = vmatprep.subr.bf16.mxu1 %v6575_v36 }
 0x514   : > { %v6277_v20 = vpop.eup %6276 }
 0x515   : > { %v1195_v21 = vsel %vm1164_vm7, %v6277_v20, 0.0 }
 0x516   : > { %1196 = vadd.xlane.f32.xlu1 %v1195_v21 }
 0x518   : > { %v6279_v22 = vpop.eup %6278 }
 0x519   : > { %v1198_v23 = vsel %vm1164_vm7, %v6279_v22, 0.0 }
 0x51a   : > { %1199 = vadd.xlane.f32.xlu0 %v1198_v23 }
 0x527   : > { %1377 = vrot.lane.b32.xlu1 %v6882_v30, %s6580_s28 }
 0x530   : > { %1324 = vrot.lane.b32.xlu0 %v6877_v25, %s6580_s28 }
 0x53a   : > { %v1191_v26 = vpop.xlane.xlu1 %1190 }
 0x53b   : > { %6280 = vrcp.f32 %v1191_v26 }
 0x545   : > { %v6281_v28 = vpop.eup %6280 }
 0x546   : > { %v1205_v31 = vmul.f32 %v6281_v28, %v6273_v5 }
 0x548   : > { %v1209_v32 = vpack.c.bf16 %v1205_v31, %v1205_v31 }
 0x54a   : > { %5601 = vmatmul.mubr.msk.bf16.vlgmr.msra.gmra.mrb[12].mxu0 %vm1164_vm7, %v1209_v32 }
 0x54b   : > { %5613 = vmatpush3.bf16.msra.mxu0 %v1323_v33  ;;  %5616 = vmatprep.mubr.msk.bf16.mxu0 %vm6576_vm5, %v6575_v36 }
 0x54c   : > { %5614 = vmatprep.subr.bf16.mxu0 %v6575_v36 }
 0x597   : > { %v1194_v34 = vpop.xlane.xlu0 %1193 }
 0x598   : > { %6282 = vrcp.f32 %v1194_v34 }
 0x5a2   : > { %v6283_v30 = vpop.eup %6282 }
 0x5a3   : > { %v1197_v35 = vpop.xlane.xlu1 %1196  ;;  %v1206_v25 = vmul.f32 %v6283_v30, %v6275_v11 }
 0x5a4   : > { %6284 = vrcp.f32 %v1197_v35 }
 0x5a5   : > { %v1210_v37 = vpack.c.bf16 %v1206_v25, %v1206_v25 }
 0x5a7   : > { %5609 = vmatmul.mubr.msk.bf16.vlgmr.msra.gmra.mrb[12].mxu1 %vm1164_vm7, %v1210_v37  ;;  %v1200_v38 = vpop.xlane.xlu0 %1199  ;;  %v1378_v39 = vpop.permute.xlu1 %1377 }
 0x5a8   : > { %5621 = vmatpush3.bf16.msra.mxu1 %v1376_v24  ;;  %6286 = vrcp.f32 %v1200_v38  ;;  %5624 = vmatprep.mubr.msk.bf16.mxu1 %vm6576_vm5, %v6575_v36  ;;  %v1384_v40 = vsel %vm1223_vm8, %v1378_v39, 0  ;;  %v5211_v39 = vld [vmem:[%s8023_s8 + $0x1] ss:$0 sm:$0xff] }
 0x5a9   : > { %5622 = vmatprep.subr.bf16.mxu1 %v6575_v36 }
 0x5ab   : > { %v1325_v41 = vpop.permute.xlu0 %1324 }
 0x5ac   : > { %5623 = vmatpush3.bf16.msra.mxu1 %v1384_v40  ;;  %v1331_v42 = vsel %vm1223_vm8, %v1325_v41, 0 }
 0x5ad   : > { %5615 = vmatpush3.bf16.msra.mxu0 %v1331_v42  ;;  %5636 = vmatprep.subr.bf16.mxu1 %v6247_v63 }
 0x5ae   : > { %v6285_v43 = vpop.eup %6284  ;;  %5628 = vmatprep.subr.bf16.mxu0 %v6575_v36 }
 0x5af   : > { %v1207_v44 = vmul.f32 %v6285_v43, %v6277_v20  ;;  %v6972_v20 = vpack.c.bf16 %v732_v19, %v731_v18 }
 0x5b1   : > { %v1211_v45 = vpack.c.bf16 %v1207_v44, %v1207_v44 }
 0x5b2   : > { %v6287_v47 = vpop.eup %6286 }
 0x5b3   : > { %5617 = vmatmul.mubr.msk.bf16.vlgmr.msra.gmra.mrb[16].mxu0 %vm1164_vm7, %v1211_v45  ;;  %v1208_v48 = vmul.f32 %v6287_v47, %v6279_v22  ;;  %v5201_v22 = vld [vmem:[%s8021_s6 + $0x1] ss:$0 sm:$0xff] }
 0x5b4   : > { %5632 = vmatprep.mubr.msk.bf16.mxu0 %vm6576_vm5, %v6575_v36  ;;  %5629 = vmatpush3.bf16.msra.mxu0 %v6244_v54 }
 0x5b5   : > { %v1212_v49 = vpack.c.bf16 %v1208_v48, %v1208_v48  ;;  %5630 = vmatprep.subr.bf16.mxu0 %v6575_v36 }
 0x5b7   : > { %5625 = vmatmul.mubr.msk.bf16.vlgmr.msra.gmra.mrb[16].mxu1 %vm1164_vm7, %v1212_v49 }
 0x5b8   : > { %5640 = vmatprep.mubr.msk.bf16.mxu1 %vm734_vm4, %v6794_v27  ;;  %5631 = vmatpush3.bf16.msra.mxu0 %v6245_v57 }
 0x5b9   : > { %5644 = vmatprep.subr.bf16.mxu0 %v6246_v62  ;;  %5637 = vmatpush3.bf16.msra.mxu1 %v6247_v63 }
 0x5ba   : > { %5638 = vmatprep.subr.bf16.mxu1 %v6249_v2 }
 0x5bd   : > { %5639 = vmatpush3.bf16.msra.mxu1 %v6249_v2 }
 0x5c0   : > { %5641 = vmatmul.mubr.msk.bf16.vlgmr.msra.gmra.mrb[20].mxu1 %vm734_vm4, %v6798_v29 }
 0x61d   : > { %v1261_v50 = vpop.f32.mrb[12].mxu0 }
 0x61e   : > { %v5602_v51 = vpop.f32.mrb[13].mxu0 }
 0x61f   : > { %v1264_v52 = vpop.f32.mrb[14].mxu0 }
 0x620   : > { %v5603_v53 = vpop.f32.mrb[15].mxu0 }
 0x67a   : > { %v1314_v55 = vpop.f32.mrb[12].mxu1 }
 0x67b   : > { %1427 = vrot.lane.b32.xlu0 %v1314_v55, %s6581_s1  ;;  %v5610_v58 = vpop.f32.mrb[13].mxu1 }
 0x67c   : > { %v1317_v60 = vpop.f32.mrb[14].mxu1 }
 0x67d   : > { %v5611_v61 = vpop.f32.mrb[15].mxu1 }
 0x686   : > { %v1367_v1 = vpop.f32.mrb[16].mxu0 }
 0x687   : > { %1431 = vrot.lane.b32.xlu1 %v1367_v1, %s6582_s18  ;;  %v5618_v4 = vpop.f32.mrb[17].mxu0 }
 0x688   : > { %v1370_v5 = vpop.f32.mrb[18].mxu0 }
 0x689   : > { %v5619_v46 = vpop.f32.mrb[19].mxu0 }
 0x68a   : > { %v1420_v59 = vpop.f32.mrb[16].mxu1 }
 0x68b   : > { %1435 = vrot.lane.b32.xlu0 %v1420_v59, %s6583_s0  ;;  %v5626_v6 = vpop.f32.mrb[17].mxu1 }
 0x68c   : > { %v1423_v7 = vpop.f32.mrb[18].mxu1 }
 0x68d   : > { %v5627_v3 = vpop.f32.mrb[19].mxu1 }
 0x693   : > { %v5642_v21 = vpop.f32.mrb[20].mxu1 }
 0x694   : > { %v1610_v23 = vadd.f32 %v5642_v21, %v5201_v22  ;;  %v1601_v24 = vpop.f32.mrb[21].mxu1 }
 0x695   : > { %v5643_v26 = vpop.f32.mrb[22].mxu1  ;;  %v1602_v28 = vadd.f32 %v5201_v22, %v1601_v24 }
 0x696   : > { %v1604_v31 = vpop.f32.mrb[23].mxu1  ;;  %v1768_v54 = vpack.c.bf16 %v1610_v23, %v1610_v23 }
 0x697   : > { %v1605_v32 = vadd.f32 %v5201_v22, %v1604_v31 }
 0x699   : > { %v6055_v33 = vpack.i.bf16 %v1605_v32, %v1602_v28  ;;  %v1767_v34 = vpack.c.bf16 %v1605_v32, %v1602_v28 }
 0x69b   : > { %5656 = vmatprep.mubr.msk.bf16.mxu1 %vm963_vm6, %v1767_v34 }
 0x6ed   : > { %v1428_v0 = vpop.permute.xlu0 %1427 }
 0x6ee   : > { %v1438_v11 = vsel %vm963_vm6, %v1261_v50, %v1428_v0 }
 0x6f9   : > { %v1432_v8 = vpop.permute.xlu1 %1431 }
 0x6fa   : > { %v1440_v12 = vsel %vm1439_vm9, %v1438_v11, %v1432_v8 }
 0x6fd   : > { %v1436_v13 = vpop.permute.xlu0 %1435 }
 0x6fe   : > { %v1442_v14 = vsel %vm1441_vm10, %v1440_v12, %v1436_v13 }
 0x6ff   : > { %v1443_v16 = vpack.c.bf16 %v1442_v14, %v1442_v14 }
 0x701   : > { %5633 = vmatmul.mubr.msk.bf16.vlgmr.msra.gmra.mrb[20].mxu0 %vm734_vm4, %v1443_v16 }
 0x702   : > { %5645 = vmatpush3.bf16.msra.mxu0 %v6246_v62  ;;  %5648 = vmatprep.mubr.msk.bf16.mxu0 %vm734_vm4, %v6964_v15 }
 0x703   : > { %5646 = vmatprep.subr.bf16.mxu0 %v6248_v17 }
 0x706   : > { %5647 = vmatpush3.bf16.msra.mxu0 %v6248_v17 }
 0x709   : > { %5649 = vmatmul.mubr.msk.bf16.vlgmr.msra.gmra.mrb[24].mxu0 %vm734_vm4, %v6972_v20 }
 0x7d4   : > { %v6980_v30 = vpop.f32.mrb[20].mxu0 }
 0x7d5   : > { %v5634_v35 = vpop.f32.mrb[21].mxu0 }
 0x7d6   : > { %v1507_v25 = vpop.f32.mrb[22].mxu0 }
 0x7d7   : > { %v5635_v37 = vpop.f32.mrb[23].mxu0 }
 0x7dc   : > { %v5650_v38 = vpop.f32.mrb[24].mxu0 }
 0x7dd   : > { %v1682_v40 = vpop.f32.mrb[25].mxu0  ;;  %v1691_v42 = vadd.f32 %v5650_v38, %v5211_v39 }
 0x7de   : > { %v5651_v41 = vpop.f32.mrb[26].mxu0  ;;  %v1683_v45 = vadd.f32 %v5211_v39, %v1682_v40 }
 0x7df   : > { %v1694_v43 = vadd.f32 %v5651_v41, %v5211_v39  ;;  %v1685_v44 = vpop.f32.mrb[27].mxu0 }
 0x7e0   : > { %v1686_v47 = vadd.f32 %v5211_v39, %v1685_v44 }
 0x7e1   : > { %v6050_v48 = vpack.i.bf16 %v1694_v43, %v1691_v42  ;;  %v6985_v49 = vpack.c.bf16 %v1694_v43, %v1691_v42 }
 0x7e2   : > { %v6045_v50 = vpack.i.bf16 %v1686_v47, %v1683_v45  ;;  %v6987_v51 = vpack.c.bf16 %v1686_v47, %v1683_v45 }
 0x7e3   : > { %6051 = vrot.lane.b32.xlu0 %v6050_v48, %s6577_s17  ;;  %v1793_v53 = vsel %vm963_vm6, %v6985_v49, 0 }
 0x7e4   : > { %6046 = vrot.lane.b32.xlu1 %v6045_v50, %s6577_s17  ;;  %5921 = vmatprep.subr.msk.bf16.mxu1 %vm963_vm6, %v6987_v51  ;;  %v1790_v52 = vsel %vm963_vm6, %v6987_v51, 0 }
 0x7e5   : > { %5653 = vmatpush3.bf16.xpose.msra.mxu1 %v1790_v52 }
 0x7e6   : > { %5922 = vmatprep.subr.msk.bf16.mxu1 %vm963_vm6, %v6985_v49 }
 0x7e7   : > { %6056 = vrot.lane.b32.xlu0 %v6055_v33, %s6577_s17 }
 0x7e8   : > { %6061 = vrot.lane.b32.xlu1 %v6045_v50, %s6578_s19 }
 0x7eb   : > { %1704 = vrot.lane.b32.xlu0 %v1610_v23, %s6577_s17 }
 0x7ec   : > { %6066 = vrot.lane.b32.xlu1 %v6045_v50, %s6579_s20 }
 0x7ed   : > { %5655 = vmatpush3.bf16.xpose.msra.mxu1 %v1793_v53 }
 0x7ef   : > { %6076 = vrot.lane.b32.xlu0 %v6050_v48, %s6579_s20 }
 0x7f0   : > { %6071 = vrot.lane.b32.xlu1 %v6050_v48, %s6578_s19 }
 0x7f3   : > { %1713 = vrot.lane.b32.xlu0 %v1610_v23, %s6578_s19 }
 0x7f4   : > { %6081 = vrot.lane.b32.xlu1 %v6055_v33, %s6578_s19  ;;  %5657 = vmatmul.mubr.msk.bf16.vlgmr.msra.gmra.mrb[24].mxu1 %vm963_vm6, %v1768_v54 }
 0x7f7   : > { %1722 = vrot.lane.b32.xlu0 %v1610_v23, %s6579_s20 }
 0x7f8   : > { %6086 = vrot.lane.b32.xlu1 %v6055_v33, %s6579_s20 }
 0x855   : > { %v6052_v55 = vpop.permute.xlu0 %6051 }
 0x856   : > { %v6047_v57 = vpop.permute.xlu1 %6046  ;;  %v6054_v58 = vunpack.i.h.bf16 %v6052_v55  ;;  %v6053_v60 = vunpack.i.l.bf16 %v6052_v55 }
 0x857   : > { %v6049_v61 = vunpack.i.h.bf16 %v6047_v57  ;;  %v6048_v62 = vunpack.i.l.bf16 %v6047_v57 }
 0x858   : > { %v7012_v46 = vpack.c.bf16 %v6054_v58, %v6053_v60 }
 0x859   : > { %v7010_v63 = vpack.c.bf16 %v6049_v61, %v6048_v62  ;;  %v6057_v1 = vpop.permute.xlu0 %6056 }
 0x85a   : > { %v6059_v2 = vunpack.i.h.bf16 %v6057_v1  ;;  %v6058_v4 = vunpack.i.l.bf16 %v6057_v1  ;;  %v6062_v5 = vpop.permute.xlu1 %6061  ;;  %v1853_v19 = vsel %vm963_vm6, %v7012_v46, 0 }
 0x85b   : > { %v6064_v59 = vunpack.i.h.bf16 %v6062_v5  ;;  %v6063_v6 = vunpack.i.l.bf16 %v6062_v5  ;;  %5923 = vmatprep.subr.msk.bf16.mxu0 %vm963_vm6, %v7010_v63  ;;  %v1850_v7 = vsel %vm963_vm6, %v7010_v63, 0 }
 0x85c   : > { %v1769_v3 = vpack.c.bf16 %v6059_v2, %v6058_v4  ;;  %5661 = vmatpush3.bf16.xpose.msra.mxu0 %v1850_v7 }
 0x85d   : > { %v7018_v0 = vpack.c.bf16 %v6064_v59, %v6063_v6  ;;  %v1705_v8 = vpop.permute.xlu0 %1704  ;;  %5924 = vmatprep.subr.msk.bf16.mxu0 %vm963_vm6, %v7012_v46 }
 0x85e   : > { %v6067_v9 = vpop.permute.xlu1 %6066  ;;  %5664 = vmatprep.mubr.msk.bf16.mxu0 %vm963_vm6, %v1769_v3  ;;  %v1770_v32 = vpack.c.bf16 %v1705_v8, %v1705_v8 }
 0x85f   : > { %v6069_v10 = vunpack.i.h.bf16 %v6067_v9  ;;  %v6068_v11 = vunpack.i.l.bf16 %v6067_v9  ;;  %5925 = vmatprep.subr.msk.bf16.mxu1 %vm963_vm6, %v7018_v0  ;;  %v1910_v12 = vsel %vm963_vm6, %v7018_v0, 0 }
 0x860   : > { %5669 = vmatpush3.bf16.xpose.msra.mxu1 %v1910_v12 }
 0x861   : > { %v7027_v14 = vpack.c.bf16 %v6069_v10, %v6068_v11  ;;  %v6077_v16 = vpop.permute.xlu0 %6076 }
 0x862   : > { %v6072_v13 = vpop.permute.xlu1 %6071  ;;  %v6079_v22 = vunpack.i.h.bf16 %v6077_v16  ;;  %v6078_v24 = vunpack.i.l.bf16 %v6077_v16 }
 0x863   : > { %v6074_v17 = vunpack.i.h.bf16 %v6072_v13  ;;  %v6073_v18 = vunpack.i.l.bf16 %v6072_v13  ;;  %v1970_v39 = vsel %vm963_vm6, %v7027_v14, 0 }
 0x864   : > { %5663 = vmatpush3.bf16.xpose.msra.mxu0 %v1853_v19  ;;  %v7039_v25 = vpack.c.bf16 %v6079_v22, %v6078_v24 }
 0x865   : > { %v7031_v21 = vpack.c.bf16 %v6074_v17, %v6073_v18  ;;  %5927 = vmatprep.subr.msk.bf16.mxu0 %vm963_vm6, %v7027_v14  ;;  %v1714_v34 = vpop.permute.xlu0 %1713 }
 0x866   : > { %v6082_v23 = vpop.permute.xlu1 %6081  ;;  %v1772_v40 = vpack.c.bf16 %v1714_v34, %v1714_v34  ;;  %v1973_v42 = vsel %vm963_vm6, %v7039_v25, 0 }
 0x867   : > { %v6084_v26 = vunpack.i.h.bf16 %v6082_v23  ;;  %v6083_v28 = vunpack.i.l.bf16 %v6082_v23  ;;  %5926 = vmatprep.subr.msk.bf16.mxu1 %vm963_vm6, %v7031_v21  ;;  %v1913_v31 = vsel %vm963_vm6, %v7031_v21, 0 }
 0x868   : > { %5671 = vmatpush3.bf16.xpose.msra.mxu1 %v1913_v31 }
 0x869   : > { %v1771_v33 = vpack.c.bf16 %v6084_v26, %v6083_v28  ;;  %v1723_v43 = vpop.permute.xlu0 %1722 }
 0x86a   : > { %v6087_v35 = vpop.permute.xlu1 %6086  ;;  %v1774_v44 = vpack.c.bf16 %v1723_v43, %v1723_v43 }
 0x86b   : > { %v6089_v37 = vunpack.i.h.bf16 %v6087_v35  ;;  %v6088_v38 = vunpack.i.l.bf16 %v6087_v35  ;;  %5665 = vmatmul.mubr.msk.bf16.vlgmr.msra.gmra.mrb[28].mxu0 %vm963_vm6, %v1770_v32  ;;  %5672 = vmatprep.mubr.msk.bf16.mxu1 %vm963_vm6, %v1771_v33 }
 0x86c   : > { %5677 = vmatpush3.bf16.xpose.msra.mxu0 %v1970_v39 }
 0x86d   : > { %v1773_v41 = vpack.c.bf16 %v6089_v37, %v6088_v38  ;;  %5928 = vmatprep.subr.msk.bf16.mxu0 %vm963_vm6, %v7039_v25 }
 0x86f   : > { %5673 = vmatmul.mubr.msk.bf16.vlgmr.msra.gmra.mrb[28].mxu1 %vm963_vm6, %v1772_v40  ;;  %5680 = vmatprep.mubr.msk.bf16.mxu0 %vm963_vm6, %v1773_v41 }
 0x874   : > { %5679 = vmatpush3.bf16.xpose.msra.mxu0 %v1973_v42 }
 0x87b   : > { %5681 = vmatmul.mubr.msk.bf16.vlgmr.msra.gmra.mrb[32].mxu0 %vm963_vm6, %v1774_v44 }
 0x8c7   : > { %v5658_v45 = vpop.f32.mrb[24].mxu1 }
 0x8c8   : > { %v2025_v47 = vmul.f32 0.35355338, %v5658_v45  ;;  %v1829_v48 = vpop.f32.mrb[25].mxu1 }
 0x8c9   : > { %v7052_v50 = vmul.f32 0.35355338, %v1829_v48  ;;  %v5659_v52 = vpop.f32.mrb[26].mxu1 }
 0x8ca   : > { %v1832_v53 = vpop.f32.mrb[27].mxu1  ;;  %v2042_v54 = vsel %vm2041_vm11, %v2025_v47, -inf }
 0x8cb   : > { %v2024_v55 = vmul.f32 0.35355338, %v1832_v53  ;;  %2043 = vmax.xlane.f32.xlu0 %v2042_v54  ;;  %v2035_v57 = vsel %vm734_vm4, %v7052_v50, -inf }
 0x8cc   : > { %2036 = vmax.xlane.f32.xlu1 %v2035_v57 }
 0x8cd   : > { %v2038_v58 = vsel %vm734_vm4, %v2024_v55, -inf }
 0x8cf   : > { %2039 = vmax.xlane.f32.xlu0 %v2038_v58 }
 0x93e   : > { %v5666_v60 = vpop.f32.mrb[28].mxu0 }
 0x93f   : > { %v7058_v61 = vmul.f32 0.35355338, %v5666_v60  ;;  %v1889_v62 = vpop.f32.mrb[29].mxu0 }
 0x940   : > { %v5667_v1 = vpop.f32.mrb[30].mxu0  ;;  %v7060_v2 = vmul.f32 0.35355338, %v1889_v62 }
 0x941   : > { %v1892_v4 = vpop.f32.mrb[31].mxu0  ;;  %v2051_v5 = vsel %vm2041_vm11, %v7058_v61, -inf }
 0x942   : > { %2052 = vmax.xlane.f32.xlu1 %v2051_v5  ;;  %v5674_v59 = vpop.f32.mrb[28].mxu1  ;;  %v2045_v9 = vsel %vm734_vm4, %v7060_v2, -inf  ;;  %v7068_v10 = vmul.f32 0.35355338, %v1892_v4 }
 0x943   : > { %v1949_v6 = vpop.f32.mrb[29].mxu1  ;;  %v7076_v16 = vmul.f32 0.35355338, %v5674_v59 }
 0x944   : > { %v7064_v7 = vmul.f32 0.35355338, %v1949_v6  ;;  %v5675_v3 = vpop.f32.mrb[30].mxu1  ;;  %v2048_v17 = vsel %vm734_vm4, %v7068_v10, -inf }
 0x945   : > { %v1952_v8 = vpop.f32.mrb[31].mxu1  ;;  %v2060_v19 = vsel %vm2041_vm11, %v7076_v16, -inf }
 0x946   : > { %v7070_v11 = vmul.f32 0.35355338, %v1952_v8  ;;  %2046 = vmax.xlane.f32.xlu1 %v2045_v9  ;;  %v2054_v12 = vsel %vm734_vm4, %v7064_v7, -inf }
 0x947   : > { %2055 = vmax.xlane.f32.xlu0 %v2054_v12 }
 0x948   : > { %v2057_v13 = vsel %vm734_vm4, %v7070_v11, -inf }
 0x94a   : > { %2058 = vmax.xlane.f32.xlu1 %v2057_v13 }
 0x94b   : > { %2049 = vmax.xlane.f32.xlu0 %v2048_v17 }
 0x94e   : > { %v5682_v18 = vpop.f32.mrb[32].mxu0 }
 0x94f   : > { %v2009_v22 = vpop.f32.mrb[33].mxu0  ;;  %2061 = vmax.xlane.f32.xlu0 %v2060_v19  ;;  %v7084_v28 = vmul.f32 0.35355338, %v5682_v18 }
 0x950   : > { %v7082_v23 = vmul.f32 0.35355338, %v2009_v22  ;;  %v5683_v24 = vpop.f32.mrb[34].mxu0 }
 0x951   : > { %v2012_v26 = vpop.f32.mrb[35].mxu0  ;;  %v2069_v34 = vsel %vm2041_vm11, %v7084_v28, -inf }
 0x952   : > { %v7086_v31 = vmul.f32 0.35355338, %v2012_v26  ;;  %v2063_v32 = vsel %vm734_vm4, %v7082_v23, -inf }
 0x953   : > { %2064 = vmax.xlane.f32.xlu1 %v2063_v32 }
 0x954   : > { %v2066_v33 = vsel %vm734_vm4, %v7086_v31, -inf }
 0x955   : > { %2067 = vmax.xlane.f32.xlu0 %v2066_v33 }
 0x957   : > { %2070 = vmax.xlane.f32.xlu1 %v2069_v34 }
 0x958   : > { %v2044_v35 = vpop.xlane.xlu0 %2043 }
 0x959   : > { %v2074_v38 = vsub.f32 %v2025_v47, %v2044_v35  ;;  %v2037_v39 = vpop.xlane.xlu1 %2036 }
 0x95b   : > { %v2088_v40 = vmul.f32 1.442695, %v2074_v38 }
 0x95c   : > { %v2040_v37 = vpop.xlane.xlu0 %2039 }
 0x95d   : > { %6288 = vpow2.f32 %v2088_v40 }
 0x968   : > { %2240 = vrot.lane.b32.xlu1 %v7010_v63, %s6580_s28  ;;  %v2073_v63 = vsub.f32 %v2024_v55, %v2040_v37 }
 0x96a   : > { %v2086_v41 = vmul.f32 1.442695, %v2073_v63 }
 0x96b   : > { %2178 = vrot.lane.b32.xlu0 %v6987_v51, %s6580_s28  ;;  %v2072_v51 = vsub.f32 %v7052_v50, %v2037_v39 }
 0x96c   : > { %2180 = vrot.lane.b32.xlu1 %v6985_v49, %s6580_s28  ;;  %6290 = vpow2.f32 %v2086_v41 }
 0x96d   : > { %v2084_v49 = vmul.f32 1.442695, %v2072_v51 }
 0x96f   : > { %2242 = vrot.lane.b32.xlu0 %v7012_v46, %s6580_s28  ;;  %6292 = vpow2.f32 %v2084_v49  ;;  %v7107_v46 = vpop.eup %6288 }
 0x970   : > { %2302 = vrot.lane.b32.xlu1 %v7018_v0, %s6580_s28  ;;  %v2114_v0 = vsel %vm2041_vm11, %v7107_v46, 0.0 }
 0x973   : > { %2364 = vrot.lane.b32.xlu0 %v7027_v14, %s6580_s28 }
 0x976   : > { %v7109_v42 = vpop.eup %6290 }
 0x977   : > { %v2111_v43 = vsel %vm734_vm4, %v7109_v42, 0.0 }
 0x979   : > { %v7113_v14 = vpop.eup %6292 }
 0x97a   : > { %v2108_v44 = vsel %vm734_vm4, %v7113_v14, 0.0 }
 0x992   : > { %2115 = vadd.xlane.f32.xlu0 %v2114_v0 }
 0x994   : > { %2112 = vadd.xlane.f32.xlu1 %v2111_v43 }
 0x996   : > { %2109 = vadd.xlane.f32.xlu0 %v2108_v44 }
 0x9cf   : > { %v2053_v45 = vpop.xlane.xlu1 %2052 }
 0x9d0   : > { %v2077_v47 = vsub.f32 %v7058_v61, %v2053_v45 }
 0x9d2   : > { %v2094_v48 = vmul.f32 1.442695, %v2077_v47 }
 0x9d3   : > { %v2047_v50 = vpop.xlane.xlu1 %2046 }
 0x9d4   : > { %6294 = vpow2.f32 %v2094_v48  ;;  %v2075_v52 = vsub.f32 %v7060_v2, %v2047_v50  ;;  %v2056_v53 = vpop.xlane.xlu0 %2055 }
 0x9d5   : > { %v2078_v62 = vsub.f32 %v7064_v7, %v2056_v53 }
 0x9d6   : > { %v2090_v54 = vmul.f32 1.442695, %v2075_v52 }
 0x9d7   : > { %v2059_v55 = vpop.xlane.xlu1 %2058  ;;  %v2096_v5 = vmul.f32 1.442695, %v2078_v62 }
 0x9d8   : > { %6296 = vpow2.f32 %v2090_v54  ;;  %v2079_v57 = vsub.f32 %v7070_v11, %v2059_v55  ;;  %v2050_v58 = vpop.xlane.xlu0 %2049 }
 0x9d9   : > { %v2076_v59 = vsub.f32 %v7068_v10, %v2050_v58 }
 0x9da   : > { %v2098_v60 = vmul.f32 1.442695, %v2079_v57 }
 0x9db   : > { %v2092_v11 = vmul.f32 1.442695, %v2076_v59 }
 0x9dc   : > { %6298 = vpow2.f32 %v2098_v60  ;;  %v2062_v1 = vpop.xlane.xlu0 %2061 }
 0x9dd   : > { %v2080_v4 = vsub.f32 %v7076_v16, %v2062_v1 }
 0x9de   : > { %v7124_v61 = vpop.eup %6294 }
 0x9df   : > { %v2100_v2 = vmul.f32 1.442695, %v2080_v4  ;;  %v2123_v6 = vsel %vm2041_vm11, %v7124_v61, 0.0 }
 0x9e0   : > { %2124 = vadd.xlane.f32.xlu1 %v2123_v6  ;;  %v2065_v3 = vpop.xlane.xlu1 %2064 }
 0x9e1   : > { %6300 = vpow2.f32 %v2100_v2  ;;  %v2081_v7 = vsub.f32 %v7082_v23, %v2065_v3 }
 0x9e2   : > { %v7129_v8 = vpop.eup %6296  ;;  %v2068_v9 = vpop.xlane.xlu0 %2067  ;;  %6302 = vpow2.f32 %v2096_v5 }
 0x9e3   : > { %v2082_v12 = vsub.f32 %v7086_v31, %v2068_v9  ;;  %v2117_v13 = vsel %vm734_vm4, %v7129_v8, 0.0  ;;  %v2102_v18 = vmul.f32 1.442695, %v2081_v7  ;;  %6304 = vpow2.f32 %v2092_v11 }
 0x9e4   : > { %2118 = vadd.xlane.f32.xlu1 %v2117_v13  ;;  %v2071_v10 = vpop.xlane.xlu1 %2070 }
 0x9e5   : > { %v2083_v16 = vsub.f32 %v7084_v28, %v2071_v10  ;;  %v2104_v22 = vmul.f32 1.442695, %v2082_v12 }
 0x9e6   : > { %v7136_v17 = vpop.eup %6298  ;;  %v2179_v19 = vpop.permute.xlu0 %2178 }
 0x9e7   : > { %v2106_v24 = vmul.f32 1.442695, %v2083_v16  ;;  %5684 = vmatprep.subr.bf16.mxu1 %v2179_v19  ;;  %v2129_v23 = vsel %vm734_vm4, %v7136_v17, 0.0 }
 0x9e8   : > { %5685 = vmatpush3.bf16.msra.mxu1 %v2179_v19  ;;  %2130 = vadd.xlane.f32.xlu1 %v2129_v23  ;;  %v2241_v26 = vpop.permute.xlu1 %2240 }
 0x9e9   : > { %6306 = vpow2.f32 %v2106_v24  ;;  %5692 = vmatprep.subr.bf16.mxu0 %v2241_v26 }
 0x9ea   : > { %6308 = vpow2.f32 %v2102_v18  ;;  %v2243_v31 = vpop.permute.xlu0 %2242  ;;  %5693 = vmatpush3.bf16.msra.mxu0 %v2241_v26 }
 0x9eb   : > { %v7140_v28 = vpop.eup %6300  ;;  %6310 = vpow2.f32 %v2104_v22  ;;  %5694 = vmatprep.subr.bf16.mxu0 %v2243_v31 }
 0x9ec   : > { %v2181_v32 = vpop.permute.xlu1 %2180  ;;  %v2132_v33 = vsel %vm2041_vm11, %v7140_v28, 0.0  ;;  %v7144_v34 = vpop.eup %6302 }
 0x9ed   : > { %2133 = vadd.xlane.f32.xlu0 %v2132_v33  ;;  %5686 = vmatprep.subr.bf16.mxu1 %v2181_v32  ;;  %v2126_v38 = vsel %vm734_vm4, %v7144_v34, 0.0  ;;  %v7151_v39 = vpop.eup %6304 }
 0x9ee   : > { %v7146_v35 = vpop.permute.xlu0 %2364  ;;  %5687 = vmatpush3.bf16.msra.mxu1 %v2181_v32  ;;  %5695 = vmatpush3.bf16.msra.mxu0 %v2243_v31  ;;  %v2120_v51 = vsel %vm734_vm4, %v7151_v39, 0.0 }
 0x9ef   : > { %5708 = vmatprep.subr.bf16.mxu0 %v7146_v35 }
 0x9f0   : > { %v2303_v37 = vpop.permute.xlu1 %2302 }
 0x9f1   : > { %2127 = vadd.xlane.f32.xlu0 %v2126_v38  ;;  %5700 = vmatprep.subr.bf16.mxu1 %v2303_v37 }
 0x9f3   : > { %v7153_v63 = vpop.eup %6306 }
 0x9f4   : > { %v7155_v40 = vpop.eup %6308  ;;  %v2141_v41 = vsel %vm2041_vm11, %v7153_v63, 0.0 }
 0x9f5   : > { %v7161_v49 = vpop.eup %6310  ;;  %2121 = vadd.xlane.f32.xlu0 %v2120_v51  ;;  %2142 = vadd.xlane.f32.xlu1 %v2141_v41  ;;  %v2135_v43 = vsel %vm734_vm4, %v7155_v40, 0.0 }
 0x9f6   : > { %v2138_v0 = vsel %vm734_vm4, %v7161_v49, 0.0 }
 0x9f9   : > { %2139 = vadd.xlane.f32.xlu0 %v2138_v0  ;;  %2136 = vadd.xlane.f32.xlu1 %v2135_v43 }
 0xa0a   : > { %2304 = vrot.lane.b32.xlu1 %v7031_v21, %s6580_s28 }
 0xa0f   : > { %2366 = vrot.lane.b32.xlu0 %v7039_v25, %s6580_s28 }
 0xa1f   : > { %v2116_v44 = vpop.xlane.xlu0 %2115 }
 0xa20   : > { %6312 = vrcp.f32 %v2116_v44 }
 0xa21   : > { %v2113_v45 = vpop.xlane.xlu1 %2112 }
 0xa22   : > { %6314 = vrcp.f32 %v2113_v45  ;;  %v6251_v45 = vld [vmem:[%s8024_s9 + $0x18] sm:$0xff]  }
 0xa23   : > { %v2110_v47 = vpop.xlane.xlu0 %2109 }
 0xa24   : > { %6316 = vrcp.f32 %v2110_v47 }
 0xa2a   : > { %v6313_v48 = vpop.eup %6312 }
 0xa2b   : > { %v2158_v53 = vmul.f32 %v6313_v48, %v7107_v46 }
 0xa2c   : > { %v6315_v50 = vpop.eup %6314 }
 0xa2d   : > { %v2157_v55 = vmul.f32 %v6315_v50, %v7109_v42  ;;  %v2169_v21 = vpack.c.bf16 %v2158_v53, %v2158_v53  ;;  %v6252_v50 = vld [vmem:[%s8020_s5 + $0x20] sm:$0xff]  }
 0xa2e   : > { %v6317_v52 = vpop.eup %6316 }
 0xa2f   : > { %v2156_v54 = vmul.f32 %v6317_v52, %v7113_v14  ;;  %v6253_v52 = vld [vmem:[%s8022_s7 + $0x20] sm:$0xff]  }
 0xa31   : > { %v2168_v57 = vpack.c.bf16 %v2157_v55, %v2156_v54  ;;  %v6254_v54 = vld [vmem:[%s8020_s5 + $0x28] sm:$0xff]  }
 0xa33   : > { %5688 = vmatprep.mubr.msk.bf16.mxu1 %vm734_vm4, %v2168_v57 }
 0xa34   : > { %5689 = vmatmul.mubr.msk.bf16.vlgmr.msra.gmra.mrb[32].mxu1 %vm734_vm4, %v2169_v21 }
 0xa35   : > { %5701 = vmatpush3.bf16.msra.mxu1 %v2303_v37 }
 0xa6d   : > { %v2125_v25 = vpop.xlane.xlu1 %2124 }
 0xa71   : > { %v2119_v58 = vpop.xlane.xlu1 %2118 }
 0xa75   : > { %v2131_v60 = vpop.xlane.xlu1 %2130 }
 0xa7a   : > { %v2134_v62 = vpop.xlane.xlu0 %2133 }
 0xa7b   : > { %6318 = vrcp.f32 %v2134_v62 }
 0xa7c   : > { %6320 = vrcp.f32 %v2131_v60 }
 0xa7e   : > { %v2128_v1 = vpop.xlane.xlu0 %2127 }
 0xa7f   : > { %6322 = vrcp.f32 %v2128_v1 }
 0xa80   : > { %6324 = vrcp.f32 %v2125_v25 }
 0xa81   : > { %6326 = vrcp.f32 %v2119_v58 }
 0xa82   : > { %v2122_v46 = vpop.xlane.xlu0 %2121  ;;  %v2143_v14 = vpop.xlane.xlu1 %2142 }
 0xa83   : > { %6328 = vrcp.f32 %v2122_v46 }
 0xa84   : > { %6330 = vrcp.f32 %v2143_v14 }
 0xa85   : > { %v6319_v42 = vpop.eup %6318 }
 0xa86   : > { %v2140_v4 = vpop.xlane.xlu0 %2139  ;;  %v2137_v5 = vpop.xlane.xlu1 %2136  ;;  %v2164_v6 = vmul.f32 %v6319_v42, %v7140_v28 }
 0xa87   : > { %v6321_v59 = vpop.eup %6320  ;;  %6332 = vrcp.f32 %v2140_v4 }
 0xa88   : > { %6334 = vrcp.f32 %v2137_v5  ;;  %v2163_v11 = vmul.f32 %v6321_v59, %v7136_v17  ;;  %v2173_v16 = vpack.c.bf16 %v2164_v6, %v2164_v6 }
 0xa89   : > { %v6323_v2 = vpop.eup %6322 }
 0xa8a   : > { %v6325_v3 = vpop.eup %6324  ;;  %v2305_v7 = vpop.permute.xlu1 %2304  ;;  %v2162_v9 = vmul.f32 %v6323_v2, %v7144_v34 }
 0xa8b   : > { %v6327_v12 = vpop.eup %6326  ;;  %5702 = vmatprep.subr.bf16.mxu1 %v2305_v7  ;;  %v2161_v18 = vmul.f32 %v6325_v3, %v7124_v61  ;;  %v2367_v32 = vpop.permute.xlu0 %2366 }
 0xa8c   : > { %5703 = vmatpush3.bf16.msra.mxu1 %v2305_v7  ;;  %v2172_v13 = vpack.c.bf16 %v2163_v11, %v2162_v9  ;;  %v2159_v19 = vmul.f32 %v6327_v12, %v7129_v8 }
 0xa8d   : > { %v6329_v10 = vpop.eup %6328  ;;  %v2171_v17 = vpack.c.bf16 %v2161_v18, %v2161_v18 }
 0xa8e   : > { %5704 = vmatprep.mubr.msk.bf16.mxu1 %vm734_vm4, %v2172_v13  ;;  %v2160_v22 = vmul.f32 %v6329_v10, %v7151_v39  ;;  %v6331_v24 = vpop.eup %6330 }
 0xa8f   : > { %5705 = vmatmul.mubr.msk.bf16.vlgmr.msra.gmra.mrb[36].mxu1 %vm734_vm4, %v2173_v16  ;;  %v2167_v33 = vmul.f32 %v6331_v24, %v7153_v63  ;;  %v6250_v63 = vld [vmem:[%s8024_s9 + $0x10] sm:$0xff]  }
 0xa90   : > { %v2170_v23 = vpack.c.bf16 %v2160_v22, %v2159_v19  ;;  %5716 = vmatprep.subr.bf16.mxu1 %v6250_v63  ;;  %v6255_v22 = vld [vmem:[%s8022_s7 + $0x28] sm:$0xff]  }
 0xa91   : > { %v6333_v26 = vpop.eup %6332  ;;  %v2175_v34 = vpack.c.bf16 %v2167_v33, %v2167_v33  ;;  %5717 = vmatpush3.bf16.msra.mxu1 %v6250_v63 }
 0xa92   : > { %v6335_v31 = vpop.eup %6334  ;;  %5696 = vmatprep.mubr.msk.bf16.mxu0 %vm734_vm4, %v2170_v23  ;;  %v2166_v28 = vmul.f32 %v6333_v26, %v7161_v49  ;;  %5718 = vmatprep.subr.bf16.mxu1 %v6251_v45  ;;  %v5251_v23 = vld [vmem:[%s8021_s6 + $0x2] ss:$0 sm:$0xff] }
 0xa93   : > { %5697 = vmatmul.mubr.msk.bf16.vlgmr.msra.gmra.mrb[36].mxu0 %vm734_vm4, %v2171_v17  ;;  %v2165_v61 = vmul.f32 %v6335_v31, %v7155_v40 }
 0xa94   : > { %5709 = vmatpush3.bf16.msra.mxu0 %v7146_v35 }
 0xa95   : > { %5710 = vmatprep.subr.bf16.mxu0 %v2367_v32  ;;  %v2174_v8 = vpack.c.bf16 %v2166_v28, %v2165_v61  ;;  %5719 = vmatpush3.bf16.msra.mxu1 %v6251_v45 }
 0xa96   : > { %5732 = vmatprep.subr.bf16.mxu1 %v6253_v52 }
 0xa97   : > { %5712 = vmatprep.mubr.msk.bf16.mxu0 %vm734_vm4, %v2174_v8 }
 0xa98   : > { %5711 = vmatpush3.bf16.msra.mxu0 %v2367_v32 }
 0xa99   : > { %5724 = vmatprep.subr.bf16.mxu0 %v6252_v50 }
 0xa9b   : > { %5713 = vmatmul.mubr.msk.bf16.vlgmr.msra.gmra.mrb[40].mxu0 %vm734_vm4, %v2175_v34 }
 0xa9c   : > { %5728 = vmatprep.mubr.msk.bf16.mxu0 %vm734_vm4, %v6964_v15  ;;  %5725 = vmatpush3.bf16.msra.mxu0 %v6252_v50 }
 0xa9d   : > { %5726 = vmatprep.subr.bf16.mxu0 %v6254_v54 }
 0xaa0   : > { %5727 = vmatpush3.bf16.msra.mxu0 %v6254_v54 }
 0xaa3   : > { %5729 = vmatmul.mubr.msk.bf16.vlgmr.msra.gmra.mrb[44].mxu0 %vm734_vm4, %v6972_v20 }
 0xb07   : > { %v5690_v37 = vpop.f32.mrb[32].mxu1 }
 0xb08   : > { %v2224_v38 = vpop.f32.mrb[33].mxu1 }
 0xb09   : > { %v5691_v39 = vpop.f32.mrb[34].mxu1 }
 0xb0a   : > { %v2227_v40 = vpop.f32.mrb[35].mxu1 }
 0xb62   : > { %v5706_v51 = vpop.f32.mrb[36].mxu1 }
 0xb63   : > { %v2348_v41 = vpop.f32.mrb[37].mxu1 }
 0xb64   : > { %v5707_v35 = vpop.f32.mrb[38].mxu1 }
 0xb65   : > { %v2351_v49 = vpop.f32.mrb[39].mxu1 }
 0xb66   : > { %v6095_v0 = vpack.i.bf16 %v2351_v49, %v2348_v41  ;;  %v5698_v43 = vpop.f32.mrb[36].mxu0 }
 0xb67   : > { %2431 = vrot.lane.b32.xlu0 %v5698_v43, %s6581_s1  ;;  %v2286_v44 = vpop.f32.mrb[37].mxu0 }
 0xb68   : > { %v5699_v15 = vpop.f32.mrb[38].mxu0 }
 0xb69   : > { %v2289_v47 = vpop.f32.mrb[39].mxu0 }
 0xb6a   : > { %v6090_v48 = vpack.i.bf16 %v2289_v47, %v2286_v44 }
 0xb6b   : > { %2443 = vrot.lane.b32.xlu0 %v5706_v51, %s6582_s18  ;;  %v5261_v51 = vld [vmem:[%s8023_s8 + $0x2] ss:$0 sm:$0xff] }
 0xb6c   : > { %6091 = vrot.lane.b32.xlu1 %v6090_v48, %s6581_s1 }
 0xb6e   : > { %v5714_v53 = vpop.f32.mrb[40].mxu0 }
 0xb6f   : > { %v2410_v55 = vpop.f32.mrb[41].mxu0  ;;  %2455 = vrot.lane.b32.xlu0 %v5714_v53, %s6583_s0 }
 0xb70   : > { %v5715_v57 = vpop.f32.mrb[42].mxu0  ;;  %6096 = vrot.lane.b32.xlu1 %v6095_v0, %s6582_s18 }
 0xb71   : > { %v2413_v21 = vpop.f32.mrb[43].mxu0 }
 0xb72   : > { %v6100_v25 = vpack.i.bf16 %v2413_v21, %v2410_v55 }
 0xb74   : > { %6101 = vrot.lane.b32.xlu1 %v6100_v25, %s6583_s0 }
 0xb76   : > { %v5730_v24 = vpop.f32.mrb[44].mxu0 }
 0xb77   : > { %v2682_v26 = vadd.f32 %v5730_v24, %v5251_v23  ;;  %v2673_v17 = vpop.f32.mrb[45].mxu0 }
 0xb78   : > { %v5731_v31 = vpop.f32.mrb[46].mxu0  ;;  %v2674_v34 = vadd.f32 %v5251_v23, %v2673_v17 }
 0xb79   : > { %v2685_v28 = vadd.f32 %v5731_v31, %v5251_v23  ;;  %v2676_v61 = vpop.f32.mrb[47].mxu0 }
 0xb7a   : > { %v2677_v8 = vadd.f32 %v5251_v23, %v2676_v61 }
 0xb7b   : > { %v2832_v32 = vpack.c.bf16 %v2685_v28, %v2682_v26 }
 0xb7c   : > { %v6115_v33 = vpack.i.bf16 %v2682_v26, %v2677_v8  ;;  %v6140_v53 = vpack.i.bf16 %v2677_v8, %v2674_v34 }
 0xbd9   : > { %v2432_v58 = vpop.permute.xlu0 %2431 }
 0xbda   : > { %v2462_v5 = vsel %vm963_vm6, %v5690_v37, %v2432_v58  ;;  %v6145_v37 = vpack.i.bf16 %v2685_v28, %v2682_v26 }
 0xbdd   : > { %v2444_v62 = vpop.permute.xlu0 %2443 }
 0xbde   : > { %v6092_v60 = vpop.permute.xlu1 %6091  ;;  %v2465_v2 = vsel %vm1439_vm9, %v2462_v5, %v2444_v62 }
 0xbdf   : > { %v6094_v46 = vunpack.i.h.bf16 %v6092_v60  ;;  %v6093_v14 = vunpack.i.l.bf16 %v6092_v60 }
 0xbe1   : > { %v2456_v59 = vpop.permute.xlu0 %2455  ;;  %v2461_v3 = vsel %vm963_vm6, %v2227_v40, %v6094_v46  ;;  %v2460_v7 = vsel %vm963_vm6, %v2224_v38, %v6093_v14 }
 0xbe2   : > { %v6097_v1 = vpop.permute.xlu1 %6096  ;;  %v2468_v11 = vsel %vm1441_vm10, %v2465_v2, %v2456_v59 }
 0xbe3   : > { %v6099_v42 = vunpack.i.h.bf16 %v6097_v1  ;;  %v6098_v4 = vunpack.i.l.bf16 %v6097_v1  ;;  %v2470_v19 = vpack.c.bf16 %v2468_v11, %v2468_v11 }
 0xbe5   : > { %v2463_v12 = vsel %vm1439_vm9, %v2460_v7, %v6098_v4  ;;  %v2464_v13 = vsel %vm1439_vm9, %v2461_v3, %v6099_v42 }
 0xbe6   : > { %v6102_v6 = vpop.permute.xlu1 %6101 }
 0xbe7   : > { %v6104_v9 = vunpack.i.h.bf16 %v6102_v6  ;;  %v6103_v20 = vunpack.i.l.bf16 %v6102_v6 }
 0xbe9   : > { %v2466_v10 = vsel %vm1441_vm10, %v2463_v12, %v6103_v20  ;;  %v2467_v16 = vsel %vm1441_vm10, %v2464_v13, %v6104_v9 }
 0xbea   : > { %v2469_v18 = vpack.c.bf16 %v2467_v16, %v2466_v10 }
 0xbec   : > { %5720 = vmatprep.mubr.msk.bf16.mxu1 %vm734_vm4, %v2469_v18 }
 0xbed   : > { %5721 = vmatmul.mubr.msk.bf16.vlgmr.msra.gmra.mrb[40].mxu1 %vm734_vm4, %v2470_v19 }
 0xbee   : > { %5733 = vmatpush3.bf16.msra.mxu1 %v6253_v52  ;;  %5736 = vmatprep.mubr.msk.bf16.mxu1 %vm734_vm4, %v6794_v27  ;;  %v2831_v27 = vpack.c.bf16 %v2677_v8, %v2674_v34 }
 0xbef   : > { %5734 = vmatprep.subr.bf16.mxu1 %v6255_v22 }
 0xbf0   : > { %5744 = vmatprep.mubr.msk.bf16.mxu0 %vm963_vm6, %v2831_v27 }
 0xbf2   : > { %5735 = vmatpush3.bf16.msra.mxu1 %v6255_v22 }
 0xbf5   : > { %5737 = vmatmul.mubr.msk.bf16.vlgmr.msra.gmra.mrb[44].mxu1 %vm734_vm4, %v6798_v29 }
 0xcc0   : > { %v7239_v38 = vpop.f32.mrb[40].mxu1 }
 0xcc1   : > { %v7241_v29 = vpop.f32.mrb[41].mxu1 }
 0xcc2   : > { %v5723_v39 = vpop.f32.mrb[42].mxu1 }
 0xcc3   : > { %v7243_v40 = vpop.f32.mrb[43].mxu1 }
 0xcc8   : > { %v5738_v41 = vpop.f32.mrb[44].mxu1 }
 0xcc9   : > { %v2756_v35 = vadd.f32 %v5738_v41, %v5261_v51  ;;  %v2747_v63 = vpop.f32.mrb[45].mxu1 }
 0xcca   : > { %v5739_v49 = vpop.f32.mrb[46].mxu1  ;;  %v2748_v44 = vadd.f32 %v5261_v51, %v2747_v63 }
 0xccb   : > { %v2750_v0 = vpop.f32.mrb[47].mxu1  ;;  %v6110_v43 = vpack.i.bf16 %v2674_v34, %v2756_v35  ;;  %v2840_v50 = vpack.c.bf16 %v2756_v35, %v2756_v35 }
 0xccc   : > { %v2751_v15 = vadd.f32 %v5261_v51, %v2750_v0 }
 0xccd   : > { %6111 = vrot.lane.b32.xlu0 %v6110_v43, %s6577_s17  ;;  %v2857_v52 = vsel %vm963_vm6, %v2840_v50, 0 }
 0xcce   : > { %v6105_v45 = vpack.i.bf16 %v2751_v15, %v2748_v44  ;;  %v2839_v47 = vpack.c.bf16 %v2751_v15, %v2748_v44 }
 0xcd0   : > { %6106 = vrot.lane.b32.xlu1 %v6105_v45, %s6577_s17  ;;  %5929 = vmatprep.subr.msk.bf16.mxu0 %vm963_vm6, %v2839_v47  ;;  %v2854_v48 = vsel %vm963_vm6, %v2839_v47, 0 }
 0xcd1   : > { %6116 = vrot.lane.b32.xlu0 %v6115_v33, %s6577_s17  ;;  %5741 = vmatpush3.bf16.xpose.msra.mxu0 %v2854_v48 }
 0xcd2   : > { %5930 = vmatprep.subr.msk.bf16.mxu0 %vm963_vm6, %v2840_v50 }
 0xcd4   : > { %6121 = vrot.lane.b32.xlu1 %v6105_v45, %s6578_s19 }
 0xcd5   : > { %2771 = vrot.lane.b32.xlu0 %v2685_v28, %s6577_s17 }
 0xcd8   : > { %6126 = vrot.lane.b32.xlu1 %v6105_v45, %s6579_s20 }
 0xcd9   : > { %2826 = vrot.lane.b32.xlu0 %v2756_v35, %s6579_s20  ;;  %5743 = vmatpush3.bf16.xpose.msra.mxu0 %v2857_v52 }
 0xcdc   : > { %6131 = vrot.lane.b32.xlu1 %v6110_v43, %s6578_s19 }
 0xcdd   : > { %2783 = vrot.lane.b32.xlu0 %v2685_v28, %s6578_s19 }
 0xce0   : > { %6136 = vrot.lane.b32.xlu1 %v6115_v33, %s6578_s19  ;;  %5745 = vmatmul.mubr.msk.bf16.vlgmr.msra.gmra.mrb[48].mxu0 %vm963_vm6, %v2832_v32 }
 0xce1   : > { %6146 = vrot.lane.b32.xlu0 %v6145_v37, %s6579_s20 }
 0xce4   : > { %6141 = vrot.lane.b32.xlu1 %v6140_v53, %s6579_s20 }
 0xce5   : > { %3293 = vrot.lane.b32.xlu0 %v2839_v47, %s6580_s28 }
 0xce8   : > { %3295 = vrot.lane.b32.xlu1 %v2840_v50, %s6580_s28 }
 0xd3f   : > { %v6112_v54 = vpop.permute.xlu0 %6111 }
 0xd40   : > { %v6113_v57 = vunpack.i.l.bf16 %v6112_v54  ;;  %v6114_v60 = vunpack.i.h.bf16 %v6112_v54 }
 0xd42   : > { %v6107_v55 = vpop.permute.xlu1 %6106  ;;  %v7267_v42 = vpack.c.bf16 %v6113_v57, %v6113_v57 }
 0xd43   : > { %v6109_v21 = vunpack.i.h.bf16 %v6107_v55  ;;  %v6108_v25 = vunpack.i.l.bf16 %v6107_v55  ;;  %v6117_v58 = vpop.permute.xlu0 %6116 }
 0xd44   : > { %v6118_v62 = vunpack.i.l.bf16 %v6117_v58  ;;  %v2918_v18 = vsel %vm963_vm6, %v7267_v42, 0  ;;  %v6119_v19 = vunpack.i.h.bf16 %v6117_v58 }
 0xd45   : > { %v2841_v1 = vpack.c.bf16 %v6109_v21, %v6108_v25 }
 0xd46   : > { %v2833_v46 = vpack.c.bf16 %v6118_v62, %v6114_v60  ;;  %v6122_v14 = vpop.permute.xlu1 %6121 }
 0xd47   : > { %v6124_v4 = vunpack.i.h.bf16 %v6122_v14  ;;  %v6123_v5 = vunpack.i.l.bf16 %v6122_v14  ;;  %v2772_v59 = vpop.permute.xlu0 %2771  ;;  %3358 = vrot.lane.b32.xlu1 %v2841_v1, %s6580_s28  ;;  %5931 = vmatprep.subr.msk.bf16.mxu1 %vm963_vm6, %v2841_v1  ;;  %v2915_v2 = vsel %vm963_vm6, %v2841_v1, 0 }
 0xd48   : > { %5749 = vmatpush3.bf16.xpose.msra.mxu1 %v2915_v2  ;;  %5752 = vmatprep.mubr.msk.bf16.mxu1 %vm963_vm6, %v2833_v46  ;;  %v2834_v28 = vpack.c.bf16 %v2772_v59, %v6119_v19 }
 0xd49   : > { %v7273_v6 = vpack.c.bf16 %v6124_v4, %v6123_v5  ;;  %5932 = vmatprep.subr.msk.bf16.mxu1 %vm963_vm6, %v7267_v42 }
 0xd4a   : > { %v6127_v3 = vpop.permute.xlu1 %6126 }
 0xd4b   : > { %v6129_v7 = vunpack.i.h.bf16 %v6127_v3  ;;  %v6128_v9 = vunpack.i.l.bf16 %v6127_v3  ;;  %v2827_v20 = vpop.permute.xlu0 %2826  ;;  %5933 = vmatprep.subr.msk.bf16.mxu0 %vm963_vm6, %v7273_v6  ;;  %v2976_v11 = vsel %vm963_vm6, %v7273_v6, 0 }
 0xd4c   : > { %5757 = vmatpush3.bf16.xpose.msra.mxu0 %v2976_v11  ;;  %v7293_v33 = vpack.c.bf16 %v2827_v20, %v2827_v20 }
 0xd4d   : > { %v7281_v13 = vpack.c.bf16 %v6129_v7, %v6128_v9 }
 0xd4e   : > { %v6132_v12 = vpop.permute.xlu1 %6131  ;;  %v3040_v63 = vsel %vm963_vm6, %v7293_v33, 0 }
 0xd4f   : > { %v6133_v10 = vunpack.i.l.bf16 %v6132_v12  ;;  %v2784_v16 = vpop.permute.xlu0 %2783  ;;  %v6134_v23 = vunpack.i.h.bf16 %v6132_v12  ;;  %v3037_v39 = vsel %vm963_vm6, %v7281_v13, 0 }
 0xd50   : > { %5751 = vmatpush3.bf16.xpose.msra.mxu1 %v2918_v18 }
 0xd51   : > { %v7285_v22 = vpack.c.bf16 %v6133_v10, %v6133_v10  ;;  %5935 = vmatprep.subr.msk.bf16.mxu1 %vm963_vm6, %v7281_v13 }
 0xd52   : > { %v6137_v24 = vpop.permute.xlu1 %6136 }
 0xd53   : > { %v6138_v26 = vunpack.i.l.bf16 %v6137_v24  ;;  %v6147_v17 = vpop.permute.xlu0 %6146  ;;  %5934 = vmatprep.subr.msk.bf16.mxu0 %vm963_vm6, %v7285_v22  ;;  %v2979_v31 = vsel %vm963_vm6, %v7285_v22, 0  ;;  %v6139_v61 = vunpack.i.h.bf16 %v6137_v24 }
 0xd54   : > { %5759 = vmatpush3.bf16.xpose.msra.mxu0 %v2979_v31  ;;  %v6149_v0 = vunpack.i.h.bf16 %v6147_v17  ;;  %v6148_v43 = vunpack.i.l.bf16 %v6147_v17 }
 0xd55   : > { %v2835_v32 = vpack.c.bf16 %v6138_v26, %v6134_v23  ;;  %v2836_v51 = vpack.c.bf16 %v2784_v16, %v6139_v61 }
 0xd56   : > { %v6142_v8 = vpop.permute.xlu1 %6141  ;;  %v2838_v44 = vpack.c.bf16 %v6149_v0, %v6148_v43 }
 0xd57   : > { %v6144_v34 = vunpack.i.h.bf16 %v6142_v8  ;;  %v6143_v27 = vunpack.i.l.bf16 %v6142_v8  ;;  %5753 = vmatmul.mubr.msk.bf16.vlgmr.msra.gmra.mrb[48].mxu1 %vm963_vm6, %v2834_v28  ;;  %v3294_v37 = vpop.permute.xlu0 %3293  ;;  %5760 = vmatprep.mubr.msk.bf16.mxu0 %vm963_vm6, %v2835_v32 }
 0xd58   : > { %5765 = vmatpush3.bf16.xpose.msra.mxu1 %v3037_v39  ;;  %5772 = vmatprep.subr.bf16.mxu0 %v3294_v37 }
 0xd59   : > { %v2837_v41 = vpack.c.bf16 %v6144_v34, %v6143_v27  ;;  %5936 = vmatprep.subr.msk.bf16.mxu1 %vm963_vm6, %v7293_v33 }
 0xd5a   : > { %v3296_v35 = vpop.permute.xlu1 %3295 }
 0xd5b   : > { %5761 = vmatmul.mubr.msk.bf16.vlgmr.msra.gmra.mrb[52].mxu0 %vm963_vm6, %v2836_v51  ;;  %5768 = vmatprep.mubr.msk.bf16.mxu1 %vm963_vm6, %v2837_v41  ;;  %v3305_v49 = vsel %vm1223_vm8, %v3296_v35, 0 }
 0xd5c   : > { %5773 = vmatpush3.bf16.msra.mxu0 %v3294_v37 }
 0xd5d   : > { %5937 = vmatprep.subr.msk.bf16.mxu0 %vm1223_vm8, %v3296_v35 }
 0xd60   : > { %5767 = vmatpush3.bf16.xpose.msra.mxu1 %v3040_v63  ;;  %5775 = vmatpush3.bf16.msra.mxu0 %v3305_v49 }
 0xd67   : > { %5769 = vmatmul.mubr.msk.bf16.vlgmr.msra.gmra.mrb[52].mxu1 %vm963_vm6, %v2838_v44 }
 0xdb3   : > { %v5746_v15 = vpop.f32.mrb[48].mxu0 }
 0xdb4   : > { %v7308_v45 = vmul.f32 0.35355338, %v5746_v15  ;;  %v2893_v47 = vpop.f32.mrb[49].mxu0 }
 0xdb5   : > { %v7310_v48 = vmul.f32 0.35355338, %v2893_v47  ;;  %v5747_v50 = vpop.f32.mrb[50].mxu0 }
 0xdb6   : > { %v2896_v52 = vpop.f32.mrb[51].mxu0  ;;  %v3113_v53 = vsel %vm1164_vm7, %v7308_v45, -inf  ;;  %v7314_v54 = vmul.f32 0.35355338, %v5747_v50 }
 0xdb7   : > { %v7316_v55 = vmul.f32 0.35355338, %v2896_v52  ;;  %3114 = vmax.xlane.f32.xlu0 %v3113_v53  ;;  %v3107_v57 = vsel %vm1164_vm7, %v7310_v48, -inf }
 0xdb8   : > { %3108 = vmax.xlane.f32.xlu1 %v3107_v57  ;;  %v3116_v58 = vsel %vm1164_vm7, %v7314_v54, -inf }
 0xdb9   : > { %v3359_v21 = vpop.permute.xlu1 %3358  ;;  %v3110_v25 = vsel %vm1164_vm7, %v7316_v55, -inf }
 0xdba   : > { %5780 = vmatprep.subr.bf16.mxu1 %v3359_v21 }
 0xdbb   : > { %5781 = vmatpush3.bf16.msra.mxu1 %v3359_v21  ;;  %3111 = vmax.xlane.f32.xlu0 %v3110_v25 }
 0xdbc   : > { %3117 = vmax.xlane.f32.xlu1 %v3116_v58 }
 0xe2a   : > { %v5754_v60 = vpop.f32.mrb[48].mxu1 }
 0xe2b   : > { %v7324_v62 = vmul.f32 0.35355338, %v5754_v60  ;;  %v2954_v1 = vpop.f32.mrb[49].mxu1 }
 0xe2c   : > { %v5755_v46 = vpop.f32.mrb[50].mxu1  ;;  %v7334_v20 = vmul.f32 0.35355338, %v2954_v1 }
 0xe2d   : > { %v7326_v14 = vmul.f32 0.35355338, %v5755_v46  ;;  %v2957_v4 = vpop.f32.mrb[51].mxu1  ;;  %v3125_v5 = vsel %vm1164_vm7, %v7324_v62, -inf }
 0xe2e   : > { %3126 = vmax.xlane.f32.xlu0 %v3125_v5  ;;  %v5762_v59 = vpop.f32.mrb[52].mxu0  ;;  %v7340_v16 = vmul.f32 0.35355338, %v2957_v4  ;;  %v3119_v24 = vsel %vm1164_vm7, %v7334_v20, -inf }
 0xe2f   : > { %v7330_v2 = vmul.f32 0.35355338, %v5762_v59  ;;  %v3015_v3 = vpop.f32.mrb[53].mxu0  ;;  %v3128_v7 = vsel %vm1164_vm7, %v7326_v14, -inf }
 0xe30   : > { %3129 = vmax.xlane.f32.xlu1 %v3128_v7  ;;  %v5763_v9 = vpop.f32.mrb[54].mxu0  ;;  %v7344_v19 = vmul.f32 0.35355338, %v3015_v3  ;;  %v3122_v26 = vsel %vm1164_vm7, %v7340_v16, -inf }
 0xe31   : > { %v7336_v11 = vmul.f32 0.35355338, %v5763_v9  ;;  %v3018_v12 = vpop.f32.mrb[55].mxu0  ;;  %v3137_v10 = vsel %vm1164_vm7, %v7330_v2, -inf }
 0xe32   : > { %3138 = vmax.xlane.f32.xlu0 %v3137_v10  ;;  %v7348_v23 = vmul.f32 0.35355338, %v3018_v12  ;;  %v3131_v17 = vsel %vm1164_vm7, %v7344_v19, -inf }
 0xe33   : > { %v3140_v18 = vsel %vm1164_vm7, %v7336_v11, -inf }
 0xe34   : > { %3141 = vmax.xlane.f32.xlu1 %v3140_v18  ;;  %v3134_v32 = vsel %vm1164_vm7, %v7348_v23, -inf }
 0xe36   : > { %3120 = vmax.xlane.f32.xlu0 %v3119_v24 }
 0xe38   : > { %3123 = vmax.xlane.f32.xlu1 %v3122_v26 }
 0xe3a   : > { %v5770_v31 = vpop.f32.mrb[52].mxu1  ;;  %3132 = vmax.xlane.f32.xlu0 %v3131_v17 }
 0xe3b   : > { %v7354_v28 = vmul.f32 0.35355338, %v5770_v31  ;;  %v3076_v61 = vpop.f32.mrb[53].mxu1 }
 0xe3c   : > { %v5771_v8 = vpop.f32.mrb[54].mxu1  ;;  %3135 = vmax.xlane.f32.xlu1 %v3134_v32  ;;  %v7358_v34 = vmul.f32 0.35355338, %v3076_v61 }
 0xe3d   : > { %v7360_v27 = vmul.f32 0.35355338, %v5771_v8  ;;  %v3079_v37 = vpop.f32.mrb[55].mxu1  ;;  %v3149_v39 = vsel %vm1164_vm7, %v7354_v28, -inf }
 0xe3e   : > { %3150 = vmax.xlane.f32.xlu0 %v3149_v39  ;;  %v7364_v51 = vmul.f32 0.35355338, %v3079_v37  ;;  %v3143_v35 = vsel %vm1164_vm7, %v7358_v34, -inf }
 0xe3f   : > { %v3152_v41 = vsel %vm1164_vm7, %v7360_v27, -inf }
 0xe40   : > { %3153 = vmax.xlane.f32.xlu1 %v3152_v41  ;;  %v3146_v63 = vsel %vm1164_vm7, %v7364_v51, -inf }
 0xe42   : > { %3144 = vmax.xlane.f32.xlu0 %v3143_v35 }
 0xe44   : > { %3147 = vmax.xlane.f32.xlu1 %v3146_v63  ;;  %v3115_v0 = vpop.xlane.xlu0 %3114 }
 0xe45   : > { %v3109_v49 = vpop.xlane.xlu1 %3108  ;;  %v3157_v47 = vsub.f32 %v7308_v45, %v3115_v0 }
 0xe47   : > { %v3175_v53 = vmul.f32 1.442695, %v3157_v47 }
 0xe48   : > { %v3112_v15 = vpop.xlane.xlu0 %3111 }
 0xe49   : > { %v3118_v43 = vpop.xlane.xlu1 %3117  ;;  %v3156_v50 = vsub.f32 %v7316_v55, %v3112_v15 }
 0xe4a   : > { %v3158_v44 = vsub.f32 %v7314_v54, %v3118_v43 }
 0xe4b   : > { %v3173_v57 = vmul.f32 1.442695, %v3156_v50 }
 0xe4c   : > { %v3177_v52 = vmul.f32 1.442695, %v3158_v44 }
 0xe4e   : > { %6336 = vpow2.f32 %v3177_v52 }
 0xe4f   : > { %6338 = vpow2.f32 %v3175_v53 }
 0xe50   : > { %6340 = vpow2.f32 %v3173_v57 }
 0xe55   : > { %3423 = vrot.lane.b32.xlu1 %v7273_v6, %s6580_s28  ;;  %v3155_v6 = vsub.f32 %v7310_v48, %v3109_v49 }
 0xe58   : > { %3360 = vrot.lane.b32.xlu0 %v7267_v42, %s6580_s28  ;;  %v3171_v42 = vmul.f32 1.442695, %v3155_v6 }
 0xe5a   : > { %6342 = vpow2.f32 %v3171_v42 }
 0xe5c   : > { %3488 = vrot.lane.b32.xlu0 %v7281_v13, %s6580_s28  ;;  %v7382_v13 = vpop.eup %6336 }
 0xe5d   : > { %v7384_v21 = vpop.eup %6338  ;;  %v3212_v54 = vsel %vm1164_vm7, %v7382_v13, 0.0 }
 0xe5e   : > { %v7388_v45 = vpop.eup %6340  ;;  %v3209_v55 = vsel %vm1164_vm7, %v7384_v21, 0.0 }
 0xe5f   : > { %v3206_v25 = vsel %vm1164_vm7, %v7388_v45, 0.0 }
 0xe64   : > { %v7392_v48 = vpop.eup %6342 }
 0xe65   : > { %v3203_v58 = vsel %vm1164_vm7, %v7392_v48, 0.0 }
 0xe79   : > { %3213 = vadd.xlane.f32.xlu1 %v3212_v54 }
 0xe7b   : > { %3210 = vadd.xlane.f32.xlu0 %v3209_v55 }
 0xe7d   : > { %3207 = vadd.xlane.f32.xlu1 %v3206_v25 }
 0xe7f   : > { %3204 = vadd.xlane.f32.xlu0 %v3203_v58 }
 0xebb   : > { %v3127_v60 = vpop.xlane.xlu0 %3126 }
 0xebc   : > { %v3161_v1 = vsub.f32 %v7324_v62, %v3127_v60 }
 0xebd   : > { %v3130_v46 = vpop.xlane.xlu1 %3129 }
 0xebe   : > { %v3183_v4 = vmul.f32 1.442695, %v3161_v1  ;;  %v3162_v5 = vsub.f32 %v7326_v14, %v3130_v46 }
 0xebf   : > { %v3139_v59 = vpop.xlane.xlu0 %3138 }
 0xec0   : > { %6344 = vpow2.f32 %v3183_v4  ;;  %v3185_v3 = vmul.f32 1.442695, %v3162_v5  ;;  %v3165_v7 = vsub.f32 %v7330_v2, %v3139_v59 }
 0xec1   : > { %v3142_v9 = vpop.xlane.xlu1 %3141 }
 0xec2   : > { %6346 = vpow2.f32 %v3185_v3  ;;  %v3191_v12 = vmul.f32 1.442695, %v3165_v7  ;;  %v3166_v10 = vsub.f32 %v7336_v11, %v3142_v9 }
 0xec3   : > { %v3121_v18 = vpop.xlane.xlu0 %3120 }
 0xec4   : > { %6348 = vpow2.f32 %v3191_v12  ;;  %v3193_v24 = vmul.f32 1.442695, %v3166_v10  ;;  %v3159_v26 = vsub.f32 %v7334_v20, %v3121_v18 }
 0xec5   : > { %v3124_v62 = vpop.xlane.xlu1 %3123 }
 0xec6   : > { %6350 = vpow2.f32 %v3193_v24  ;;  %v3179_v17 = vmul.f32 1.442695, %v3159_v26  ;;  %v3160_v14 = vsub.f32 %v7340_v16, %v3124_v62 }
 0xec7   : > { %v3133_v31 = vpop.xlane.xlu0 %3132 }
 0xec8   : > { %6352 = vpow2.f32 %v3179_v17  ;;  %v3181_v61 = vmul.f32 1.442695, %v3160_v14  ;;  %v3163_v2 = vsub.f32 %v7344_v19, %v3133_v31 }
 0xec9   : > { %v3136_v32 = vpop.xlane.xlu1 %3135 }
 0xeca   : > { %v7405_v8 = vpop.eup %6344  ;;  %6354 = vpow2.f32 %v3181_v61  ;;  %v3187_v11 = vmul.f32 1.442695, %v3163_v2  ;;  %v3164_v37 = vsub.f32 %v7348_v23, %v3136_v32 }
 0xecb   : > { %v3151_v39 = vpop.xlane.xlu0 %3150  ;;  %v3221_v20 = vsel %vm1164_vm7, %v7405_v8, 0.0 }
 0xecc   : > { %v7410_v41 = vpop.eup %6346  ;;  %6356 = vpow2.f32 %v3187_v11  ;;  %v3189_v16 = vmul.f32 1.442695, %v3164_v37  ;;  %v3169_v35 = vsub.f32 %v7354_v28, %v3151_v39  ;;  %3222 = vadd.xlane.f32.xlu0 %v3221_v20 }
 0xecd   : > { %v3154_v63 = vpop.xlane.xlu1 %3153  ;;  %v3224_v19 = vsel %vm1164_vm7, %v7410_v41, 0.0 }
 0xece   : > { %v7415_v49 = vpop.eup %6348  ;;  %6358 = vpow2.f32 %v3189_v16  ;;  %v3199_v0 = vmul.f32 1.442695, %v3169_v35  ;;  %v3170_v23 = vsub.f32 %v7360_v27, %v3154_v63  ;;  %3225 = vadd.xlane.f32.xlu1 %v3224_v19 }
 0xecf   : > { %v3145_v43 = vpop.xlane.xlu0 %3144  ;;  %v3233_v44 = vsel %vm1164_vm7, %v7415_v49, 0.0 }
 0xed0   : > { %v7420_v15 = vpop.eup %6350  ;;  %6360 = vpow2.f32 %v3199_v0  ;;  %v3201_v28 = vmul.f32 1.442695, %v3170_v23  ;;  %v3167_v47 = vsub.f32 %v7358_v34, %v3145_v43  ;;  %3234 = vadd.xlane.f32.xlu0 %v3233_v44 }
 0xed1   : > { %v3148_v50 = vpop.xlane.xlu1 %3147  ;;  %v3236_v52 = vsel %vm1164_vm7, %v7420_v15, 0.0 }
 0xed2   : > { %v7425_v53 = vpop.eup %6352  ;;  %6362 = vpow2.f32 %v3201_v28  ;;  %v3195_v27 = vmul.f32 1.442695, %v3167_v47  ;;  %v3168_v6 = vsub.f32 %v7364_v51, %v3148_v50  ;;  %3237 = vadd.xlane.f32.xlu1 %v3236_v52 }
 0xed3   : > { %v3361_v57 = vpop.permute.xlu0 %3360  ;;  %v3215_v42 = vsel %vm1164_vm7, %v7425_v53, 0.0 }
 0xed4   : > { %v7430_v54 = vpop.eup %6354  ;;  %6364 = vpow2.f32 %v3195_v27  ;;  %v3197_v34 = vmul.f32 1.442695, %v3168_v6  ;;  %3216 = vadd.xlane.f32.xlu0 %v3215_v42  ;;  %5938 = vmatprep.subr.msk.bf16.mxu1 %vm1223_vm8, %v3361_v57  ;;  %v3370_v55 = vsel %vm1223_vm8, %v3361_v57, 0 }
 0xed5   : > { %5783 = vmatpush3.bf16.msra.mxu1 %v3370_v55  ;;  %v3424_v25 = vpop.permute.xlu1 %3423  ;;  %v3218_v58 = vsel %vm1164_vm7, %v7430_v54, 0.0 }
 0xed6   : > { %v7436_v51 = vpop.eup %6356  ;;  %6366 = vpow2.f32 %v3197_v34  ;;  %3219 = vadd.xlane.f32.xlu1 %v3218_v58  ;;  %5788 = vmatprep.subr.bf16.mxu0 %v3424_v25 }
 0xed7   : > { %v7438_v60 = vpop.permute.xlu0 %3488  ;;  %v3227_v1 = vsel %vm1164_vm7, %v7436_v51, 0.0 }
 0xed8   : > { %v7442_v46 = vpop.eup %6358  ;;  %3228 = vadd.xlane.f32.xlu0 %v3227_v1  ;;  %5796 = vmatprep.subr.bf16.mxu1 %v7438_v60 }
 0xed9   : > { %v3230_v4 = vsel %vm1164_vm7, %v7442_v46, 0.0 }
 0xeda   : > { %v7447_v5 = vpop.eup %6360  ;;  %3231 = vadd.xlane.f32.xlu1 %v3230_v4 }
 0xedb   : > { %v3245_v59 = vsel %vm1164_vm7, %v7447_v5, 0.0 }
 0xedc   : > { %v7451_v3 = vpop.eup %6362  ;;  %3246 = vadd.xlane.f32.xlu0 %v3245_v59 }
 0xedd   : > { %v3248_v7 = vsel %vm1164_vm7, %v7451_v3, 0.0 }
 0xede   : > { %v7455_v9 = vpop.eup %6364  ;;  %3249 = vadd.xlane.f32.xlu1 %v3248_v7 }
 0xedf   : > { %v3239_v12 = vsel %vm1164_vm7, %v7455_v9, 0.0 }
 0xee0   : > { %v7459_v10 = vpop.eup %6366  ;;  %3240 = vadd.xlane.f32.xlu0 %v3239_v12 }
 0xee1   : > { %v3242_v18 = vsel %vm1164_vm7, %v7459_v10, 0.0 }
 0xee2   : > { %3243 = vadd.xlane.f32.xlu1 %v3242_v18 }
 0xef3   : > { %3425 = vrot.lane.b32.xlu1 %v7285_v22, %s6580_s28 }
 0xef6   : > { %3490 = vrot.lane.b32.xlu0 %v7293_v33, %s6580_s28 }
 0xf06   : > { %v3214_v24 = vpop.xlane.xlu1 %3213 }
 0xf08   : > { %v3211_v26 = vpop.xlane.xlu0 %3210 }
 0xf09   : > { %6368 = vrcp.f32 %v3211_v26 }
 0xf0a   : > { %v3208_v62 = vpop.xlane.xlu1 %3207 }
 0xf0b   : > { %6370 = vrcp.f32 %v3208_v62 }
 0xf0c   : > { %6372 = vrcp.f32 %v3214_v24  ;;  %v3205_v17 = vpop.xlane.xlu0 %3204 }
 0xf0d   : > { %6374 = vrcp.f32 %v3205_v17 }
 0xf13   : > { %v6369_v14 = vpop.eup %6368 }
 0xf14   : > { %v3269_v32 = vmul.f32 %v6369_v14, %v7384_v21 }
 0xf15   : > { %v6371_v31 = vpop.eup %6370 }
 0xf16   : > { %v6373_v61 = vpop.eup %6372  ;;  %v3268_v22 = vmul.f32 %v6371_v31, %v7388_v45 }
 0xf17   : > { %v6375_v2 = vpop.eup %6374  ;;  %v3270_v33 = vmul.f32 %v6373_v61, %v7382_v13 }
 0xf18   : > { %v3267_v11 = vmul.f32 %v6375_v2, %v7392_v48 }
 0xf19   : > { %v3284_v39 = vpack.c.bf16 %v3270_v33, %v3269_v32 }
 0xf1a   : > { %v3283_v37 = vpack.c.bf16 %v3268_v22, %v3267_v11 }
 0xf1c   : > { %5776 = vmatprep.mubr.msk.bf16.mxu0 %vm1164_vm7, %v3283_v37 }
 0xf1d   : > { %5777 = vmatmul.mubr.msk.bf16.vlgmr.msra.gmra.mrb[56].mxu0 %vm1164_vm7, %v3284_v39 }
 0xf1e   : > { %5789 = vmatpush3.bf16.msra.mxu0 %v3424_v25 }
 0xf59   : > { %v3223_v20 = vpop.xlane.xlu0 %3222 }
 0xf5b   : > { %v3226_v16 = vpop.xlane.xlu1 %3225 }
 0xf5c   : > { %6376 = vrcp.f32 %v3226_v16 }
 0xf5d   : > { %v3235_v35 = vpop.xlane.xlu0 %3234 }
 0xf5f   : > { %v3238_v63 = vpop.xlane.xlu1 %3237 }
 0xf61   : > { %v3217_v19 = vpop.xlane.xlu0 %3216 }
 0xf62   : > { %6378 = vrcp.f32 %v3217_v19 }
 0xf63   : > { %6380 = vrcp.f32 %v3223_v20  ;;  %v3220_v21 = vpop.xlane.xlu1 %3219 }
 0xf64   : > { %6382 = vrcp.f32 %v3220_v21 }
 0xf65   : > { %6384 = vrcp.f32 %v3238_v63  ;;  %v3229_v45 = vpop.xlane.xlu0 %3228 }
 0xf66   : > { %6386 = vrcp.f32 %v3229_v45  ;;  %v6377_v0 = vpop.eup %6376 }
 0xf67   : > { %6388 = vrcp.f32 %v3235_v35  ;;  %v3232_v13 = vpop.xlane.xlu1 %3231  ;;  %v3274_v50 = vmul.f32 %v6377_v0, %v7410_v41  ;;  %v6257_v35 = vld [vmem:[%s8024_s9 + $0x28] sm:$0xff]  }
 0xf68   : > { %6390 = vrcp.f32 %v3232_v13 }
 0xf69   : > { %v3247_v48 = vpop.xlane.xlu0 %3246 }
 0xf6b   : > { %v3250_v23 = vpop.xlane.xlu1 %3249 }
 0xf6c   : > { %v6379_v43 = vpop.eup %6378  ;;  %6392 = vrcp.f32 %v3250_v23 }
 0xf6d   : > { %v6381_v44 = vpop.eup %6380  ;;  %v3241_v28 = vpop.xlane.xlu0 %3240  ;;  %v3271_v6 = vmul.f32 %v6379_v43, %v7425_v53 }
 0xf6e   : > { %v6383_v47 = vpop.eup %6382  ;;  %6394 = vrcp.f32 %v3241_v28  ;;  %v3273_v34 = vmul.f32 %v6381_v44, %v7405_v8 }
 0xf6f   : > { %v6385_v52 = vpop.eup %6384  ;;  %6396 = vrcp.f32 %v3247_v48  ;;  %v3244_v27 = vpop.xlane.xlu1 %3243  ;;  %v3272_v57 = vmul.f32 %v6383_v47, %v7430_v54 }
 0xf70   : > { %v6387_v42 = vpop.eup %6386  ;;  %6398 = vrcp.f32 %v3244_v27  ;;  %v3278_v1 = vmul.f32 %v6385_v52, %v7420_v15  ;;  %v3286_v4 = vpack.c.bf16 %v3274_v50, %v3273_v34 }
 0xf71   : > { %v6389_v55 = vpop.eup %6388  ;;  %v3285_v25 = vpack.c.bf16 %v3272_v57, %v3271_v6  ;;  %v3275_v59 = vmul.f32 %v6387_v42, %v7436_v51  ;;  %v3491_v8 = vpop.permute.xlu0 %3490 }
 0xf72   : > { %v6391_v58 = vpop.eup %6390  ;;  %v3277_v53 = vmul.f32 %v6389_v55, %v7415_v49  ;;  %v3500_v49 = vsel %vm1223_vm8, %v3491_v8, 0 }
 0xf73   : > { %5784 = vmatprep.mubr.msk.bf16.mxu1 %vm1164_vm7, %v3285_v25  ;;  %v3426_v41 = vpop.permute.xlu1 %3425  ;;  %v3276_v7 = vmul.f32 %v6391_v58, %v7442_v46 }
 0xf74   : > { %v3435_v54 = vsel %vm1223_vm8, %v3426_v41, 0  ;;  %5785 = vmatmul.mubr.msk.bf16.vlgmr.msra.gmra.mrb[56].mxu1 %vm1164_vm7, %v3286_v4  ;;  %5939 = vmatprep.subr.msk.bf16.mxu0 %vm1223_vm8, %v3426_v41  ;;  %v3288_v12 = vpack.c.bf16 %v3278_v1, %v3277_v53 }
 0xf75   : > { %5797 = vmatpush3.bf16.msra.mxu1 %v7438_v60  ;;  %5791 = vmatpush3.bf16.msra.mxu0 %v3435_v54  ;;  %v3287_v15 = vpack.c.bf16 %v3276_v7, %v3275_v59 }
 0xf76   : > { %5940 = vmatprep.subr.msk.bf16.mxu1 %vm1223_vm8, %v3491_v8  ;;  %v6393_v18 = vpop.eup %6392 }
 0xf77   : > { %5792 = vmatprep.mubr.msk.bf16.mxu0 %vm1164_vm7, %v3287_v15  ;;  %v3282_v26 = vmul.f32 %v6393_v18, %v7451_v3  ;;  %v6256_v3 = vld [vmem:[%s8024_s9 + $0x20] sm:$0xff]  }
 0xf78   : > { %v6395_v51 = vpop.eup %6394  ;;  %5793 = vmatmul.mubr.msk.bf16.vlgmr.msra.gmra.mrb[60].mxu0 %vm1164_vm7, %v3288_v12  ;;  %5804 = vmatprep.subr.bf16.mxu0 %v6256_v3 }
 0xf79   : > { %v6397_v46 = vpop.eup %6396  ;;  %5799 = vmatpush3.bf16.msra.mxu1 %v3500_v49  ;;  %v3279_v60 = vmul.f32 %v6395_v51, %v7455_v9  ;;  %5805 = vmatpush3.bf16.msra.mxu0 %v6256_v3 }
 0xf7a   : > { %v6399_v24 = vpop.eup %6398  ;;  %v3281_v17 = vmul.f32 %v6397_v46, %v7447_v5  ;;  %5806 = vmatprep.subr.bf16.mxu0 %v6257_v35 }
 0xf7b   : > { %v3280_v62 = vmul.f32 %v6399_v24, %v7459_v10 }
 0xf7c   : > { %v3290_v31 = vpack.c.bf16 %v3282_v26, %v3281_v17 }
 0xf7d   : > { %v3289_v14 = vpack.c.bf16 %v3280_v62, %v3279_v60  ;;  %5807 = vmatpush3.bf16.msra.mxu0 %v6257_v35 }
 0xf7f   : > { %5800 = vmatprep.mubr.msk.bf16.mxu1 %vm1164_vm7, %v3289_v14  ;;  %v5287_v14 = vld [vmem:[%s8025_s10 + $0x2] ss:$0 sm:$0xff] }
 0xf80   : > { %5801 = vmatmul.mubr.msk.bf16.vlgmr.msra.gmra.mrb[60].mxu1 %vm1164_vm7, %v3290_v31 }
 0xff0   : > { %v5778_v61 = vpop.f32.mrb[56].mxu0 }
 0xff1   : > { %v3341_v2 = vpop.f32.mrb[57].mxu0 }
 0xff2   : > { %v5779_v32 = vpop.f32.mrb[58].mxu0 }
 0xff3   : > { %v3344_v11 = vpop.f32.mrb[59].mxu0 }
0x1047   : > { %v5786_v22 = vpop.f32.mrb[56].mxu1 }
0x1048   : > { %v3406_v9 = vpop.f32.mrb[57].mxu1 }
0x1049   : > { %v5787_v10 = vpop.f32.mrb[58].mxu1 }
0x104a   : > { %v6150_v5 = vpack.i.bf16 %v5787_v10, %v5786_v22  ;;  %v3409_v33 = vpop.f32.mrb[59].mxu1 }
0x104b   : > { %v6160_v37 = vpack.i.bf16 %v3409_v33, %v3406_v9  ;;  %v5794_v39 = vpop.f32.mrb[60].mxu0  ;;  %v6472_v9 = vld [vmem:[#allocation4] sm:$0xff] }
0x104c   : > { %6151 = vrot.lane.b32.xlu0 %v6150_v5, %s6581_s1  ;;  %v3471_v20 = vpop.f32.mrb[61].mxu0  ;;  %v5237_v33 = vld [vmem:[%s8025_s10 + $0x1] ss:$0 sm:$0xff] }
0x104d   : > { %6161 = vrot.lane.b32.xlu1 %v6160_v37, %s6581_s1  ;;  %v5795_v16 = vpop.f32.mrb[62].mxu0  ;;  %v2540_v37 = vadd.f32 %v5237_v33, %v7243_v40  ;;  %v2545_v40 = vadd.f32 %v7239_v38, %v5237_v33 }
0x104e   : > { %v6155_v63 = vpack.i.bf16 %v5795_v16, %v5794_v39  ;;  %v3474_v19 = vpop.f32.mrb[63].mxu0  ;;  %v6473_v39 = vld [vmem:[#allocation4 + $0x18] sm:$0xff]  ;;  %v6474_v16 = vld [vmem:[#allocation4 + $0x8] sm:$0xff] }
0x104f   : > { %v6165_v21 = vpack.i.bf16 %v3474_v19, %v3471_v20  ;;  %v2537_v19 = vadd.f32 %v5237_v33, %v7241_v29  ;;  %v6478_v29 = vld [vmem:[#allocation3 + $0x10] sm:$0xf] }
0x1050   : > { %6156 = vrot.lane.b32.xlu0 %v6155_v63, %s6582_s18  ;;  %v6261_v33 = vld [vmem:[%s8020_s5 + $0x38] sm:$0xff]  }
0x1051   : > { %6166 = vrot.lane.b32.xlu1 %v6165_v21, %s6582_s18  ;;  %v6475_v21 = vld [vmem:[#allocation4 + $0x10] sm:$0xff] }
0x1053   : > { %v5802_v45 = vpop.f32.mrb[60].mxu1 }
0x1054   : > { %v3536_v13 = vpop.f32.mrb[61].mxu1 }
0x1055   : > { %v5803_v48 = vpop.f32.mrb[62].mxu1 }
0x1056   : > { %v6175_v0 = vpack.i.bf16 %v5803_v48, %v5802_v45  ;;  %v3539_v23 = vpop.f32.mrb[63].mxu1  ;;  %v6476_v48 = vld [vmem:[#allocation3 + $0x8] sm:$0xff] }
0x1057   : > { %v6170_v43 = vpack.i.bf16 %v3539_v23, %v3536_v13 }
0x1058   : > { %6176 = vrot.lane.b32.xlu0 %v6175_v0, %s6583_s0  ;;  %v2551_v0 = vadd.f32 %v6476_v48, %v2540_v37 }
0x1059   : > { %6171 = vrot.lane.b32.xlu1 %v6170_v43, %s6583_s0  ;;  %v6477_v43 = vld [vmem:[#allocation3] sm:$0xff] }
0x10be   : > { %v6152_v44 = vpop.permute.xlu0 %6151 }
0x10bf   : > { %v6162_v28 = vpop.permute.xlu1 %6161  ;;  %v6154_v50 = vunpack.i.h.bf16 %v6152_v44  ;;  %v6153_v52 = vunpack.i.l.bf16 %v6152_v44  ;;  %v2550_v44 = vadd.f32 %v6477_v43, %v2537_v19 }
0x10c0   : > { %v6164_v6 = vunpack.i.h.bf16 %v6162_v28  ;;  %v6163_v57 = vunpack.i.l.bf16 %v6162_v28 }
0x10c1   : > { %v3602_v58 = vsel %vm963_vm6, %v5779_v32, %v6154_v50  ;;  %v3601_v1 = vsel %vm963_vm6, %v5778_v61, %v6153_v52  ;;  %v2552_v50 = vadd.f32 %v6478_v29, %v2545_v40  ;;  %v2553_v52 = vsel %vm734_vm4, %v2550_v44, 0.0 }
0x10c2   : > { %v6157_v47 = vpop.permute.xlu0 %6156  ;;  %v3600_v41 = vsel %vm963_vm6, %v3344_v11, %v6164_v6  ;;  %v3599_v59 = vsel %vm963_vm6, %v3341_v2, %v6163_v57 }
0x10c3   : > { %v6167_v27 = vpop.permute.xlu1 %6166  ;;  %v6159_v42 = vunpack.i.h.bf16 %v6157_v47  ;;  %v6158_v34 = vunpack.i.l.bf16 %v6157_v47  ;;  %v2556_v47 = vsel %vm734_vm4, %v2551_v0, 0.0 }
0x10c4   : > { %v6169_v55 = vunpack.i.h.bf16 %v6167_v27  ;;  %v6168_v25 = vunpack.i.l.bf16 %v6167_v27  ;;  %v2559_v27 = vsel %vm2041_vm11, %v2552_v50, 0.0 }
0x10c5   : > { %v3606_v8 = vsel %vm1439_vm9, %v3602_v58, %v6159_v42  ;;  %v3605_v15 = vsel %vm1439_vm9, %v3601_v1, %v6158_v34 }
0x10c6   : > { %v3603_v51 = vsel %vm1439_vm9, %v3599_v59, %v6168_v25  ;;  %v3604_v49 = vsel %vm1439_vm9, %v3600_v41, %v6169_v55 }
0x10ca   : > { %v6177_v4 = vpop.permute.xlu0 %6176 }
0x10cb   : > { %v6179_v7 = vunpack.i.h.bf16 %v6177_v4  ;;  %v6178_v53 = vunpack.i.l.bf16 %v6177_v4  ;;  %v6172_v54 = vpop.permute.xlu1 %6171 }
0x10cc   : > { %v6174_v12 = vunpack.i.h.bf16 %v6172_v54  ;;  %v6173_v18 = vunpack.i.l.bf16 %v6172_v54 }
0x10cd   : > { %v3609_v46 = vsel %vm1441_vm10, %v3605_v15, %v6178_v53  ;;  %v3610_v24 = vsel %vm1441_vm10, %v3606_v8, %v6179_v7 }
0x10ce   : > { %v3612_v26 = vpack.c.bf16 %v3610_v24, %v3609_v46  ;;  %v3607_v60 = vsel %vm1441_vm10, %v3603_v51, %v6173_v18  ;;  %v3608_v62 = vsel %vm1441_vm10, %v3604_v49, %v6174_v12 }
0x10cf   : > { %v3611_v17 = vpack.c.bf16 %v3608_v62, %v3607_v60 }
0x10d1   : > { %5808 = vmatprep.mubr.msk.bf16.mxu0 %vm734_vm4, %v3611_v17 }
0x10d2   : > { %5809 = vmatmul.mubr.msk.bf16.vlgmr.msra.gmra.mrb[64].mxu0 %vm734_vm4, %v3612_v26 }
0x11a5   : > { %v5810_v31 = vpop.f32.mrb[64].mxu0 }
0x11a6   : > { %v3678_v61 = vpop.f32.mrb[65].mxu0  ;;  %v3687_v22 = vadd.f32 %v5810_v31, %v5287_v14 }
0x11a7   : > { %v3679_v2 = vadd.f32 %v5287_v14, %v3678_v61  ;;  %v5811_v32 = vpop.f32.mrb[66].mxu0 }
0x11a8   : > { %v3690_v11 = vadd.f32 %v5811_v32, %v5287_v14  ;;  %v3681_v3 = vpop.f32.mrb[67].mxu0  ;;  %v3695_v45 = vadd.f32 %v6475_v21, %v3687_v22 }
0x11a9   : > { %v3693_v10 = vadd.f32 %v6472_v9, %v3679_v2  ;;  %v3682_v5 = vadd.f32 %v5287_v14, %v3681_v3  ;;  %v6258_v9 = vld [vmem:[%s8022_s7 + $0x30] sm:$0xff]  }
0x11aa   : > { %v3696_v20 = vadd.f32 %v6473_v39, %v3690_v11  ;;  %v3703_v28 = vsel %vm734_vm4, %v3695_v45, 0.0  ;;  %5820 = vmatprep.subr.bf16.mxu0 %v6258_v9 }
0x11ab   : > { %v3694_v35 = vadd.f32 %v6474_v16, %v3682_v5  ;;  %v3697_v63 = vsel %vm734_vm4, %v3693_v10, 0.0  ;;  %5821 = vmatpush3.bf16.msra.mxu0 %v6258_v9  ;;  %v6260_v5 = vld [vmem:[%s8020_s5 + $0x30] sm:$0xff]  }
0x11ac   : > { %3698 = vadd.xlane.f32.xlu1 %v3697_v63  ;;  %v3706_v23 = vsel %vm734_vm4, %v3696_v20, 0.0  ;;  %5812 = vmatprep.subr.bf16.mxu1 %v6260_v5 }
0x11ad   : > { %v3700_v13 = vsel %vm734_vm4, %v3694_v35, 0.0  ;;  %5813 = vmatpush3.bf16.msra.mxu1 %v6260_v5 }
0x11ae   : > { %3701 = vadd.xlane.f32.xlu0 %v3700_v13  ;;  %5814 = vmatprep.subr.bf16.mxu1 %v6261_v33 }
0x11b0   : > { %3707 = vadd.xlane.f32.xlu1 %v3706_v23 }
0x11b1   : > { %5815 = vmatpush3.bf16.msra.mxu1 %v6261_v33 }
0x11b2   : > { %3704 = vadd.xlane.f32.xlu0 %v3703_v28 }
0x11b4   : > { %2557 = vadd.xlane.f32.xlu1 %v2556_v47 }
0x11b6   : > { %2554 = vadd.xlane.f32.xlu0 %v2553_v52  ;;  %v5293_v52 = vld [vmem:[%s8026_s11 + $0x4] ss:$0 sm:$0xff] }
0x11ba   : > { %2560 = vadd.xlane.f32.xlu0 %v2559_v27 }
0x1239   : > { %v3699_v6 = vpop.xlane.xlu1 %3698 }
0x123a   : > { %v3709_v57 = vmul.f32 0.03125, %v3699_v6 }
0x123b   : > { %v3702_v42 = vpop.xlane.xlu0 %3701 }
0x123c   : > { %v7538_v38 = vsub.f32 %v3693_v10, %v3709_v57  ;;  %v3710_v34 = vmul.f32 0.03125, %v3702_v42  ;;  %v6259_v10 = vld [vmem:[%s8022_s7 + $0x38] sm:$0xff]  }
0x123d   : > { %v3708_v55 = vpop.xlane.xlu1 %3707  ;;  %5822 = vmatprep.subr.bf16.mxu0 %v6259_v10 }
0x123e   : > { %v7540_v25 = vsub.f32 %v3694_v35, %v3710_v34  ;;  %v3712_v58 = vmul.f32 0.03125, %v3708_v55  ;;  %v3717_v1 = vmul.f32 %v7538_v38, %v7538_v38  ;;  %5823 = vmatpush3.bf16.msra.mxu0 %v6259_v10  ;;  %v5295_v34 = vld [vmem:[%s8027_s12 + $0x4] ss:$0 sm:$0xff]  ;;  %v5311_v10 = vld [vmem:[%s8023_s8 + $0x3] ss:$0 sm:$0xff] }
0x123f   : > { %v3705_v4 = vpop.xlane.xlu0 %3704 }
0x1240   : > { %v7544_v41 = vsub.f32 %v3696_v20, %v3712_v58  ;;  %v3711_v59 = vmul.f32 0.03125, %v3705_v4  ;;  %v3721_v7 = vsel %vm734_vm4, %v3717_v1, 0.0  ;;  %v3718_v53 = vmul.f32 %v7540_v25, %v7540_v25 }
0x1241   : > { %3722 = vadd.xlane.f32.xlu1 %v3721_v7  ;;  %v2558_v54 = vpop.xlane.xlu1 %2557 }
0x1242   : > { %v7549_v8 = vsub.f32 %v3695_v45, %v3711_v59  ;;  %v2563_v15 = vmul.f32 0.03125, %v2558_v54  ;;  %v3724_v12 = vsel %vm734_vm4, %v3718_v53, 0.0  ;;  %v3720_v18 = vmul.f32 %v7544_v41, %v7544_v41 }
0x1243   : > { %3725 = vadd.xlane.f32.xlu0 %v3724_v12  ;;  %v2555_v51 = vpop.xlane.xlu0 %2554 }
0x1244   : > { %v7554_v49 = vsub.f32 %v2551_v0, %v2563_v15  ;;  %v2562_v46 = vmul.f32 0.03125, %v2555_v51  ;;  %v3719_v24 = vmul.f32 %v7549_v8, %v7549_v8  ;;  %v3730_v62 = vsel %vm734_vm4, %v3720_v18, 0.0 }
0x1246   : > { %v7558_v26 = vsub.f32 %v2550_v44, %v2562_v46  ;;  %v3727_v60 = vsel %vm734_vm4, %v3719_v24, 0.0  ;;  %v2569_v17 = vmul.f32 %v7554_v49, %v7554_v49 }
0x1247   : > { %3728 = vadd.xlane.f32.xlu1 %v3727_v60  ;;  %3731 = vadd.xlane.f32.xlu0 %v3730_v62  ;;  %v2561_v14 = vpop.xlane.xlu0 %2560 }
0x1248   : > { %v2564_v31 = vmul.f32 0.03125, %v2561_v14  ;;  %v2568_v61 = vmul.f32 %v7558_v26, %v7558_v26  ;;  %v2574_v32 = vsel %vm734_vm4, %v2569_v17, 0.0 }
0x124a   : > { %v7566_v2 = vsub.f32 %v2552_v50, %v2564_v31  ;;  %v2571_v11 = vsel %vm734_vm4, %v2568_v61, 0.0 }
0x124b   : > { %2575 = vadd.xlane.f32.xlu0 %v2574_v32  ;;  %2572 = vadd.xlane.f32.xlu1 %v2571_v11 }
0x124c   : > { %v2570_v3 = vmul.f32 %v7566_v2, %v7566_v2 }
0x124e   : > { %v2577_v22 = vsel %vm2041_vm11, %v2570_v3, 0.0 }
0x124f   : > { %2578 = vadd.xlane.f32.xlu1 %v2577_v22 }
0x12ce   : > { %v3723_v37 = vpop.xlane.xlu1 %3722 }
0x12cf   : > { %v3733_v39 = vmul.f32 0.03125, %v3723_v37 }
0x12d0   : > { %v3726_v20 = vpop.xlane.xlu0 %3725 }
0x12d1   : > { %v3737_v16 = vadd.f32 1e-05, %v3733_v39  ;;  %v3734_v35 = vmul.f32 0.03125, %v3726_v20 }
0x12d3   : > { %6400 = vrsqrt.f32 %v3737_v16  ;;  %v3738_v63 = vadd.f32 1e-05, %v3734_v35 }
0x12d4   : > { %v3729_v19 = vpop.xlane.xlu1 %3728  ;;  %v3732_v21 = vpop.xlane.xlu0 %3731 }
0x12d5   : > { %6402 = vrsqrt.f32 %v3738_v63  ;;  %v3735_v45 = vmul.f32 0.03125, %v3729_v19  ;;  %v3736_v13 = vmul.f32 0.03125, %v3732_v21 }
0x12d7   : > { %v3739_v48 = vadd.f32 1e-05, %v3735_v45  ;;  %v3740_v0 = vadd.f32 1e-05, %v3736_v13 }
0x12d8   : > { %v2573_v23 = vpop.xlane.xlu1 %2572  ;;  %v2576_v40 = vpop.xlane.xlu0 %2575 }
0x12d9   : > { %6404 = vrsqrt.f32 %v3739_v48  ;;  %v2580_v43 = vmul.f32 0.03125, %v2573_v23  ;;  %v2581_v44 = vmul.f32 0.03125, %v2576_v40  ;;  %v5301_v48 = vld [vmem:[%s8021_s6 + $0x3] ss:$0 sm:$0xff] }
0x12da   : > { %6406 = vrsqrt.f32 %v3740_v0 }
0x12db   : > { %v2583_v28 = vadd.f32 1e-05, %v2580_v43  ;;  %v2584_v47 = vadd.f32 1e-05, %v2581_v44 }
0x12dc   : > { %v2579_v29 = vpop.xlane.xlu1 %2578 }
0x12dd   : > { %v6401_v50 = vpop.eup %6400  ;;  %6408 = vrsqrt.f32 %v2583_v28  ;;  %v2582_v27 = vmul.f32 0.03125, %v2579_v29 }
0x12de   : > { %v3745_v6 = vmul.f32 %v6401_v50, %v7538_v38  ;;  %6410 = vrsqrt.f32 %v2584_v47 }
0x12df   : > { %v6403_v57 = vpop.eup %6402  ;;  %v2585_v42 = vadd.f32 1e-05, %v2582_v27 }
0x12e0   : > { %v3746_v55 = vmul.f32 %v6403_v57, %v7540_v25  ;;  %v3757_v58 = vmul.f32 %v5293_v52, %v3745_v6  ;;  %v5243_v25 = vld [vmem:[%s8026_s11 + $0x3] ss:$0 sm:$0xff] }
0x12e1   : > { %6412 = vrsqrt.f32 %v2585_v42 }
0x12e2   : > { %v3758_v1 = vmul.f32 %v5293_v52, %v3746_v55  ;;  %v3769_v4 = vadd.f32 %v5295_v34, %v3757_v58 }
0x12e3   : > { %v6405_v59 = vpop.eup %6404 }
0x12e4   : > { %v6407_v7 = vpop.eup %6406  ;;  %v3747_v53 = vmul.f32 %v6405_v59, %v7549_v8  ;;  %v3770_v54 = vadd.f32 %v5295_v34, %v3758_v1  ;;  %5040 = vst.msk [vmem:[#allocation4] sm:$0xff] %vm734_vm4, %v3769_v4 }
0x12e5   : > { %v3748_v38 = vmul.f32 %v6407_v7, %v7544_v41  ;;  %v5245_v41 = vld [vmem:[%s8027_s12 + $0x3] ss:$0 sm:$0xff] }
0x12e6   : > { %v3759_v15 = vmul.f32 %v5293_v52, %v3747_v53  ;;  %v3854_v12 = vpack.c.bf16 %v3770_v54, %v3769_v4  ;;  %5041 = vst.msk [vmem:[#allocation4 + $0x8] sm:$0xff] %vm734_vm4, %v3770_v54 }
0x12e7   : > { %v6409_v18 = vpop.eup %6408  ;;  %v3760_v51 = vmul.f32 %v5293_v52, %v3748_v38 }
0x12e8   : > { %v6411_v46 = vpop.eup %6410  ;;  %v2589_v24 = vmul.f32 %v6409_v18, %v7558_v26  ;;  %5824 = vmatprep.mubr.msk.bf16.mxu0 %vm734_vm4, %v3854_v12  ;;  %v3771_v8 = vadd.f32 %v5295_v34, %v3759_v15 }
0x12e9   : > { %v2590_v60 = vmul.f32 %v6411_v46, %v7554_v49  ;;  %v3772_v62 = vadd.f32 %v5295_v34, %v3760_v51 }
0x12ea   : > { %5042 = vst.msk [vmem:[#allocation4 + $0x10] sm:$0xff] %vm734_vm4, %v3771_v8  ;;  %v2600_v17 = vmul.f32 %v5243_v25, %v2589_v24 }
0x12eb   : > { %v6413_v14 = vpop.eup %6412  ;;  %v3855_v31 = vpack.c.bf16 %v3772_v62, %v3771_v8  ;;  %5043 = vst.msk [vmem:[#allocation4 + $0x18] sm:$0xff] %vm734_vm4, %v3772_v62  ;;  %v2601_v61 = vmul.f32 %v5243_v25, %v2590_v60 }
0x12ec   : > { %v2591_v26 = vmul.f32 %v6413_v14, %v7566_v2  ;;  %v7609_v32 = vadd.f32 %v5245_v41, %v2600_v17 }
0x12ed   : > { %5825 = vmatmul.mubr.msk.bf16.vlgmr.msra.gmra.mrb[68].mxu0 %vm734_vm4, %v3855_v31  ;;  %v7612_v49 = vadd.f32 %v5245_v41, %v2601_v61 }
0x12ee   : > { %v2602_v11 = vmul.f32 %v5243_v25, %v2591_v26 }
0x12ef   : > { %v3773_v3 = vpack.c.bf16 %v7612_v49, %v7609_v32 }
0x12f0   : > { %v7616_v22 = vadd.f32 %v5245_v41, %v2602_v11 }
0x12f1   : > { %5816 = vmatprep.mubr.msk.bf16.mxu1 %vm734_vm4, %v3773_v3 }
0x12f2   : > { %v3774_v9 = vpack.c.bf16 %v7616_v22, %v7616_v22 }
0x12f4   : > { %5817 = vmatmul.mubr.msk.bf16.vlgmr.msra.gmra.mrb[64].mxu1 %vm734_vm4, %v3774_v9 }
0x13c0   : > { %v5826_v2 = vpop.f32.mrb[68].mxu0 }
0x13c1   : > { %v3921_v5 = vpop.f32.mrb[69].mxu0  ;;  %v3930_v37 = vadd.f32 %v5826_v2, %v5311_v10 }
0x13c2   : > { %v5827_v33 = vpop.f32.mrb[70].mxu0  ;;  %v3922_v16 = vadd.f32 %v5311_v10, %v3921_v5 }
0x13c3   : > { %v3933_v39 = vadd.f32 %v5827_v33, %v5311_v10  ;;  %v3924_v20 = vpop.f32.mrb[71].mxu0 }
0x13c4   : > { %v3925_v35 = vadd.f32 %v5311_v10, %v3924_v20 }
0x13c5   : > { %v6185_v63 = vpack.i.bf16 %v3933_v39, %v3930_v37  ;;  %v7625_v19 = vpack.c.bf16 %v3933_v39, %v3930_v37 }
0x13c6   : > { %v6180_v21 = vpack.i.bf16 %v3925_v35, %v3922_v16  ;;  %v7627_v45 = vpack.c.bf16 %v3925_v35, %v3922_v16 }
0x13c7   : > { %6186 = vrot.lane.b32.xlu1 %v6185_v63, %s6577_s17  ;;  %v5818_v13 = vpop.f32.mrb[64].mxu1  ;;  %v4032_v50 = vsel %vm963_vm6, %v7625_v19, 0 }
0x13c8   : > { %6181 = vrot.lane.b32.xlu0 %v6180_v21, %s6577_s17  ;;  %5941 = vmatprep.subr.msk.bf16.mxu1 %vm963_vm6, %v7627_v45  ;;  %v3840_v0 = vpop.f32.mrb[65].mxu1  ;;  %v4029_v23 = vsel %vm963_vm6, %v7627_v45, 0  ;;  %v3849_v52 = vadd.f32 %v5818_v13, %v5301_v48 }
0x13c9   : > { %5829 = vmatpush3.bf16.xpose.msra.mxu1 %v4029_v23  ;;  %v5819_v40 = vpop.f32.mrb[66].mxu1  ;;  %v3841_v44 = vadd.f32 %v5301_v48, %v3840_v0 }
0x13ca   : > { %5942 = vmatprep.subr.msk.bf16.mxu1 %vm963_vm6, %v7625_v19  ;;  %v3843_v43 = vpop.f32.mrb[67].mxu1  ;;  %v4007_v27 = vpack.c.bf16 %v3849_v52, %v3849_v52 }
0x13cb   : > { %6196 = vrot.lane.b32.xlu1 %v6180_v21, %s6578_s19  ;;  %v3844_v28 = vadd.f32 %v5301_v48, %v3843_v43 }
0x13cd   : > { %v6190_v47 = vpack.i.bf16 %v3844_v28, %v3841_v44  ;;  %v4006_v29 = vpack.c.bf16 %v3844_v28, %v3841_v44 }
0x13cf   : > { %6201 = vrot.lane.b32.xlu1 %v6180_v21, %s6579_s20  ;;  %6191 = vrot.lane.b32.xlu0 %v6190_v47, %s6577_s17 }
0x13d0   : > { %5832 = vmatprep.mubr.msk.bf16.mxu1 %vm963_vm6, %v4006_v29 }
0x13d1   : > { %5831 = vmatpush3.bf16.xpose.msra.mxu1 %v4032_v50 }
0x13d3   : > { %6206 = vrot.lane.b32.xlu1 %v6185_v63, %s6578_s19  ;;  %3943 = vrot.lane.b32.xlu0 %v3849_v52, %s6577_s17 }
0x13d7   : > { %6216 = vrot.lane.b32.xlu1 %v6190_v47, %s6578_s19  ;;  %6211 = vrot.lane.b32.xlu0 %v6185_v63, %s6579_s20 }
0x13d8   : > { %5833 = vmatmul.mubr.msk.bf16.vlgmr.msra.gmra.mrb[68].mxu1 %vm963_vm6, %v4007_v27 }
0x13db   : > { %6221 = vrot.lane.b32.xlu1 %v6190_v47, %s6579_s20  ;;  %3952 = vrot.lane.b32.xlu0 %v3849_v52, %s6578_s19  ;;  %s8070_s19 = sld [smem:[#allocation23_spill]] }
0x13df   : > { %3961 = vrot.lane.b32.xlu0 %v3849_v52, %s6579_s20 }
0x1439   : > { %v6187_v6 = vpop.permute.xlu1 %6186 }
0x143a   : > { %v6182_v57 = vpop.permute.xlu0 %6181  ;;  %v6189_v42 = vunpack.i.h.bf16 %v6187_v6  ;;  %v6188_v34 = vunpack.i.l.bf16 %v6187_v6 }
0x143b   : > { %v6184_v55 = vunpack.i.h.bf16 %v6182_v57  ;;  %v6183_v58 = vunpack.i.l.bf16 %v6182_v57 }
0x143c   : > { %v7656_v53 = vpack.c.bf16 %v6189_v42, %v6188_v34 }
0x143d   : > { %v7654_v1 = vpack.c.bf16 %v6184_v55, %v6183_v58  ;;  %v6197_v4 = vpop.permute.xlu1 %6196 }
0x143e   : > { %v6199_v59 = vunpack.i.h.bf16 %v6197_v4  ;;  %v6198_v7 = vunpack.i.l.bf16 %v6197_v4  ;;  %v4092_v31 = vsel %vm963_vm6, %v7656_v53, 0 }
0x143f   : > { %5943 = vmatprep.subr.msk.bf16.mxu0 %vm963_vm6, %v7654_v1  ;;  %v4089_v54 = vsel %vm963_vm6, %v7654_v1, 0 }
0x1440   : > { %v7662_v38 = vpack.c.bf16 %v6199_v59, %v6198_v7  ;;  %5837 = vmatpush3.bf16.xpose.msra.mxu0 %v4089_v54 }
0x1441   : > { %v6202_v15 = vpop.permute.xlu1 %6201  ;;  %5944 = vmatprep.subr.msk.bf16.mxu0 %vm963_vm6, %v7656_v53  ;;  %v6192_v12 = vpop.permute.xlu0 %6191 }
0x1442   : > { %5945 = vmatprep.subr.msk.bf16.mxu1 %vm963_vm6, %v7662_v38  ;;  %v6194_v18 = vunpack.i.h.bf16 %v6192_v12  ;;  %v6193_v51 = vunpack.i.l.bf16 %v6192_v12  ;;  %v6204_v25 = vunpack.i.h.bf16 %v6202_v15  ;;  %v6203_v46 = vunpack.i.l.bf16 %v6202_v15 }
0x1443   : > { %v4149_v24 = vsel %vm963_vm6, %v7662_v38, 0 }
0x1444   : > { %v4008_v8 = vpack.c.bf16 %v6194_v18, %v6193_v51  ;;  %5845 = vmatpush3.bf16.xpose.msra.mxu1 %v4149_v24  ;;  %v7671_v14 = vpack.c.bf16 %v6204_v25, %v6203_v46 }
0x1445   : > { %v6207_v60 = vpop.permute.xlu1 %6206  ;;  %v3944_v62 = vpop.permute.xlu0 %3943 }
0x1446   : > { %v6209_v41 = vunpack.i.h.bf16 %v6207_v60  ;;  %v6208_v17 = vunpack.i.l.bf16 %v6207_v60  ;;  %5840 = vmatprep.mubr.msk.bf16.mxu0 %vm963_vm6, %v4008_v8  ;;  %v4009_v37 = vpack.c.bf16 %v3944_v62, %v3944_v62  ;;  %v4209_v13 = vsel %vm963_vm6, %v7671_v14, 0 }
0x1448   : > { %v7675_v61 = vpack.c.bf16 %v6209_v41, %v6208_v17  ;;  %5839 = vmatpush3.bf16.xpose.msra.mxu0 %v4092_v31  ;;  %v5188_v17 = vld [vmem:[%s8025_s10] ss:$0 sm:$0xff] }
0x1449   : > { %v6217_v26 = vpop.permute.xlu1 %6216  ;;  %5947 = vmatprep.subr.msk.bf16.mxu0 %vm963_vm6, %v7671_v14  ;;  %v6212_v11 = vpop.permute.xlu0 %6211 }
0x144a   : > { %v6219_v3 = vunpack.i.h.bf16 %v6217_v26  ;;  %v6218_v9 = vunpack.i.l.bf16 %v6217_v26  ;;  %5946 = vmatprep.subr.msk.bf16.mxu1 %vm963_vm6, %v7675_v61  ;;  %v6214_v2 = vunpack.i.h.bf16 %v6212_v11  ;;  %v6213_v10 = vunpack.i.l.bf16 %v6212_v11 }
0x144b   : > { %v4152_v5 = vsel %vm963_vm6, %v7675_v61, 0 }
0x144c   : > { %v4010_v33 = vpack.c.bf16 %v6219_v3, %v6218_v9  ;;  %5847 = vmatpush3.bf16.xpose.msra.mxu1 %v4152_v5  ;;  %v7684_v63 = vpack.c.bf16 %v6214_v2, %v6213_v10  ;;  %v1505_v3 = vadd.f32 %v5188_v17, %v6980_v30 }
0x144d   : > { %v6222_v39 = vpop.permute.xlu1 %6221  ;;  %v3953_v20 = vpop.permute.xlu0 %3952 }
0x144e   : > { %v6224_v16 = vunpack.i.h.bf16 %v6222_v39  ;;  %v6223_v35 = vunpack.i.l.bf16 %v6222_v39  ;;  %5848 = vmatprep.mubr.msk.bf16.mxu1 %vm963_vm6, %v4010_v33  ;;  %v4011_v21 = vpack.c.bf16 %v3953_v20, %v3953_v20  ;;  %v4212_v0 = vsel %vm963_vm6, %v7684_v63, 0 }
0x144f   : > { %5841 = vmatmul.mubr.msk.bf16.vlgmr.msra.gmra.mrb[72].mxu0 %vm963_vm6, %v4009_v37  ;;  %v7742_v39 = vadd.f32 %v1505_v3, %v6832_v56 }
0x1450   : > { %v4012_v48 = vpack.c.bf16 %v6224_v16, %v6223_v35  ;;  %5853 = vmatpush3.bf16.xpose.msra.mxu0 %v4209_v13 }
0x1451   : > { %5948 = vmatprep.subr.msk.bf16.mxu0 %vm963_vm6, %v7684_v63  ;;  %v3962_v23 = vpop.permute.xlu0 %3961  ;;  %v1511_v16 = vsel %vm734_vm4, %v7742_v39, 0.0 }
0x1452   : > { %5856 = vmatprep.mubr.msk.bf16.mxu0 %vm963_vm6, %v4012_v48  ;;  %v4013_v40 = vpack.c.bf16 %v3962_v23, %v3962_v23 }
0x1453   : > { %5849 = vmatmul.mubr.msk.bf16.vlgmr.msra.gmra.mrb[72].mxu1 %vm963_vm6, %v4011_v21 }
0x1458   : > { %5855 = vmatpush3.bf16.xpose.msra.mxu0 %v4212_v0 }
0x145f   : > { %5857 = vmatmul.mubr.msk.bf16.vlgmr.msra.gmra.mrb[76].mxu0 %vm963_vm6, %v4013_v40 }
0x14ab   : > { %v5834_v43 = vpop.f32.mrb[68].mxu1 }
0x14ac   : > { %v7696_v44 = vmul.f32 0.35355338, %v5834_v43  ;;  %v4068_v28 = vpop.f32.mrb[69].mxu1 }
0x14ad   : > { %v7698_v47 = vmul.f32 0.35355338, %v4068_v28  ;;  %v5835_v29 = vpop.f32.mrb[70].mxu1 }
0x14ae   : > { %v4071_v50 = vpop.f32.mrb[71].mxu1  ;;  %v4280_v52 = vsel %vm2041_vm11, %v7696_v44, -inf }
0x14af   : > { %v4263_v27 = vmul.f32 0.35355338, %v4071_v50  ;;  %4281 = vmax.xlane.f32.xlu0 %v4280_v52  ;;  %v4274_v6 = vsel %vm734_vm4, %v7698_v47, -inf }
0x14b0   : > { %4275 = vmax.xlane.f32.xlu1 %v4274_v6 }
0x14b1   : > { %v4277_v57 = vsel %vm734_vm4, %v4263_v27, -inf }
0x14b3   : > { %4278 = vmax.xlane.f32.xlu0 %v4277_v57 }
0x1522   : > { %v5842_v42 = vpop.f32.mrb[72].mxu0 }
0x1523   : > { %v7705_v34 = vmul.f32 0.35355338, %v5842_v42  ;;  %v4128_v55 = vpop.f32.mrb[73].mxu0 }
0x1524   : > { %v5843_v58 = vpop.f32.mrb[74].mxu0  ;;  %v7707_v4 = vmul.f32 0.35355338, %v4128_v55 }
0x1525   : > { %v4131_v59 = vpop.f32.mrb[75].mxu0  ;;  %v4289_v7 = vsel %vm2041_vm11, %v7705_v34, -inf }
0x1526   : > { %v5850_v54 = vpop.f32.mrb[72].mxu1  ;;  %4290 = vmax.xlane.f32.xlu1 %v4289_v7  ;;  %v4283_v25 = vsel %vm734_vm4, %v7707_v4, -inf  ;;  %v7715_v46 = vmul.f32 0.35355338, %v4131_v59 }
0x1527   : > { %v4188_v15 = vpop.f32.mrb[73].mxu1  ;;  %v7723_v62 = vmul.f32 0.35355338, %v5850_v54 }
0x1528   : > { %v7711_v12 = vmul.f32 0.35355338, %v4188_v15  ;;  %v5851_v18 = vpop.f32.mrb[74].mxu1  ;;  %v4286_v41 = vsel %vm734_vm4, %v7715_v46, -inf }
0x1529   : > { %v4191_v51 = vpop.f32.mrb[75].mxu1  ;;  %v4298_v31 = vsel %vm2041_vm11, %v7723_v62, -inf }
0x152a   : > { %v7717_v24 = vmul.f32 0.35355338, %v4191_v51  ;;  %v4292_v8 = vsel %vm734_vm4, %v7711_v12, -inf  ;;  %4284 = vmax.xlane.f32.xlu1 %v4283_v25 }
0x152b   : > { %4293 = vmax.xlane.f32.xlu0 %v4292_v8 }
0x152c   : > { %v4295_v60 = vsel %vm734_vm4, %v7717_v24, -inf }
0x152e   : > { %4296 = vmax.xlane.f32.xlu1 %v4295_v60 }
0x152f   : > { %4287 = vmax.xlane.f32.xlu0 %v4286_v41 }
0x1532   : > { %v5858_v26 = vpop.f32.mrb[76].mxu0 }
0x1533   : > { %4299 = vmax.xlane.f32.xlu0 %v4298_v31  ;;  %v4248_v11 = vpop.f32.mrb[77].mxu0  ;;  %v7735_v5 = vmul.f32 0.35355338, %v5858_v26 }
0x1534   : > { %v7733_v9 = vmul.f32 0.35355338, %v4248_v11  ;;  %v5859_v2 = vpop.f32.mrb[78].mxu0 }
0x1535   : > { %v4251_v10 = vpop.f32.mrb[79].mxu0  ;;  %v4307_v30 = vsel %vm2041_vm11, %v7735_v5, -inf }
0x1536   : > { %v7737_v33 = vmul.f32 0.35355338, %v4251_v10  ;;  %v4301_v37 = vsel %vm734_vm4, %v7733_v9, -inf }
0x1537   : > { %4302 = vmax.xlane.f32.xlu1 %v4301_v37 }
0x1538   : > { %v4304_v20 = vsel %vm734_vm4, %v7737_v33, -inf }
0x1539   : > { %4305 = vmax.xlane.f32.xlu0 %v4304_v20 }
0x153b   : > { %4308 = vmax.xlane.f32.xlu1 %v4307_v30 }
0x153c   : > { %v4282_v56 = vpop.xlane.xlu0 %4281 }
0x153d   : > { %1512 = vadd.xlane.f32.xlu0 %v1511_v16  ;;  %v4276_v48 = vpop.xlane.xlu1 %4275 }
0x1540   : > { %v4279_v35 = vpop.xlane.xlu0 %4278 }
0x1541   : > { %v4311_v21 = vsub.f32 %v4263_v27, %v4279_v35 }
0x1543   : > { %v4324_v13 = vmul.f32 1.442695, %v4311_v21 }
0x1545   : > { %6414 = vpow2.f32 %v4324_v13 }
0x154c   : > { %4416 = vrot.lane.b32.xlu1 %v7627_v45, %s6580_s28  ;;  %v4312_v45 = vsub.f32 %v7696_v44, %v4282_v56 }
0x1550   : > { %4418 = vrot.lane.b32.xlu1 %v7625_v19, %s6580_s28  ;;  %v4326_v19 = vmul.f32 1.442695, %v4312_v45 }
0x1552   : > { %6416 = vpow2.f32 %v4326_v19 }
0x1553   : > { %4478 = vrot.lane.b32.xlu0 %v7654_v1, %s6580_s28  ;;  %v4310_v1 = vsub.f32 %v7698_v47, %v4276_v48 }
0x1554   : > { %4480 = vrot.lane.b32.xlu1 %v7656_v53, %s6580_s28  ;;  %v7764_v53 = vpop.eup %6414 }
0x1555   : > { %v4322_v0 = vmul.f32 1.442695, %v4310_v1 }
0x1557   : > { %4540 = vrot.lane.b32.xlu0 %v7662_v38, %s6580_s28  ;;  %6418 = vpow2.f32 %v4322_v0  ;;  %v4349_v38 = vsel %vm734_vm4, %v7764_v53, 0.0 }
0x1558   : > { %4602 = vrot.lane.b32.xlu1 %v7671_v14, %s6580_s28 }
0x155c   : > { %v7768_v14 = vpop.eup %6416 }
0x155d   : > { %v4352_v23 = vsel %vm2041_vm11, %v7768_v14, 0.0 }
0x1561   : > { %v7772_v40 = vpop.eup %6418 }
0x1562   : > { %v4346_v43 = vsel %vm734_vm4, %v7772_v40, 0.0 }
0x1576   : > { %4350 = vadd.xlane.f32.xlu0 %v4349_v38 }
0x157c   : > { %4353 = vadd.xlane.f32.xlu1 %v4352_v23 }
0x1580   : > { %4347 = vadd.xlane.f32.xlu1 %v4346_v43 }
0x15b3   : > { %v4291_v44 = vpop.xlane.xlu1 %4290 }
0x15b4   : > { %v4315_v28 = vsub.f32 %v7705_v34, %v4291_v44 }
0x15b6   : > { %v4332_v47 = vmul.f32 1.442695, %v4315_v28 }
0x15b7   : > { %v4285_v29 = vpop.xlane.xlu1 %4284 }
0x15b8   : > { %6420 = vpow2.f32 %v4332_v47  ;;  %v4294_v50 = vpop.xlane.xlu0 %4293  ;;  %v4313_v52 = vsub.f32 %v7707_v4, %v4285_v29 }
0x15b9   : > { %v4316_v58 = vsub.f32 %v7711_v12, %v4294_v50 }
0x15ba   : > { %v4328_v27 = vmul.f32 1.442695, %v4313_v52 }
0x15bb   : > { %v4297_v6 = vpop.xlane.xlu1 %4296  ;;  %v4334_v54 = vmul.f32 1.442695, %v4316_v58 }
0x15bc   : > { %6422 = vpow2.f32 %v4328_v27  ;;  %v4317_v57 = vsub.f32 %v7717_v24, %v4297_v6  ;;  %v4288_v42 = vpop.xlane.xlu0 %4287 }
0x15bd   : > { %v4314_v15 = vsub.f32 %v7715_v46, %v4288_v42 }
0x15be   : > { %v4336_v55 = vmul.f32 1.442695, %v4317_v57 }
0x15bf   : > { %v4330_v8 = vmul.f32 1.442695, %v4314_v15 }
0x15c0   : > { %6424 = vpow2.f32 %v4336_v55  ;;  %v4300_v59 = vpop.xlane.xlu0 %4299 }
0x15c1   : > { %v4318_v7 = vsub.f32 %v7723_v62, %v4300_v59 }
0x15c2   : > { %v7781_v34 = vpop.eup %6420 }
0x15c3   : > { %v4338_v18 = vmul.f32 1.442695, %v4318_v7  ;;  %v4361_v4 = vsel %vm2041_vm11, %v7781_v34, 0.0 }
0x15c4   : > { %v4303_v51 = vpop.xlane.xlu1 %4302  ;;  %4362 = vadd.xlane.f32.xlu0 %v4361_v4 }
0x15c5   : > { %6426 = vpow2.f32 %v4338_v18  ;;  %v4319_v12 = vsub.f32 %v7733_v9, %v4303_v51 }
0x15c6   : > { %v7786_v25 = vpop.eup %6422  ;;  %v4306_v24 = vpop.xlane.xlu0 %4305  ;;  %6428 = vpow2.f32 %v4334_v54 }
0x15c7   : > { %v4320_v60 = vsub.f32 %v7737_v33, %v4306_v24  ;;  %v4355_v62 = vsel %vm734_vm4, %v7786_v25, 0.0  ;;  %v4340_v31 = vmul.f32 1.442695, %v4319_v12  ;;  %6430 = vpow2.f32 %v4330_v8 }
0x15c8   : > { %v4309_v46 = vpop.xlane.xlu1 %4308  ;;  %4356 = vadd.xlane.f32.xlu0 %v4355_v62 }
0x15c9   : > { %v4321_v41 = vsub.f32 %v7735_v5, %v4309_v46  ;;  %v4342_v11 = vmul.f32 1.442695, %v4320_v60 }
0x15ca   : > { %v7793_v17 = vpop.eup %6424  ;;  %v1513_v26 = vpop.xlane.xlu0 %1512 }
0x15cb   : > { %v4344_v3 = vmul.f32 1.442695, %v4321_v41  ;;  %v4367_v9 = vsel %vm734_vm4, %v7793_v17, 0.0  ;;  %v1514_v23 = vmul.f32 0.03125, %v1513_v26 }
0x15cc   : > { %v4417_v2 = vpop.permute.xlu1 %4416  ;;  %4368 = vadd.xlane.f32.xlu0 %v4367_v9 }
0x15cd   : > { %6432 = vpow2.f32 %v4344_v3  ;;  %5860 = vmatprep.subr.bf16.mxu1 %v4417_v2  ;;  %v7829_v43 = vsub.f32 %v7742_v39, %v1514_v23 }
0x15ce   : > { %6434 = vpow2.f32 %v4340_v31  ;;  %5861 = vmatpush3.bf16.msra.mxu1 %v4417_v2  ;;  %v4479_v10 = vpop.permute.xlu0 %4478 }
0x15cf   : > { %v7797_v33 = vpop.eup %6426  ;;  %6436 = vpow2.f32 %v4342_v11  ;;  %5868 = vmatprep.subr.bf16.mxu0 %v4479_v10  ;;  %v1516_v29 = vmul.f32 %v7829_v43, %v7829_v43 }
0x15d0   : > { %v4370_v5 = vsel %vm2041_vm11, %v7797_v33, 0.0  ;;  %v4419_v37 = vpop.permute.xlu1 %4418  ;;  %5869 = vmatpush3.bf16.msra.mxu0 %v4479_v10  ;;  %v7801_v20 = vpop.eup %6428 }
0x15d1   : > { %4371 = vadd.xlane.f32.xlu1 %v4370_v5  ;;  %5862 = vmatprep.subr.bf16.mxu1 %v4419_v37  ;;  %v4364_v16 = vsel %vm734_vm4, %v7801_v20, 0.0  ;;  %v7805_v35 = vpop.eup %6430  ;;  %v1517_v50 = vsel %vm734_vm4, %v1516_v29, 0.0 }
0x15d2   : > { %5863 = vmatpush3.bf16.msra.mxu1 %v4419_v37  ;;  %v4541_v30 = vpop.permute.xlu0 %4540  ;;  %v4358_v45 = vsel %vm734_vm4, %v7805_v35, 0.0 }
0x15d3   : > { %5876 = vmatprep.subr.bf16.mxu1 %v4541_v30 }
0x15d4   : > { %v4481_v56 = vpop.permute.xlu1 %4480 }
0x15d5   : > { %4365 = vadd.xlane.f32.xlu1 %v4364_v16  ;;  %5870 = vmatprep.subr.bf16.mxu0 %v4481_v56  ;;  %v6262_v16 = vld [vmem:[%s8028_s13] sm:$0xff]  }
0x15d6   : > { %5871 = vmatpush3.bf16.msra.mxu0 %v4481_v56 }
0x15d7   : > { %v7807_v21 = vpop.eup %6432 }
0x15d8   : > { %v7809_v13 = vpop.eup %6434  ;;  %v7813_v48 = vpop.permute.xlu1 %4602  ;;  %v4379_v19 = vsel %vm2041_vm11, %v7807_v21, 0.0 }
0x15d9   : > { %v7817_v1 = vpop.eup %6436  ;;  %4359 = vadd.xlane.f32.xlu1 %v4358_v45  ;;  %4380 = vadd.xlane.f32.xlu0 %v4379_v19  ;;  %v4373_v38 = vsel %vm734_vm4, %v7809_v13, 0.0  ;;  %v5193_v19 = vld [vmem:[%s8026_s11 + $0x1] ss:$0 sm:$0xff] }
0x15da   : > { %5884 = vmatprep.subr.bf16.mxu0 %v7813_v48  ;;  %v4376_v0 = vsel %vm734_vm4, %v7817_v1, 0.0 }
0x15dd   : > { %4377 = vadd.xlane.f32.xlu1 %v4376_v0  ;;  %4374 = vadd.xlane.f32.xlu0 %v4373_v38  ;;  %v5195_v0 = vld [vmem:[%s8027_s12 + $0x1] ss:$0 sm:$0xff] }
0x15ee   : > { %4604 = vrot.lane.b32.xlu1 %v7684_v63, %s6580_s28 }
0x15f3   : > { %4542 = vrot.lane.b32.xlu0 %v7675_v61, %s6580_s28 }
0x1603   : > { %v4351_v44 = vpop.xlane.xlu0 %4350 }
0x1609   : > { %v4354_v28 = vpop.xlane.xlu1 %4353 }
0x160a   : > { %6438 = vrcp.f32 %v4354_v28 }
0x160b   : > { %6440 = vrcp.f32 %v4351_v44 }
0x160d   : > { %v4348_v47 = vpop.xlane.xlu1 %4347 }
0x160e   : > { %6442 = vrcp.f32 %v4348_v47 }
0x1612   : > { %1518 = vadd.xlane.f32.xlu0 %v1517_v50 }
0x1614   : > { %v6439_v63 = vpop.eup %6438 }
0x1615   : > { %v6441_v52 = vpop.eup %6440  ;;  %v4396_v61 = vmul.f32 %v6439_v63, %v7768_v14 }
0x1616   : > { %v4395_v6 = vmul.f32 %v6441_v52, %v7764_v53 }
0x1617   : > { %v4407_v42 = vpack.c.bf16 %v4396_v61, %v4396_v61 }
0x1618   : > { %v6443_v27 = vpop.eup %6442 }
0x1619   : > { %v4394_v39 = vmul.f32 %v6443_v27, %v7772_v40 }
0x161b   : > { %v4406_v57 = vpack.c.bf16 %v4395_v6, %v4394_v39 }
0x161d   : > { %5864 = vmatprep.mubr.msk.bf16.mxu1 %vm734_vm4, %v4406_v57  ;;  %v6264_v57 = vld [vmem:[%s8024_s9 + $0x30] sm:$0xff]  }
0x161e   : > { %5865 = vmatmul.mubr.msk.bf16.vlgmr.msra.gmra.mrb[76].mxu1 %vm734_vm4, %v4407_v42 }
0x161f   : > { %5877 = vmatpush3.bf16.msra.mxu1 %v4541_v30 }
0x1651   : > { %v4363_v55 = vpop.xlane.xlu0 %4362 }
0x1655   : > { %v4357_v58 = vpop.xlane.xlu0 %4356 }
0x1659   : > { %v4369_v59 = vpop.xlane.xlu0 %4368 }
0x165e   : > { %v4372_v7 = vpop.xlane.xlu1 %4371 }
0x165f   : > { %6444 = vrcp.f32 %v4372_v7 }
0x1660   : > { %6446 = vrcp.f32 %v4369_v59  ;;  %v6265_v59 = vld [vmem:[%s8024_s9 + $0x38] sm:$0xff]  }
0x1662   : > { %v4366_v54 = vpop.xlane.xlu1 %4365 }
0x1663   : > { %6448 = vrcp.f32 %v4366_v54 }
0x1664   : > { %6450 = vrcp.f32 %v4363_v55 }
0x1665   : > { %6452 = vrcp.f32 %v4357_v58 }
0x1666   : > { %v4360_v14 = vpop.xlane.xlu1 %4359  ;;  %v4381_v40 = vpop.xlane.xlu0 %4380 }
0x1667   : > { %6454 = vrcp.f32 %v4360_v14 }
0x1668   : > { %6456 = vrcp.f32 %v4381_v40 }
0x1669   : > { %v6445_v53 = vpop.eup %6444 }
0x166a   : > { %v4378_v15 = vpop.xlane.xlu1 %4377  ;;  %v4375_v18 = vpop.xlane.xlu0 %4374  ;;  %v4402_v12 = vmul.f32 %v6445_v53, %v7797_v33 }
0x166b   : > { %v6447_v4 = vpop.eup %6446  ;;  %6458 = vrcp.f32 %v4378_v15 }
0x166c   : > { %6460 = vrcp.f32 %v4375_v18  ;;  %v4401_v62 = vmul.f32 %v6447_v4, %v7793_v17  ;;  %v4411_v11 = vpack.c.bf16 %v4402_v12, %v4402_v12 }
0x166d   : > { %v6449_v51 = vpop.eup %6448 }
0x166e   : > { %v6451_v24 = vpop.eup %6450  ;;  %v4543_v8 = vpop.permute.xlu0 %4542  ;;  %v4400_v60 = vmul.f32 %v6449_v51, %v7801_v20 }
0x166f   : > { %v6453_v46 = vpop.eup %6452  ;;  %5878 = vmatprep.subr.bf16.mxu1 %v4543_v8  ;;  %v4399_v26 = vmul.f32 %v6451_v24, %v7781_v34  ;;  %v4605_v20 = vpop.permute.xlu1 %4604 }
0x1670   : > { %5879 = vmatpush3.bf16.msra.mxu1 %v4543_v8  ;;  %v4410_v41 = vpack.c.bf16 %v4401_v62, %v4400_v60  ;;  %v4397_v3 = vmul.f32 %v6453_v46, %v7786_v25 }
0x1671   : > { %v6455_v31 = vpop.eup %6454  ;;  %v4409_v17 = vpack.c.bf16 %v4399_v26, %v4399_v26  ;;  %5892 = vmatprep.subr.bf16.mxu1 %v6264_v57 }
0x1672   : > { %5880 = vmatprep.mubr.msk.bf16.mxu1 %vm734_vm4, %v4410_v41  ;;  %v4398_v9 = vmul.f32 %v6455_v31, %v7805_v35  ;;  %v6457_v2 = vpop.eup %6456  ;;  %v6263_v35 = vld [vmem:[%s8028_s13 + $0x8] sm:$0xff]  }
0x1673   : > { %5881 = vmatmul.mubr.msk.bf16.vlgmr.msra.gmra.mrb[80].mxu1 %vm734_vm4, %v4411_v11  ;;  %v4405_v25 = vmul.f32 %v6457_v2, %v7807_v21 }
0x1674   : > { %v4408_v10 = vpack.c.bf16 %v4398_v9, %v4397_v3  ;;  %5893 = vmatpush3.bf16.msra.mxu1 %v6264_v57 }
0x1675   : > { %v6459_v33 = vpop.eup %6458  ;;  %v4413_v56 = vpack.c.bf16 %v4405_v25, %v4405_v25  ;;  %5894 = vmatprep.subr.bf16.mxu1 %v6265_v59 }
0x1676   : > { %v6461_v5 = vpop.eup %6460  ;;  %5872 = vmatprep.mubr.msk.bf16.mxu0 %vm734_vm4, %v4408_v10  ;;  %v4404_v37 = vmul.f32 %v6459_v33, %v7817_v1 }
0x1677   : > { %5873 = vmatmul.mubr.msk.bf16.vlgmr.msra.gmra.mrb[80].mxu0 %vm734_vm4, %v4409_v17  ;;  %v4403_v34 = vmul.f32 %v6461_v5, %v7809_v13 }
0x1678   : > { %5885 = vmatpush3.bf16.msra.mxu0 %v7813_v48  ;;  %5895 = vmatpush3.bf16.msra.mxu1 %v6265_v59 }
0x1679   : > { %5886 = vmatprep.subr.bf16.mxu0 %v4605_v20  ;;  %v4412_v30 = vpack.c.bf16 %v4404_v37, %v4403_v34  ;;  %5908 = vmatprep.subr.bf16.mxu1 %v6575_v36 }
0x167b   : > { %5888 = vmatprep.mubr.msk.bf16.mxu0 %vm734_vm4, %v4412_v30 }
0x167c   : > { %5887 = vmatpush3.bf16.msra.mxu0 %v4605_v20 }
0x167d   : > { %5900 = vmatprep.subr.bf16.mxu0 %v6575_v36 }
0x167f   : > { %5889 = vmatmul.mubr.msk.bf16.vlgmr.msra.gmra.mrb[84].mxu0 %vm734_vm4, %v4413_v56 }
0x1680   : > { %5901 = vmatpush3.bf16.msra.mxu0 %v6262_v16  ;;  %5904 = vmatprep.mubr.msk.bf16.mxu0 %vm6576_vm5, %v6575_v36  ;;  %v6266_v16 = vld [vmem:[%s8030_s15] sm:$0xff]  }
0x1681   : > { %5902 = vmatprep.subr.bf16.mxu0 %v6575_v36 }
0x1684   : > { %5903 = vmatpush3.bf16.msra.mxu0 %v6263_v35  ;;  %v6267_v35 = vld [vmem:[%s8030_s15 + $0x8] sm:$0xff]  }
0x169f   : > { %v1519_v21 = vpop.xlane.xlu0 %1518 }
0x16a0   : > { %v1520_v13 = vmul.f32 0.03125, %v1519_v21  ;;  %v5346_v21 = vld [vmem:[%s8029_s14] ss:$0 sm:$0xff] }
0x16a2   : > { %v1521_v45 = vadd.f32 1e-05, %v1520_v13  ;;  %v6268_v13 = vld [vmem:[%s8030_s15 + $0x10] sm:$0xff]  }
0x16a4   : > { %6462 = vrsqrt.f32 %v1521_v45 }
0x16ae   : > { %v6463_v48 = vpop.eup %6462 }
0x16af   : > { %v1523_v1 = vmul.f32 %v6463_v48, %v7829_v43  ;;  %v6269_v48 = vld [vmem:[%s8030_s15 + $0x18] sm:$0xff]  }
0x16b1   : > { %v1532_v38 = vmul.f32 %v5193_v19, %v1523_v1 }
0x16b3   : > { %v7872_v23 = vadd.f32 %v5195_v0, %v1532_v38  ;;  %v5337_v0 = vld [vmem:[%s8025_s10 + $0x3] ss:$0 sm:$0xff] }
0x16b5   : > { %v4852_v44 = vpack.c.bf16 %v7872_v23, %v7872_v23 }
0x16b7   : > { %5905 = vmatmul.mubr.msk.bf16.vlgmr.msra.gmra.mrb[88].mxu0 %vm734_vm4, %v4852_v44 }
0x16f1   : > { %v5866_v28 = vpop.f32.mrb[76].mxu1 }
0x16f2   : > { %v4462_v47 = vpop.f32.mrb[77].mxu1 }
0x16f3   : > { %v5867_v29 = vpop.f32.mrb[78].mxu1 }
0x16f4   : > { %v4465_v50 = vpop.f32.mrb[79].mxu1 }
0x1746   : > { %v5882_v63 = vpop.f32.mrb[80].mxu1 }
0x1747   : > { %v4586_v52 = vpop.f32.mrb[81].mxu1 }
0x1748   : > { %v5883_v27 = vpop.f32.mrb[82].mxu1 }
0x1749   : > { %v4589_v43 = vpop.f32.mrb[83].mxu1 }
0x174a   : > { %v5874_v61 = vpop.f32.mrb[80].mxu0  ;;  %v6230_v39 = vpack.i.bf16 %v4589_v43, %v4586_v52 }
0x174b   : > { %4669 = vrot.lane.b32.xlu1 %v5874_v61, %s6581_s1  ;;  %v4524_v6 = vpop.f32.mrb[81].mxu0 }
0x174c   : > { %v5875_v42 = vpop.f32.mrb[82].mxu0 }
0x174d   : > { %v4527_v55 = vpop.f32.mrb[83].mxu0 }
0x174e   : > { %v6225_v58 = vpack.i.bf16 %v4527_v55, %v4524_v6  ;;  %v5350_v6 = vld [vmem:[%s8070_s19] ss:$0 sm:$0xff] }
0x174f   : > { %4681 = vrot.lane.b32.xlu1 %v5882_v63, %s6582_s18 }
0x1752   : > { %v5890_v7 = vpop.f32.mrb[84].mxu0 }
0x1753   : > { %v4648_v54 = vpop.f32.mrb[85].mxu0  ;;  %6226 = vrot.lane.b32.xlu1 %v6225_v58, %s6581_s1 }
0x1754   : > { %v5891_v14 = vpop.f32.mrb[86].mxu0 }
0x1755   : > { %v4651_v40 = vpop.f32.mrb[87].mxu0 }
0x1756   : > { %v6235_v53 = vpack.i.bf16 %v4651_v40, %v4648_v54 }
0x1757   : > { %6231 = vrot.lane.b32.xlu1 %v6230_v39, %s6582_s18 }
0x175b   : > { %6236 = vrot.lane.b32.xlu1 %v6235_v53, %s6583_s0 }
0x175f   : > { %4693 = vrot.lane.b32.xlu1 %v5890_v7, %s6583_s0 }
0x178a   : > { %v4913_v15 = vpop.f32.mrb[88].mxu0 }
0x178b   : > { %v5906_v18 = vpop.f32.mrb[89].mxu0  ;;  %v4914_v45 = vadd.f32 %v5346_v21, %v4913_v15 }
0x178c   : > { %v4916_v4 = vpop.f32.mrb[90].mxu0 }
0x178d   : > { %v5907_v51 = vpop.f32.mrb[91].mxu0  ;;  %v4919_v19 = vmax.f32 %v4914_v45, 0.0 }
0x178f   : > { %v4920_v1 = vpack.c.bf16 %v4919_v19, %v4919_v19 }
0x17bd   : > { %v4670_v12 = vpop.permute.xlu1 %4669 }
0x17be   : > { %v4700_v17 = vsel %vm963_vm6, %v5866_v28, %v4670_v12 }
0x17c1   : > { %v4682_v24 = vpop.permute.xlu1 %4681 }
0x17c2   : > { %v4703_v34 = vsel %vm1439_vm9, %v4700_v17, %v4682_v24 }
0x17c5   : > { %v6227_v8 = vpop.permute.xlu1 %6226 }
0x17c6   : > { %v6229_v62 = vunpack.i.h.bf16 %v6227_v8  ;;  %v6228_v46 = vunpack.i.l.bf16 %v6227_v8 }
0x17c8   : > { %v4699_v11 = vsel %vm963_vm6, %v4465_v50, %v6229_v62  ;;  %v4698_v3 = vsel %vm963_vm6, %v4462_v47, %v6228_v46 }
0x17c9   : > { %v6232_v60 = vpop.permute.xlu1 %6231 }
0x17ca   : > { %v6234_v41 = vunpack.i.h.bf16 %v6232_v60  ;;  %v6233_v31 = vunpack.i.l.bf16 %v6232_v60 }
0x17cc   : > { %v4702_v10 = vsel %vm1439_vm9, %v4699_v11, %v6234_v41  ;;  %v4701_v33 = vsel %vm1439_vm9, %v4698_v3, %v6233_v31 }
0x17cd   : > { %v6237_v26 = vpop.permute.xlu1 %6236 }
0x17ce   : > { %v6239_v9 = vunpack.i.h.bf16 %v6237_v26  ;;  %v6238_v2 = vunpack.i.l.bf16 %v6237_v26 }
0x17d0   : > { %v4704_v5 = vsel %vm1441_vm10, %v4701_v33, %v6238_v2  ;;  %v4705_v37 = vsel %vm1441_vm10, %v4702_v10, %v6239_v9 }
0x17d1   : > { %v4707_v20 = vpack.c.bf16 %v4705_v37, %v4704_v5  ;;  %v4694_v25 = vpop.permute.xlu1 %4693 }
0x17d2   : > { %v4706_v30 = vsel %vm1441_vm10, %v4703_v34, %v4694_v25 }
0x17d3   : > { %v4708_v56 = vpack.c.bf16 %v4706_v30, %v4706_v30  ;;  %5896 = vmatprep.mubr.msk.bf16.mxu1 %vm734_vm4, %v4707_v20  ;;  %v5343_v20 = vld [vmem:[%s8026_s11 + $0x5] ss:$0 sm:$0xff] }
0x17d5   : > { %5897 = vmatmul.mubr.msk.bf16.vlgmr.msra.gmra.mrb[84].mxu1 %vm734_vm4, %v4708_v56 }
0x17d6   : > { %5909 = vmatpush3.bf16.msra.mxu1 %v6266_v16  ;;  %5916 = vmatprep.mubr.msk.bf16.mxu1 %vm6576_vm5, %v6575_v36  ;;  %v5345_v16 = vld [vmem:[%s8027_s12 + $0x5] ss:$0 sm:$0xff] }
0x17d7   : > { %5910 = vmatprep.subr.bf16.mxu1 %v6575_v36 }
0x17da   : > { %5911 = vmatpush3.bf16.msra.mxu1 %v6267_v35 }
0x17db   : > { %5912 = vmatprep.subr.bf16.mxu1 %v6575_v36 }
0x17de   : > { %5913 = vmatpush3.bf16.msra.mxu1 %v6268_v13 }
0x17df   : > { %5914 = vmatprep.subr.bf16.mxu1 %v6575_v36 }
0x17e2   : > { %5915 = vmatpush3.bf16.msra.mxu1 %v6269_v48 }
0x17e5   : > { %5917 = vmatmul.mubr.msk.bf16.vlgmr.msra.gmra.mrb[88].mxu1 %vm4960_vm12, %v4920_v1 }
0x18a8   : > { %v5898_v38 = vpop.f32.mrb[84].mxu1 }
0x18a9   : > { %v4783_v44 = vadd.f32 %v5898_v38, %v5337_v0  ;;  %v4774_v28 = vpop.f32.mrb[85].mxu1 }
0x18aa   : > { %v4775_v47 = vadd.f32 %v5337_v0, %v4774_v28  ;;  %v5899_v29 = vpop.f32.mrb[86].mxu1 }
0x18ab   : > { %v4790_v50 = vadd.f32 %v4783_v44, %v7616_v22  ;;  %v4777_v63 = vpop.f32.mrb[87].mxu1  ;;  %v5357_v29 = vld [vmem:[%s8026_s11 + $0x2] ss:$0 sm:$0xff] }
0x18ac   : > { %v4788_v52 = vadd.f32 %v4775_v47, %v7609_v32  ;;  %v4778_v27 = vadd.f32 %v5337_v0, %v4777_v63  ;;  %v5359_v63 = vld [vmem:[%s8027_s12 + $0x2] ss:$0 sm:$0xff] }
0x18ad   : > { %v4797_v36 = vsel %vm2041_vm11, %v4790_v50, 0.0 }
0x18ae   : > { %v4789_v43 = vadd.f32 %v4778_v27, %v7612_v49  ;;  %4798 = vadd.xlane.f32.xlu0 %v4797_v36  ;;  %v4791_v61 = vsel %vm734_vm4, %v4788_v52, 0.0  ;;  %v5048_v36 = vld [vmem:[%s8071_s24] sm:$0xff] (!%p5360_p0) }
0x18af   : > { %4792 = vadd.xlane.f32.xlu1 %v4791_v61 }
0x18b0   : > { %v4794_v39 = vsel %vm734_vm4, %v4789_v43, 0.0 }
0x18b2   : > { %4795 = vadd.xlane.f32.xlu0 %v4794_v39  ;;  %v5057_v39 = vlaneseq (!%p5360_p0) }
0x18b8   : > { %v4998_v22 = vpop.f32.mrb[88].mxu1 }
0x18b9   : > { %v4999_v57 = vadd.f32 %v5350_v6, %v4998_v22  ;;  %v5918_v42 = vpop.f32.mrb[89].mxu1  ;;  %v5058_v6 = vand.u32 (!%p5360_p0), 127, %v5057_v39  ;;  %v5060_v22 = vshrl.u32 (!%p5360_p0), %v5057_v39, 7 }
0x18ba   : > { %v5001_v32 = vpop.f32.mrb[90].mxu1 }
0x18bb   : > { %v5004_v55 = vadd.f32 %v4999_v57, %v7872_v23  ;;  %v5919_v58 = vpop.f32.mrb[91].mxu1  ;;  %v5054_v57 = vstv (!%p5360_p0), %s5053_s25  ;;  %v5061_v42 = vsub.s32 (!%p5360_p0), %v5058_v6, %v5060_v22 }
0x18bd   : > { %v5005_v49 = vsel %vm734_vm4, %v5004_v55, 0.0 }
0x18be   : > { %5006 = vadd.xlane.f32.xlu0 %v5005_v49 }
0x193b   : > { %v4799_v59 = vpop.xlane.xlu0 %4798 }
0x193c   : > { %v4802_v7 = vmul.f32 0.03125, %v4799_v59  ;;  %v4793_v54 = vpop.xlane.xlu1 %4792 }
0x193d   : > { %v4800_v14 = vmul.f32 0.03125, %v4793_v54 }
0x193e   : > { %v4805_v40 = vsub.f32 %v4790_v50, %v4802_v7 }
0x193f   : > { %v4803_v53 = vsub.f32 %v4788_v52, %v4800_v14  ;;  %v4796_v15 = vpop.xlane.xlu0 %4795 }
0x1940   : > { %v4801_v18 = vmul.f32 0.03125, %v4796_v15  ;;  %v4808_v4 = vmul.f32 %v4805_v40, %v4805_v40 }
0x1941   : > { %v4806_v24 = vmul.f32 %v4803_v53, %v4803_v53 }
0x1942   : > { %v4804_v51 = vsub.f32 %v4789_v43, %v4801_v18  ;;  %v4815_v12 = vsel %vm2041_vm11, %v4808_v4, 0.0 }
0x1943   : > { %4816 = vadd.xlane.f32.xlu0 %v4815_v12  ;;  %v4809_v23 = vsel %vm734_vm4, %v4806_v24, 0.0 }
0x1944   : > { %v4807_v8 = vmul.f32 %v4804_v51, %v4804_v51 }
0x1946   : > { %v4812_v60 = vsel %vm734_vm4, %v4807_v8, 0.0 }
0x1947   : > { %4810 = vadd.xlane.f32.xlu0 %v4809_v23 }
0x194b   : > { %v5007_v62 = vpop.xlane.xlu0 %5006  ;;  %4813 = vadd.xlane.f32.xlu0 %v4812_v60 }
0x194c   : > { %v5008_v46 = vmul.f32 0.03125, %v5007_v62 }
0x194e   : > { %v5009_v41 = vsub.f32 %v5004_v55, %v5008_v46 }
0x1950   : > { %v5010_v31 = vmul.f32 %v5009_v41, %v5009_v41 }
0x1952   : > { %v5011_v26 = vsel %vm734_vm4, %v5010_v31, 0.0 }
0x1953   : > { %5012 = vadd.xlane.f32.xlu0 %v5011_v26 }
0x19d0   : > { %v4817_v11 = vpop.xlane.xlu0 %4816 }
0x19d1   : > { %v4820_v3 = vmul.f32 0.03125, %v4817_v11 }
0x19d3   : > { %v4823_v9 = vadd.f32 1e-05, %v4820_v3 }
0x19d4   : > { %v4811_v2 = vpop.xlane.xlu0 %4810 }
0x19d5   : > { %6464 = vrsqrt.f32 %v4823_v9  ;;  %v4818_v10 = vmul.f32 0.03125, %v4811_v2 }
0x19d7   : > { %v4821_v33 = vadd.f32 1e-05, %v4818_v10 }
0x19d8   : > { %v4814_v17 = vpop.xlane.xlu0 %4813 }
0x19d9   : > { %6466 = vrsqrt.f32 %v4821_v33  ;;  %v4819_v5 = vmul.f32 0.03125, %v4814_v17 }
0x19db   : > { %v4822_v37 = vadd.f32 1e-05, %v4819_v5 }
0x19dd   : > { %6468 = vrsqrt.f32 %v4822_v37 }
0x19df   : > { %v6465_v34 = vpop.eup %6464 }
0x19e0   : > { %v4829_v25 = vmul.f32 %v6465_v34, %v4805_v40  ;;  %v5013_v30 = vpop.xlane.xlu0 %5012 }
0x19e1   : > { %v5014_v56 = vmul.f32 0.03125, %v5013_v30 }
0x19e2   : > { %v4840_v35 = vmul.f32 %v5343_v20, %v4829_v25 }
0x19e3   : > { %v6467_v21 = vpop.eup %6466  ;;  %v5015_v13 = vadd.f32 1e-05, %v5014_v56 }
0x19e4   : > { %v4851_v45 = vadd.f32 %v5345_v16, %v4840_v35  ;;  %v4827_v48 = vmul.f32 %v6467_v21, %v4803_v53 }
0x19e5   : > { %6470 = vrsqrt.f32 %v5015_v13 }
0x19e6   : > { %5039 = vst.msk [vmem:[#allocation3 + $0x10] sm:$0xf] %vm2041_vm11, %v4851_v45  ;;  %v4838_v19 = vmul.f32 %v5343_v20, %v4827_v48 }
0x19e7   : > { %v6469_v1 = vpop.eup %6468 }
0x19e8   : > { %v4849_v0 = vadd.f32 %v5345_v16, %v4838_v19  ;;  %v4828_v38 = vmul.f32 %v6469_v1, %v4804_v51 }
0x19ea   : > { %5037 = vst.msk [vmem:[#allocation3] sm:$0xff] %vm734_vm4, %v4849_v0  ;;  %v4839_v44 = vmul.f32 %v5343_v20, %v4828_v38 }
0x19ec   : > { %v4850_v28 = vadd.f32 %v5345_v16, %v4839_v44 }
0x19ee   : > { %5038 = vst.msk [vmem:[#allocation3 + $0x8] sm:$0xff] %vm734_vm4, %v4850_v28 }
0x19ef   : > { %v6471_v47 = vpop.eup %6470 }
0x19f0   : > { %v5017_v50 = vmul.f32 %v6471_v47, %v5009_v41  ;;  %5047 = sbr.rel (%p5360_p0) target bundleno = 6796 (0x1a8c), region = 104 }
0x19f2   : > { %v5026_v52 = vmul.f32 %v5357_v29, %v5017_v50 }
0x19f4   : > { %v5035_v27 = vadd.f32 %v5359_v63, %v5026_v52 }
0x19f6   : > { %5036 = vst.msk [vmem:[#allocation2] sm:$0xff] %vm734_vm4, %v5035_v27  ;;  %v5049_v43 = vmul.f32 (!%p5360_p0), %v5048_v36, %v5035_v27 }
0x19f8   : > { %v5050_v61 = vsel %vm734_vm4, %v5049_v43, 0.0 }
0x19f9   : > { %5051 = vadd.xlane.f32.xlu0 %v5050_v61 }
0x1a86   : > { %v5052_v32 = vpop.xlane.xlu0 %5051 }
0x1a87   : > { %v5055_v55 = vadd.f32 %v5054_v57, %v5052_v32 }
0x1a89   : > { %v5062_v58 = vrot.slane %v5055_v55, %v5061_v42 }
0x1a8b   : > { %5065 = vst.msk [vmem:[%s6768_s30] sm:$0x1] %vm5064_vm13, %v5062_v58 }
0x1a8c PF: > { %s5361_s26 = sshll.u32 %s6561_s2, 4  ;;  %s8073_s1 = sld [smem:[#allocation25_spill]] }
0x1a8d   : > { %s5079_s20 = sshll.u32 %s6768_s30, 4  ;;  %s8075_s28 = sand.u32 1, %s6549_s21   ;;  %s5080_s20 = int_to_ptr.vmem [resolvable:$true] %s5079_s20 }
0x1a8e   : > { %s5067_s27 = scalar_lea.sflag [#allocation7], %s8075_s28  ;;  %s6479_s29 = scalar_lea.vmem %s5080_s20, 16 }
0x1a8f   : > { %p6480_p1 = scmp.ne.s32.totalorder %s5080_s20, %s6479_s29  ;;  %s6584_s16 = smov [#allocation6]  }
0x1a90   : > { %s6483_s23 = sshll.u32 %s6584_s16, 4  ;;  %s6484_s23 = int_to_ptr.vmem [resolvable:$false] %s6483_s23 }
0x1a91   : > { %p6481_p2 = pnand %p6480_p1, %p6737_p3  ;;  %s6485_s3 = scalar_lea.vmem %s6484_s23, 32 }
0x1a92   : > { %s8074_s18 = smov %s8073_s1  ;;  %s7965_s0 = scalar_lea.hbm %s8073_s1, %s5361_s26 }
0x1a93   : > { %p6482_p4 = pneg %p6481_p2  ;;  %p6486_p5 = scmp.lt.s32.totalorder %s5080_s20, %s6484_s23 }
0x1a94   : > { %p6487_p6 = scmp.lt.s32.totalorder %s6485_s3, %s6479_s29 }
0x1a96   : > { %p6488_p7 = por %p6487_p6, %p6486_p5 }
0x1a98   : > { %p6489_p8 = pnand %p6488_p7, %p6482_p4 }
0x1a9a   : > { %6492 = shalt.err (!%p6489_p8)
}
0x1a9b   : > { %s6493_s2 = scalar_lea.hbm %s7965_s0, 16  ;;  %s6497_s25 = scalar_lea.hbm %s8074_s18, 32 }
0x1a9c   : > { %p6494_p10 = scmp.ne.s32.totalorder %s7965_s0, %s6493_s2  ;;  %p6498_p13 = scmp.lt.u32.totalorder %s7965_s0, %s8074_s18 }
0x1a9d   : > { %p6499_p0 = scmp.lt.u32.totalorder %s6497_s25, %s6493_s2  ;;  %p6501_p2 = scmp.lt.u32.totalorder %s6493_s2, %s7965_s0 }
0x1a9e   : > { %p6495_p11 = pnand %p6494_p10, %p6737_p3 }
0x1a9f   : > { %p6500_p1 = por %p6499_p0, %p6498_p13 }
0x1aa0   : > { %p6496_p12 = pneg %p6495_p11 }
0x1aa1   : > { %p6502_p4 = por %p6501_p2, %p6500_p1 }
0x1aa3   : > { %p6503_p5 = pnand %p6502_p4, %p6496_p12 }
0x1aa5   : > { %6506 = shalt.err (!%p6503_p5)
}
0x1aa6   : > { %5950 = dma.vmem_to_hbm [thread:$0]  (%p6737_p3), %s5080_s20, 16, %s7965_s0, %s5067_s27  }
0x1aa7 PF: > { %s8076_s19 = sld [smem:[#allocation13_spill]]  ;;  %s8077_s1 = sld [smem:[#allocation9_spill]] }
0x1aad   : > { %p5956_p6 = scmp.ge.s32.totalorder %s8076_s19, 2  ;;  %s5091_s29 = sand.u32 1, %s8077_s1  }
0x1aae   : > { %s5092_s16 = scalar_lea.sflag [#allocation7], %s5091_s29 }
0x1aaf   : > { %p5953_p7 = pnand %p5956_p6, %p6747_p9 }
0x1ab1   : > { %6540 = dma.done.wait (!%p5953_p7), %s5092_s16, 16  }
0x1ab2   : > { %6542 = vsyncadd (!%p5953_p7), %s5092_s16, 4294967280  ;;  %s33_s25 = sadd.s32 1, %s8076_s19   ;;  %s8079_s23 = sld [smem:[#allocation10_spill]] }
0x1ab3   : > { %p30_p8 = scmp.ge.s32.totalorder %s33_s25, 6   ;;  %s8080_s1 = sld [smem:[#allocation18_spill]] }
0x1ab4   : > { %s8081_s22 = sld [smem:[#allocation11_spill]]  ;;  %s8082_s2 = sld [smem:[#allocation12_spill]] }
0x1ab5   : > { %s8083_s0 = sld [smem:[#allocation14_spill]]  ;;  %s8084_s24 = sld [smem:[#allocation16_spill]] }
0x1ab6   : > { %s8085_s20 = smov %s6549_s21  ;;  %32 = sbr.rel (!%p30_p8) target bundleno = 14 (0xe), region = 170 }
0x1ab8   : > { %s8086_s21 = smov %s8079_s23 }
0x1abb   : > { %s8087_s23 = smov %s8083_s0 }
0x1abd   :  { %5096 = vsyncpa [#allocation7], 1 }
0x1abe   :  { %5098 = vsyncpa [#allocation7 + $0x1], 1 }

</bundles_post_ra>
